<compile_context>
chip_gen: v6e
topology: v6e:2x2x1
jax: 0.10.0
libtpu: 0.0.40
codegen_flags: <defaults>
</compile_context>

<pallas_src>
import functools

import numpy as np

import jax
import jax.numpy as jnp
from jax.experimental import pallas as pl
from jax.experimental.pallas import tpu as pltpu


# ----------------------------------------------------------------------------
# Kernel 1: modality projections + multimodal fusion (prologue)
# ----------------------------------------------------------------------------
def _fuse_modalities_kernel(text_ref, vis_ref, aud_ref,
                            wv_ref, bv_ref, wa_ref, ba_ref, o_ref):
    # vision_proj / audio_proj Linears, then fused add with the text nodes.
    vis = (jnp.dot(vis_ref[...], wv_ref[...], preferred_element_type=jnp.float32)
           + bv_ref[...])                                            # [B, D]
    aud = (jnp.dot(aud_ref[...], wa_ref[...], preferred_element_type=jnp.float32)
           + ba_ref[...])                                            # [B, D]
    # text + (text + vis) + (text + aud) == 3*text + vis + aud
    o_ref[...] = 3.0 * text_ref[...] + vis[:, None, :] + aud[:, None, :]


def fuse_modalities(text_nodes, visual_feat, acoustic_feat, wv, bv, wa, ba):
    B, Nt, D = text_nodes.shape
    Dv = wv.shape[0]
    Da = wa.shape[0]
    return pl.pallas_call(
        _fuse_modalities_kernel,
        out_shape=jax.ShapeDtypeStruct((B, Nt, D), jnp.float32),
        in_specs=[
            pl.BlockSpec((B, Nt, D), lambda: (0, 0, 0)),
            pl.BlockSpec((B, Dv), lambda: (0, 0)),
            pl.BlockSpec((B, Da), lambda: (0, 0)),
            pl.BlockSpec((Dv, D), lambda: (0, 0)),
            pl.BlockSpec((1, D), lambda: (0, 0)),
            pl.BlockSpec((Da, D), lambda: (0, 0)),
            pl.BlockSpec((1, D), lambda: (0, 0)),
        ],
        out_specs=pl.BlockSpec((B, Nt, D), lambda: (0, 0, 0)),
    )(text_nodes, visual_feat, acoustic_feat,
      wv, bv.reshape(1, D), wa, ba.reshape(1, D))


# ----------------------------------------------------------------------------
# Kernel 2: multi-head GAT layer — all heads fused, grid over batch only
# ----------------------------------------------------------------------------
def _gat_kernel(h_ref, w_ref, ablk_ref, bias_ref, o_ref, *, n_heads, dh, alpha):
    """One batch element, all heads.

    h_ref:    [1, N, D]        node features
    w_ref:    [D, H*Dh]        all-head projection (lane-dense, one matmul)
    ablk_ref: [H*Dh, 2H]       block-diag attention vecs (src cols 0..H-1,
                               dst cols H..2H-1) -> one MXU matmul replaces
                               2H cross-lane reductions
    bias_ref: [N, N]           additive window-adjacency bias (0 / -1e9)
    o_ref:    [1, N, H*Dh]     concatenated head outputs (lane-dense)
    """
    x = h_ref[0]                                                    # [N, D]
    wh = jnp.dot(x, w_ref[...], preferred_element_type=jnp.float32) # [N, H*Dh]
    f = jnp.dot(wh, ablk_ref[...], preferred_element_type=jnp.float32)  # [N, 2H]
    bias = bias_ref[...]                                            # [N, N]

    outs = []
    for hh in range(n_heads):                                       # static unroll
        f_src = f[:, hh:hh + 1]                                     # [N, 1]
        f_dst = f[:, n_heads + hh:n_heads + hh + 1]                 # [N, 1]
        e = f_src + jnp.transpose(f_dst)                            # [N, N]
        e = jnp.where(e > 0, e, alpha * e)                          # LeakyReLU
        e = e + bias                                                # window mask
        e = e - jnp.max(e, axis=-1, keepdims=True)
        p = jnp.exp(e)
        attn = p * pl.reciprocal(jnp.sum(p, axis=-1, keepdims=True), approx=True)
        whh = wh[:, hh * dh:(hh + 1) * dh]                          # [N, Dh]
        outs.append(jnp.dot(attn, whh, preferred_element_type=jnp.float32))

    out = jnp.concatenate(outs, axis=-1)                            # [N, H*Dh]
    # ELU applied once on the lane-dense concat (exp clamped to avoid overflow
    # in the unselected branch)
    o_ref[0] = jnp.where(out > 0, out, jnp.exp(jnp.minimum(out, 0.0)) - 1.0)


def gat_layer(h, w_all, a_src, a_dst, *, n_heads, window, alpha):
    """h: [B, N, D]; w_all: [D, H*Dh]; a_*: [H, 1, Dh] -> [B, N, H*Dh]."""
    B, N, D = h.shape
    HDh = w_all.shape[1]
    dh = HDh // n_heads

    # windowed adjacency as an additive bias, built at trace time (constant)
    idx = np.arange(N)
    bias = np.where(np.abs(idx[:, None] - idx[None, :]) <= window,
                    0.0, -1e9).astype(np.float32)

    # block-diagonal attention matrix [H*Dh, 2H] so f_src/f_dst for all heads
    # come out of one MXU matmul instead of 2H XLU lane-reductions.
    eye = jnp.eye(n_heads, dtype=jnp.float32)                       # [H, H]
    a_s = a_src[:, 0, :]                                            # [H, Dh]
    a_d = a_dst[:, 0, :]                                            # [H, Dh]
    blk_src = (a_s[:, :, None] * eye[:, None, :]).reshape(HDh, n_heads)
    blk_dst = (a_d[:, :, None] * eye[:, None, :]).reshape(HDh, n_heads)
    a_blk = jnp.concatenate([blk_src, blk_dst], axis=1)             # [H*Dh, 2H]

    kernel = functools.partial(_gat_kernel, n_heads=n_heads, dh=dh, alpha=alpha)
    return pl.pallas_call(
        kernel,
        out_shape=jax.ShapeDtypeStruct((B, N, HDh), jnp.float32),
        grid=(B,),
        in_specs=[
            pl.BlockSpec((1, N, D), lambda b: (b, 0, 0)),
            pl.BlockSpec((D, HDh), lambda b: (0, 0)),
            pl.BlockSpec((HDh, 2 * n_heads), lambda b: (0, 0)),
            pl.BlockSpec((N, N), lambda b: (0, 0)),
        ],
        out_specs=pl.BlockSpec((1, N, HDh), lambda b: (b, 0, 0)),
        compiler_params=pltpu.CompilerParams(
            dimension_semantics=("parallel",)),     # megacore on v7x, neutral else
    )(h, w_all, a_blk, jnp.asarray(bias))


# ----------------------------------------------------------------------------
# Kernel 3: classifier (Linear -> ReLU -> Linear -> Sigmoid) + both CE losses
# ----------------------------------------------------------------------------
def _classifier_ce_kernel(x_ref, w1_ref, b1_ref, w2_ref, b2_ref, lbl_ref, o_ref,
                          *, m1):
    h = (jnp.dot(x_ref[...], w1_ref[...], preferred_element_type=jnp.float32)
         + b1_ref[...])
    h = jnp.maximum(h, 0.0)                                         # ReLU
    z = (jnp.dot(h, w2_ref[...], preferred_element_type=jnp.float32)
         + b2_ref[...])
    p = 1.0 / (1.0 + jnp.exp(-z))                                   # Sigmoid
    # CrossEntropyLoss over the sigmoid outputs (matches the reference module)
    m = jnp.max(p, axis=-1, keepdims=True)
    lse = m + jnp.log(jnp.sum(jnp.exp(p - m), axis=-1, keepdims=True))
    col = jax.lax.broadcasted_iota(jnp.int32, p.shape, 1)           # [M, C]
    onehot = col == lbl_ref[...]                                    # [M, C]
    tgt = jnp.sum(jnp.where(onehot, p, 0.0), axis=-1, keepdims=True)
    row_loss = lse - tgt                                            # [M, 1]
    row = jax.lax.broadcasted_iota(jnp.int32, row_loss.shape, 0)
    first = row < m1                                                # emotion rows
    m_total = row_loss.shape[0]
    o_ref[0, 0] = jnp.sum(jnp.where(first, row_loss, 0.0)) / float(m1)
    o_ref[0, 1] = jnp.sum(jnp.where(first, 0.0, row_loss)) / float(m_total - m1)


def classifier_ce_losses(x1, labels1, x2, labels2, w1, b1, w2, b2):
    """Both heads share the *emotion* classifier (as in the reference).

    Returns (emotion_loss, cause_loss), each a mean CE over its own rows.
    One fused pallas_call over the row-concatenated input.
    """
    M1, D = x1.shape
    M2 = x2.shape[0]
    M = M1 + M2
    C = w2.shape[1]
    x = jnp.concatenate([x1, x2], axis=0)                           # [M, D]
    lbl = jnp.concatenate([labels1, labels2], axis=0).reshape(M, 1).astype(jnp.int32)
    kernel = functools.partial(_classifier_ce_kernel, m1=M1)
    out = pl.pallas_call(
        kernel,
        out_shape=jax.ShapeDtypeStruct((1, 2), jnp.float32),
        in_specs=[
            pl.BlockSpec((M, D), lambda: (0, 0)),
            pl.BlockSpec((D, D), lambda: (0, 0)),
            pl.BlockSpec((1, D), lambda: (0, 0)),
            pl.BlockSpec((D, C), lambda: (0, 0)),
            pl.BlockSpec((1, C), lambda: (0, 0)),
            pl.BlockSpec((M, 1), lambda: (0, 0)),
        ],
        out_specs=pl.BlockSpec(memory_space=pltpu.MemorySpace.SMEM),
    )(x, w1, b1.reshape(1, D), w2, b2.reshape(1, C), lbl)
    return out[0, 0], out[0, 1]


# ----------------------------------------------------------------------------
# Model glue (plain JAX): gathers, slices, concats
# ----------------------------------------------------------------------------
def model_forward(params, causal_text, visual_feat, acoustic_feat,
                  erc_label, ecpe_label, cfg):
    x_ids, m1_ids, m2_ids = cfg["x_ids"], cfg["m1_ids"], cfg["m2_ids"]
    window, alpha, H = cfg["window"], cfg["alpha"], cfg["n_heads"]
    Nx, Nm1, Nm2 = len(x_ids), len(m1_ids), len(m2_ids)

    # --- Causal_Prompt_Encoder, text branch (BERT stubbed by causal_text) ---
    all_ids = jnp.asarray(list(x_ids) + list(m1_ids) + list(m2_ids), jnp.int32)
    text_nodes = causal_text[:, all_ids, :]                 # [B, Nx+Nm1+Nm2, D]

    # --- fused modality projections + multimodal fusion (one Pallas kernel) ---
    fused = fuse_modalities(text_nodes, visual_feat, acoustic_feat,
                            params["vis_w"], params["vis_b"],
                            params["aud_w"], params["aud_b"])
    x_hidden = fused[:, :Nx]
    m1_hidden = fused[:, Nx:Nx + Nm1]
    m2_hidden = fused[:, Nx + Nm1:]

    # --- GAT encoders (head-fused Pallas kernels, lane-dense outputs) ---
    x_hidden = gat_layer(x_hidden, params["x_W"], params["x_asrc"],
                         params["x_adst"], n_heads=H, window=window, alpha=alpha)
    m2_in = jnp.concatenate([x_hidden, m2_hidden], axis=1)
    m2_hidden = gat_layer(m2_in, params["m2_W"], params["m2_asrc"],
                          params["m2_adst"], n_heads=H, window=window, alpha=alpha)
    m1_in = jnp.concatenate([m1_hidden, x_hidden, m2_hidden], axis=1)
    m1_hidden = gat_layer(m1_in, params["m1_W"], params["m1_asrc"],
                          params["m1_adst"], n_heads=H, window=window, alpha=alpha)

    # --- fused classifier + CE losses (one Pallas call for both heads).
    # NB: the reference uses the *emotion* classifier for both predictions,
    # reproduced here. ---
    B, N1, D = m1_hidden.shape
    _, N2, _ = m2_hidden.shape
    emotion_loss, cause_loss = classifier_ce_losses(
        m1_hidden.reshape(B * N1, D), erc_label,
        m2_hidden.reshape(B * N2, D), ecpe_label,
        params["cls_w1"], params["cls_b1"],
        params["cls_w2"], params["cls_b2"])
    return emotion_loss, cause_loss


# ----------------------------------------------------------------------------
# Deterministic parameter / input construction + run
# ----------------------------------------------------------------------------
def make_params(key, *, D, Dv, Da, H, C):
    Dh = D // H
    ks = jax.random.split(key, 16)
    n = lambda k, shape, s=0.02: (s * jax.random.normal(k, shape)).astype(jnp.float32)
    params = {
        "vis_w": n(ks[0], (Dv, D)), "vis_b": n(ks[1], (D,)),
        "aud_w": n(ks[2], (Da, D)), "aud_b": n(ks[3], (D,)),
        "cls_w1": n(ks[4], (D, D)), "cls_b1": n(ks[5], (D,)),
        "cls_w2": n(ks[6], (D, C)), "cls_b2": n(ks[7], (C,)),
    }
    for i, name in enumerate(("x", "m2", "m1")):
        k0, k1, k2 = jax.random.split(ks[8 + i], 3)
        params[f"{name}_W"] = n(k0, (D, H * Dh), 0.05)       # all heads fused: [D, H*Dh]
        params[f"{name}_asrc"] = n(k1, (H, 1, Dh), 0.05)
        params[f"{name}_adst"] = n(k2, (H, 1, Dh), 0.05)
    return params


if __name__ == "__main__":
    B, S, D = 2, 48, 128           # batch, text seq len, common_dim / task_dim
    Dv, Da = 64, 32                # visual_dim, audio_dim
    H = 4                          # GAT n_heads
    C = 8                          # task_pred
    cfg = {
        "x_ids": list(range(1, 17, 2)),        # 8 nodes
        "m1_ids": list(range(18, 34, 2)),      # 8 nodes
        "m2_ids": list(range(34, 48, 2))[:8],  # 8 nodes
        "window": 2,
        "alpha": 0.2,
        "task_pred": C,
        "n_heads": H,
    }
    while len(cfg["m2_ids"]) < 8:
        cfg["m2_ids"].append(cfg["m2_ids"][-1])

    key = jax.random.PRNGKey(0)
    kp, k1, k2, k3, k4, k5 = jax.random.split(key, 6)
    params = make_params(kp, D=D, Dv=Dv, Da=Da, H=H, C=C)

    causal_text = jax.random.normal(k1, (B, S, D), dtype=jnp.float32)   # BERT stub
    visual_feat = jax.random.normal(k2, (B, Dv), dtype=jnp.float32)     # ViT pooler stub
    acoustic_feat = jax.random.normal(k3, (B, Da), dtype=jnp.float32)   # AST pooler stub

    Nx, Nm1, Nm2 = len(cfg["x_ids"]), len(cfg["m1_ids"]), len(cfg["m2_ids"])
    N1 = Nm1 + Nx + (Nx + Nm2)     # nodes going into emotion classifier
    N2 = Nx + Nm2                  # nodes going into cause classifier
    erc_label = jax.random.randint(k4, (B * N1,), 0, C, dtype=jnp.int32)
    ecpe_label = jax.random.randint(k5, (B * N2,), 0, C, dtype=jnp.int32)

    fwd = jax.jit(functools.partial(model_forward, cfg=cfg))
    emotion_loss, cause_loss = fwd(params, causal_text, visual_feat,
                                   acoustic_feat, erc_label, ecpe_label)
    jax.block_until_ready((emotion_loss, cause_loss))
    assert jnp.isfinite(emotion_loss) and jnp.isfinite(cause_loss)
    print("KERNEL_OK")
</pallas_src>

<mosaic_0001>
module attributes {stable_mosaic.version = 11 : i64} {
  func.func @_gat_kernel(%arg0: i32, %arg1: memref<1x8x128xf32, #tpu.memory_space<vmem>>, %arg2: memref<128x128xf32, #tpu.memory_space<vmem>>, %arg3: memref<128x8xf32, #tpu.memory_space<vmem>>, %arg4: memref<8x8xf32, #tpu.memory_space<vmem>>, %arg5: memref<1x8x128xf32, #tpu.memory_space<vmem>>) attributes {dimension_semantics = [#tpu.dimension_semantics<parallel>], iteration_bounds = array<i64: 2>, scalar_prefetch = 0 : i64, scratch_operands = 0 : i64, tpu.core_type = #tpu.core_type<tc>, window_params = [{transform_indices = @transform_0, window_bounds = array<i64: 1, 8, 128>}, {pipeline_mode = #tpu.pipeline_mode<synchronous>, transform_indices = @transform_1, window_bounds = array<i64: 128, 128>}, {pipeline_mode = #tpu.pipeline_mode<synchronous>, transform_indices = @transform_2, window_bounds = array<i64: 128, 8>}, {pipeline_mode = #tpu.pipeline_mode<synchronous>, transform_indices = @transform_3, window_bounds = array<i64: 8, 8>}, {transform_indices = @transform_4, window_bounds = array<i64: 1, 8, 128>}]} {
    %c0 = arith.constant 0 : index
    %c0_0 = arith.constant 0 : index
    %c0_1 = arith.constant 0 : index
    %0 = vector.load %arg1[%c0, %c0_0, %c0_1] : memref<1x8x128xf32, #tpu.memory_space<vmem>>, vector<1x8x128xf32>
    %1 = vector.shape_cast %0 : vector<1x8x128xf32> to vector<8x128xf32>
    %c0_2 = arith.constant 0 : index
    %c0_3 = arith.constant 0 : index
    %2 = vector.load %arg2[%c0_2, %c0_3] : memref<128x128xf32, #tpu.memory_space<vmem>>, vector<128x128xf32>
    %cst = arith.constant dense<0.000000e+00> : vector<8x128xf32>
    %3 = tpu.matmul %1, %2, %cst {dimension_numbers = #tpu.dot_dimension_numbers<[1], [0], [0], [1], [0, 0, 1, 1], [], []>} : vector<8x128xf32>, vector<128x128xf32>, vector<8x128xf32> -> vector<8x128xf32>
    %c0_4 = arith.constant 0 : index
    %c0_5 = arith.constant 0 : index
    %4 = vector.load %arg3[%c0_4, %c0_5] : memref<128x8xf32, #tpu.memory_space<vmem>>, vector<128x8xf32>
    %cst_6 = arith.constant dense<0.000000e+00> : vector<8x8xf32>
    %5 = tpu.matmul %3, %4, %cst_6 {dimension_numbers = #tpu.dot_dimension_numbers<[1], [0], [0], [1], [0, 0, 1, 1], [], []>} : vector<8x128xf32>, vector<128x8xf32>, vector<8x8xf32> -> vector<8x8xf32>
    %c0_7 = arith.constant 0 : index
    %c0_8 = arith.constant 0 : index
    %6 = vector.load %arg4[%c0_7, %c0_8] : memref<8x8xf32, #tpu.memory_space<vmem>>, vector<8x8xf32>
    %7 = vector.extract_strided_slice %5 {offsets = [0, 0], sizes = [8, 1], strides = [1, 1]} : vector<8x8xf32> to vector<8x1xf32>
    %8 = vector.extract_strided_slice %5 {offsets = [0, 4], sizes = [8, 1], strides = [1, 1]} : vector<8x8xf32> to vector<8x1xf32>
    %9 = tpu.transpose %8, [1, 0] : vector<8x1xf32> -> vector<1x8xf32>
    %10 = vector.broadcast %7 : vector<8x1xf32> to vector<8x8xf32>
    %11 = vector.broadcast %9 : vector<1x8xf32> to vector<8x8xf32>
    %12 = arith.addf %10, %11 : vector<8x8xf32>
    %cst_9 = arith.constant 0.000000e+00 : f32
    %13 = vector.broadcast %cst_9 : f32 to vector<8x8xf32>
    %14 = arith.cmpf ogt, %12, %13 : vector<8x8xf32>
    %cst_10 = arith.constant 2.000000e-01 : f32
    %15 = vector.broadcast %cst_10 : f32 to vector<8x8xf32>
    %16 = arith.mulf %15, %12 : vector<8x8xf32>
    %17 = arith.select %14, %12, %16 : vector<8x8xi1>, vector<8x8xf32>
    %18 = arith.addf %17, %6 : vector<8x8xf32>
    %cst_11 = arith.constant dense<0xFF800000> : vector<8xf32>
    %19 = vector.multi_reduction <maximumf>, %18, %cst_11 [1] : vector<8x8xf32> to vector<8xf32>
    %20 = vector.shape_cast %19 : vector<8xf32> to vector<8x1xf32>
    %21 = vector.broadcast %20 : vector<8x1xf32> to vector<8x8xf32>
    %22 = arith.subf %18, %21 : vector<8x8xf32>
    %23 = math.exp %22 : vector<8x8xf32>
    %cst_12 = arith.constant dense<0.000000e+00> : vector<8xf32>
    %24 = vector.multi_reduction <add>, %23, %cst_12 [1] : vector<8x8xf32> to vector<8xf32>
    %25 = vector.shape_cast %24 : vector<8xf32> to vector<8x1xf32>
    %26 = tpu.reciprocal %25 {approx = true} : vector<8x1xf32> -> vector<8x1xf32>
    %27 = vector.broadcast %26 : vector<8x1xf32> to vector<8x8xf32>
    %28 = arith.mulf %23, %27 : vector<8x8xf32>
    %29 = vector.extract_strided_slice %3 {offsets = [0, 0], sizes = [8, 32], strides = [1, 1]} : vector<8x128xf32> to vector<8x32xf32>
    %cst_13 = arith.constant dense<0.000000e+00> : vector<8x32xf32>
    %30 = tpu.matmul %28, %29, %cst_13 {dimension_numbers = #tpu.dot_dimension_numbers<[1], [0], [0], [1], [0, 0, 1, 1], [], []>} : vector<8x8xf32>, vector<8x32xf32>, vector<8x32xf32> -> vector<8x32xf32>
    %31 = vector.extract_strided_slice %5 {offsets = [0, 1], sizes = [8, 1], strides = [1, 1]} : vector<8x8xf32> to vector<8x1xf32>
    %32 = vector.extract_strided_slice %5 {offsets = [0, 5], sizes = [8, 1], strides = [1, 1]} : vector<8x8xf32> to vector<8x1xf32>
    %33 = tpu.transpose %32, [1, 0] : vector<8x1xf32> -> vector<1x8xf32>
    %34 = vector.broadcast %31 : vector<8x1xf32> to vector<8x8xf32>
    %35 = vector.broadcast %33 : vector<1x8xf32> to vector<8x8xf32>
    %36 = arith.addf %34, %35 : vector<8x8xf32>
    %cst_14 = arith.constant 0.000000e+00 : f32
    %37 = vector.broadcast %cst_14 : f32 to vector<8x8xf32>
    %38 = arith.cmpf ogt, %36, %37 : vector<8x8xf32>
    %cst_15 = arith.constant 2.000000e-01 : f32
    %39 = vector.broadcast %cst_15 : f32 to vector<8x8xf32>
    %40 = arith.mulf %39, %36 : vector<8x8xf32>
    %41 = arith.select %38, %36, %40 : vector<8x8xi1>, vector<8x8xf32>
    %42 = arith.addf %41, %6 : vector<8x8xf32>
    %cst_16 = arith.constant dense<0xFF800000> : vector<8xf32>
    %43 = vector.multi_reduction <maximumf>, %42, %cst_16 [1] : vector<8x8xf32> to vector<8xf32>
    %44 = vector.shape_cast %43 : vector<8xf32> to vector<8x1xf32>
    %45 = vector.broadcast %44 : vector<8x1xf32> to vector<8x8xf32>
    %46 = arith.subf %42, %45 : vector<8x8xf32>
    %47 = math.exp %46 : vector<8x8xf32>
    %cst_17 = arith.constant dense<0.000000e+00> : vector<8xf32>
    %48 = vector.multi_reduction <add>, %47, %cst_17 [1] : vector<8x8xf32> to vector<8xf32>
    %49 = vector.shape_cast %48 : vector<8xf32> to vector<8x1xf32>
    %50 = tpu.reciprocal %49 {approx = true} : vector<8x1xf32> -> vector<8x1xf32>
    %51 = vector.broadcast %50 : vector<8x1xf32> to vector<8x8xf32>
    %52 = arith.mulf %47, %51 : vector<8x8xf32>
    %53 = vector.extract_strided_slice %3 {offsets = [0, 32], sizes = [8, 32], strides = [1, 1]} : vector<8x128xf32> to vector<8x32xf32>
    %cst_18 = arith.constant dense<0.000000e+00> : vector<8x32xf32>
    %54 = tpu.matmul %52, %53, %cst_18 {dimension_numbers = #tpu.dot_dimension_numbers<[1], [0], [0], [1], [0, 0, 1, 1], [], []>} : vector<8x8xf32>, vector<8x32xf32>, vector<8x32xf32> -> vector<8x32xf32>
    %55 = vector.extract_strided_slice %5 {offsets = [0, 2], sizes = [8, 1], strides = [1, 1]} : vector<8x8xf32> to vector<8x1xf32>
    %56 = vector.extract_strided_slice %5 {offsets = [0, 6], sizes = [8, 1], strides = [1, 1]} : vector<8x8xf32> to vector<8x1xf32>
    %57 = tpu.transpose %56, [1, 0] : vector<8x1xf32> -> vector<1x8xf32>
    %58 = vector.broadcast %55 : vector<8x1xf32> to vector<8x8xf32>
    %59 = vector.broadcast %57 : vector<1x8xf32> to vector<8x8xf32>
    %60 = arith.addf %58, %59 : vector<8x8xf32>
    %cst_19 = arith.constant 0.000000e+00 : f32
    %61 = vector.broadcast %cst_19 : f32 to vector<8x8xf32>
    %62 = arith.cmpf ogt, %60, %61 : vector<8x8xf32>
    %cst_20 = arith.constant 2.000000e-01 : f32
    %63 = vector.broadcast %cst_20 : f32 to vector<8x8xf32>
    %64 = arith.mulf %63, %60 : vector<8x8xf32>
    %65 = arith.select %62, %60, %64 : vector<8x8xi1>, vector<8x8xf32>
    %66 = arith.addf %65, %6 : vector<8x8xf32>
    %cst_21 = arith.constant dense<0xFF800000> : vector<8xf32>
    %67 = vector.multi_reduction <maximumf>, %66, %cst_21 [1] : vector<8x8xf32> to vector<8xf32>
    %68 = vector.shape_cast %67 : vector<8xf32> to vector<8x1xf32>
    %69 = vector.broadcast %68 : vector<8x1xf32> to vector<8x8xf32>
    %70 = arith.subf %66, %69 : vector<8x8xf32>
    %71 = math.exp %70 : vector<8x8xf32>
    %cst_22 = arith.constant dense<0.000000e+00> : vector<8xf32>
    %72 = vector.multi_reduction <add>, %71, %cst_22 [1] : vector<8x8xf32> to vector<8xf32>
    %73 = vector.shape_cast %72 : vector<8xf32> to vector<8x1xf32>
    %74 = tpu.reciprocal %73 {approx = true} : vector<8x1xf32> -> vector<8x1xf32>
    %75 = vector.broadcast %74 : vector<8x1xf32> to vector<8x8xf32>
    %76 = arith.mulf %71, %75 : vector<8x8xf32>
    %77 = vector.extract_strided_slice %3 {offsets = [0, 64], sizes = [8, 32], strides = [1, 1]} : vector<8x128xf32> to vector<8x32xf32>
    %cst_23 = arith.constant dense<0.000000e+00> : vector<8x32xf32>
    %78 = tpu.matmul %76, %77, %cst_23 {dimension_numbers = #tpu.dot_dimension_numbers<[1], [0], [0], [1], [0, 0, 1, 1], [], []>} : vector<8x8xf32>, vector<8x32xf32>, vector<8x32xf32> -> vector<8x32xf32>
    %79 = vector.extract_strided_slice %5 {offsets = [0, 3], sizes = [8, 1], strides = [1, 1]} : vector<8x8xf32> to vector<8x1xf32>
    %80 = vector.extract_strided_slice %5 {offsets = [0, 7], sizes = [8, 1], strides = [1, 1]} : vector<8x8xf32> to vector<8x1xf32>
    %81 = tpu.transpose %80, [1, 0] : vector<8x1xf32> -> vector<1x8xf32>
    %82 = vector.broadcast %79 : vector<8x1xf32> to vector<8x8xf32>
    %83 = vector.broadcast %81 : vector<1x8xf32> to vector<8x8xf32>
    %84 = arith.addf %82, %83 : vector<8x8xf32>
    %cst_24 = arith.constant 0.000000e+00 : f32
    %85 = vector.broadcast %cst_24 : f32 to vector<8x8xf32>
    %86 = arith.cmpf ogt, %84, %85 : vector<8x8xf32>
    %cst_25 = arith.constant 2.000000e-01 : f32
    %87 = vector.broadcast %cst_25 : f32 to vector<8x8xf32>
    %88 = arith.mulf %87, %84 : vector<8x8xf32>
    %89 = arith.select %86, %84, %88 : vector<8x8xi1>, vector<8x8xf32>
    %90 = arith.addf %89, %6 : vector<8x8xf32>
    %cst_26 = arith.constant dense<0xFF800000> : vector<8xf32>
    %91 = vector.multi_reduction <maximumf>, %90, %cst_26 [1] : vector<8x8xf32> to vector<8xf32>
    %92 = vector.shape_cast %91 : vector<8xf32> to vector<8x1xf32>
    %93 = vector.broadcast %92 : vector<8x1xf32> to vector<8x8xf32>
    %94 = arith.subf %90, %93 : vector<8x8xf32>
    %95 = math.exp %94 : vector<8x8xf32>
    %cst_27 = arith.constant dense<0.000000e+00> : vector<8xf32>
    %96 = vector.multi_reduction <add>, %95, %cst_27 [1] : vector<8x8xf32> to vector<8xf32>
    %97 = vector.shape_cast %96 : vector<8xf32> to vector<8x1xf32>
    %98 = tpu.reciprocal %97 {approx = true} : vector<8x1xf32> -> vector<8x1xf32>
    %99 = vector.broadcast %98 : vector<8x1xf32> to vector<8x8xf32>
    %100 = arith.mulf %95, %99 : vector<8x8xf32>
    %101 = vector.extract_strided_slice %3 {offsets = [0, 96], sizes = [8, 32], strides = [1, 1]} : vector<8x128xf32> to vector<8x32xf32>
    %cst_28 = arith.constant dense<0.000000e+00> : vector<8x32xf32>
    %102 = tpu.matmul %100, %101, %cst_28 {dimension_numbers = #tpu.dot_dimension_numbers<[1], [0], [0], [1], [0, 0, 1, 1], [], []>} : vector<8x8xf32>, vector<8x32xf32>, vector<8x32xf32> -> vector<8x32xf32>
    %103 = tpu.concatenate %30, %54, %78, %102 in 1 : vector<8x32xf32>, vector<8x32xf32>, vector<8x32xf32>, vector<8x32xf32> -> vector<8x128xf32>
    %cst_29 = arith.constant 0.000000e+00 : f32
    %104 = vector.broadcast %cst_29 : f32 to vector<8x128xf32>
    %105 = arith.cmpf ogt, %103, %104 : vector<8x128xf32>
    %cst_30 = arith.constant 0.000000e+00 : f32
    %106 = vector.broadcast %cst_30 : f32 to vector<8x128xf32>
    %107 = arith.minimumf %103, %106 : vector<8x128xf32>
    %108 = math.exp %107 : vector<8x128xf32>
    %cst_31 = arith.constant 1.000000e+00 : f32
    %109 = vector.broadcast %cst_31 : f32 to vector<8x128xf32>
    %110 = arith.subf %108, %109 : vector<8x128xf32>
    %111 = arith.select %105, %103, %110 : vector<8x128xi1>, vector<8x128xf32>
    %c0_32 = arith.constant 0 : index
    %c0_33 = arith.constant 0 : index
    %c0_34 = arith.constant 0 : index
    %112 = vector.load %arg5[%c0_32, %c0_33, %c0_34] : memref<1x8x128xf32, #tpu.memory_space<vmem>>, vector<1x8x128xf32>
    %113 = vector.shape_cast %112 : vector<1x8x128xf32> to vector<8x128xf32>
    %114 = vector.shape_cast %111 : vector<8x128xf32> to vector<1x8x128xf32>
    tpu.vector_store %arg5[%c0_32, %c0_33, %c0_34], %114 {strides = array<i32>} : memref<1x8x128xf32, #tpu.memory_space<vmem>>, vector<1x8x128xf32>,
    return
  }
  func.func @transform_0(%arg0: i32) -> (i32, i32, i32) {
    %c0_i32 = arith.constant 0 : i32
    %c0_i32_0 = arith.constant 0 : i32
    %c0_i32_1 = arith.constant 0 : i32
    return %arg0, %c0_i32, %c0_i32_0 : i32, i32, i32
  }
  func.func @transform_1(%arg0: i32) -> (i32, i32) {
    %c0_i32 = arith.constant 0 : i32
    %c0_i32_0 = arith.constant 0 : i32
    %c0_i32_1 = arith.constant 0 : i32
    return %c0_i32, %c0_i32_0 : i32, i32
  }
  func.func @transform_2(%arg0: i32) -> (i32, i32) {
    %c0_i32 = arith.constant 0 : i32
    %c0_i32_0 = arith.constant 0 : i32
    %c0_i32_1 = arith.constant 0 : i32
    return %c0_i32, %c0_i32_0 : i32, i32
  }
  func.func @transform_3(%arg0: i32) -> (i32, i32) {
    %c0_i32 = arith.constant 0 : i32
    %c0_i32_0 = arith.constant 0 : i32
    %c0_i32_1 = arith.constant 0 : i32
    return %c0_i32, %c0_i32_0 : i32, i32
  }
  func.func @transform_4(%arg0: i32) -> (i32, i32, i32) {
    %c0_i32 = arith.constant 0 : i32
    %c0_i32_0 = arith.constant 0 : i32
    %c0_i32_1 = arith.constant 0 : i32
    return %arg0, %c0_i32, %c0_i32_0 : i32, i32, i32
  }
}

module attributes {stable_mosaic.version = 11 : i64} {
  func.func @_fuse_modalities_kernel(%arg0: memref<2x24x128xf32, #tpu.memory_space<vmem>>, %arg1: memref<2x64xf32, #tpu.memory_space<vmem>>, %arg2: memref<2x32xf32, #tpu.memory_space<vmem>>, %arg3: memref<64x128xf32, #tpu.memory_space<vmem>>, %arg4: memref<1x128xf32, #tpu.memory_space<vmem>>, %arg5: memref<32x128xf32, #tpu.memory_space<vmem>>, %arg6: memref<1x128xf32, #tpu.memory_space<vmem>>, %arg7: memref<2x24x128xf32, #tpu.memory_space<vmem>>) attributes {dimension_semantics = [], scalar_prefetch = 0 : i64, scratch_operands = 0 : i64, tpu.core_type = #tpu.core_type<tc>} {
    %c0 = arith.constant 0 : index
    %c0_0 = arith.constant 0 : index
    %0 = vector.load %arg1[%c0, %c0_0] : memref<2x64xf32, #tpu.memory_space<vmem>>, vector<2x64xf32>
    %c0_1 = arith.constant 0 : index
    %c0_2 = arith.constant 0 : index
    %1 = vector.load %arg3[%c0_1, %c0_2] : memref<64x128xf32, #tpu.memory_space<vmem>>, vector<64x128xf32>
    %cst = arith.constant dense<0.000000e+00> : vector<2x128xf32>
    %2 = tpu.matmul %0, %1, %cst {dimension_numbers = #tpu.dot_dimension_numbers<[1], [0], [0], [1], [0, 0, 1, 1], [], []>} : vector<2x64xf32>, vector<64x128xf32>, vector<2x128xf32> -> vector<2x128xf32>
    %c0_3 = arith.constant 0 : index
    %c0_4 = arith.constant 0 : index
    %3 = vector.load %arg4[%c0_3, %c0_4] : memref<1x128xf32, #tpu.memory_space<vmem>>, vector<1x128xf32>
    %4 = vector.broadcast %3 : vector<1x128xf32> to vector<2x128xf32>
    %5 = arith.addf %2, %4 : vector<2x128xf32>
    %c0_5 = arith.constant 0 : index
    %c0_6 = arith.constant 0 : index
    %6 = vector.load %arg2[%c0_5, %c0_6] : memref<2x32xf32, #tpu.memory_space<vmem>>, vector<2x32xf32>
    %c0_7 = arith.constant 0 : index
    %c0_8 = arith.constant 0 : index
    %7 = vector.load %arg5[%c0_7, %c0_8] : memref<32x128xf32, #tpu.memory_space<vmem>>, vector<32x128xf32>
    %cst_9 = arith.constant dense<0.000000e+00> : vector<2x128xf32>
    %8 = tpu.matmul %6, %7, %cst_9 {dimension_numbers = #tpu.dot_dimension_numbers<[1], [0], [0], [1], [0, 0, 1, 1], [], []>} : vector<2x32xf32>, vector<32x128xf32>, vector<2x128xf32> -> vector<2x128xf32>
    %c0_10 = arith.constant 0 : index
    %c0_11 = arith.constant 0 : index
    %9 = vector.load %arg6[%c0_10, %c0_11] : memref<1x128xf32, #tpu.memory_space<vmem>>, vector<1x128xf32>
    %10 = vector.broadcast %9 : vector<1x128xf32> to vector<2x128xf32>
    %11 = arith.addf %8, %10 : vector<2x128xf32>
    %c0_12 = arith.constant 0 : index
    %c0_13 = arith.constant 0 : index
    %c0_14 = arith.constant 0 : index
    %12 = vector.load %arg0[%c0_12, %c0_13, %c0_14] : memref<2x24x128xf32, #tpu.memory_space<vmem>>, vector<2x24x128xf32>
    %cst_15 = arith.constant 3.000000e+00 : f32
    %13 = vector.broadcast %cst_15 : f32 to vector<2x24x128xf32>
    %14 = arith.mulf %13, %12 : vector<2x24x128xf32>
    %15 = vector.shape_cast %5 : vector<2x128xf32> to vector<2x1x128xf32>
    %16 = vector.broadcast %15 : vector<2x1x128xf32> to vector<2x24x128xf32>
    %17 = arith.addf %14, %16 : vector<2x24x128xf32>
    %18 = vector.shape_cast %11 : vector<2x128xf32> to vector<2x1x128xf32>
    %19 = vector.broadcast %18 : vector<2x1x128xf32> to vector<2x24x128xf32>
    %20 = arith.addf %17, %19 : vector<2x24x128xf32>
    %c0_16 = arith.constant 0 : index
    %c0_17 = arith.constant 0 : index
    %c0_18 = arith.constant 0 : index
    %21 = vector.load %arg7[%c0_16, %c0_17, %c0_18] : memref<2x24x128xf32, #tpu.memory_space<vmem>>, vector<2x24x128xf32>
    tpu.vector_store %arg7[%c0_16, %c0_17, %c0_18], %20 {strides = array<i32>} : memref<2x24x128xf32, #tpu.memory_space<vmem>>, vector<2x24x128xf32>,
    return
  }
}

module attributes {stable_mosaic.version = 11 : i64} {
  func.func @_gat_kernel(%arg0: i32, %arg1: memref<1x16x128xf32, #tpu.memory_space<vmem>>, %arg2: memref<128x128xf32, #tpu.memory_space<vmem>>, %arg3: memref<128x8xf32, #tpu.memory_space<vmem>>, %arg4: memref<16x16xf32, #tpu.memory_space<vmem>>, %arg5: memref<1x16x128xf32, #tpu.memory_space<vmem>>) attributes {dimension_semantics = [#tpu.dimension_semantics<parallel>], iteration_bounds = array<i64: 2>, scalar_prefetch = 0 : i64, scratch_operands = 0 : i64, tpu.core_type = #tpu.core_type<tc>, window_params = [{transform_indices = @transform_0, window_bounds = array<i64: 1, 16, 128>}, {pipeline_mode = #tpu.pipeline_mode<synchronous>, transform_indices = @transform_1, window_bounds = array<i64: 128, 128>}, {pipeline_mode = #tpu.pipeline_mode<synchronous>, transform_indices = @transform_2, window_bounds = array<i64: 128, 8>}, {pipeline_mode = #tpu.pipeline_mode<synchronous>, transform_indices = @transform_3, window_bounds = array<i64: 16, 16>}, {transform_indices = @transform_4, window_bounds = array<i64: 1, 16, 128>}]} {
    %c0 = arith.constant 0 : index
    %c0_0 = arith.constant 0 : index
    %c0_1 = arith.constant 0 : index
    %0 = vector.load %arg1[%c0, %c0_0, %c0_1] : memref<1x16x128xf32, #tpu.memory_space<vmem>>, vector<1x16x128xf32>
    %1 = vector.shape_cast %0 : vector<1x16x128xf32> to vector<16x128xf32>
    %c0_2 = arith.constant 0 : index
    %c0_3 = arith.constant 0 : index
    %2 = vector.load %arg2[%c0_2, %c0_3] : memref<128x128xf32, #tpu.memory_space<vmem>>, vector<128x128xf32>
    %cst = arith.constant dense<0.000000e+00> : vector<16x128xf32>
    %3 = tpu.matmul %1, %2, %cst {dimension_numbers = #tpu.dot_dimension_numbers<[1], [0], [0], [1], [0, 0, 1, 1], [], []>} : vector<16x128xf32>, vector<128x128xf32>, vector<16x128xf32> -> vector<16x128xf32>
    %c0_4 = arith.constant 0 : index
    %c0_5 = arith.constant 0 : index
    %4 = vector.load %arg3[%c0_4, %c0_5] : memref<128x8xf32, #tpu.memory_space<vmem>>, vector<128x8xf32>
    %cst_6 = arith.constant dense<0.000000e+00> : vector<16x8xf32>
    %5 = tpu.matmul %3, %4, %cst_6 {dimension_numbers = #tpu.dot_dimension_numbers<[1], [0], [0], [1], [0, 0, 1, 1], [], []>} : vector<16x128xf32>, vector<128x8xf32>, vector<16x8xf32> -> vector<16x8xf32>
    %c0_7 = arith.constant 0 : index
    %c0_8 = arith.constant 0 : index
    %6 = vector.load %arg4[%c0_7, %c0_8] : memref<16x16xf32, #tpu.memory_space<vmem>>, vector<16x16xf32>
    %7 = vector.extract_strided_slice %5 {offsets = [0, 0], sizes = [16, 1], strides = [1, 1]} : vector<16x8xf32> to vector<16x1xf32>
    %8 = vector.extract_strided_slice %5 {offsets = [0, 4], sizes = [16, 1], strides = [1, 1]} : vector<16x8xf32> to vector<16x1xf32>
    %9 = tpu.transpose %8, [1, 0] : vector<16x1xf32> -> vector<1x16xf32>
    %10 = vector.broadcast %7 : vector<16x1xf32> to vector<16x16xf32>
    %11 = vector.broadcast %9 : vector<1x16xf32> to vector<16x16xf32>
    %12 = arith.addf %10, %11 : vector<16x16xf32>
    %cst_9 = arith.constant 0.000000e+00 : f32
    %13 = vector.broadcast %cst_9 : f32 to vector<16x16xf32>
    %14 = arith.cmpf ogt, %12, %13 : vector<16x16xf32>
    %cst_10 = arith.constant 2.000000e-01 : f32
    %15 = vector.broadcast %cst_10 : f32 to vector<16x16xf32>
    %16 = arith.mulf %15, %12 : vector<16x16xf32>
    %17 = arith.select %14, %12, %16 : vector<16x16xi1>, vector<16x16xf32>
    %18 = arith.addf %17, %6 : vector<16x16xf32>
    %cst_11 = arith.constant dense<0xFF800000> : vector<16xf32>
    %19 = vector.multi_reduction <maximumf>, %18, %cst_11 [1] : vector<16x16xf32> to vector<16xf32>
    %20 = vector.shape_cast %19 : vector<16xf32> to vector<16x1xf32>
    %21 = vector.broadcast %20 : vector<16x1xf32> to vector<16x16xf32>
    %22 = arith.subf %18, %21 : vector<16x16xf32>
    %23 = math.exp %22 : vector<16x16xf32>
    %cst_12 = arith.constant dense<0.000000e+00> : vector<16xf32>
    %24 = vector.multi_reduction <add>, %23, %cst_12 [1] : vector<16x16xf32> to vector<16xf32>
    %25 = vector.shape_cast %24 : vector<16xf32> to vector<16x1xf32>
    %26 = tpu.reciprocal %25 {approx = true} : vector<16x1xf32> -> vector<16x1xf32>
    %27 = vector.broadcast %26 : vector<16x1xf32> to vector<16x16xf32>
    %28 = arith.mulf %23, %27 : vector<16x16xf32>
    %29 = vector.extract_strided_slice %3 {offsets = [0, 0], sizes = [16, 32], strides = [1, 1]} : vector<16x128xf32> to vector<16x32xf32>
    %cst_13 = arith.constant dense<0.000000e+00> : vector<16x32xf32>
    %30 = tpu.matmul %28, %29, %cst_13 {dimension_numbers = #tpu.dot_dimension_numbers<[1], [0], [0], [1], [0, 0, 1, 1], [], []>} : vector<16x16xf32>, vector<16x32xf32>, vector<16x32xf32> -> vector<16x32xf32>
    %31 = vector.extract_strided_slice %5 {offsets = [0, 1], sizes = [16, 1], strides = [1, 1]} : vector<16x8xf32> to vector<16x1xf32>
    %32 = vector.extract_strided_slice %5 {offsets = [0, 5], sizes = [16, 1], strides = [1, 1]} : vector<16x8xf32> to vector<16x1xf32>
    %33 = tpu.transpose %32, [1, 0] : vector<16x1xf32> -> vector<1x16xf32>
    %34 = vector.broadcast %31 : vector<16x1xf32> to vector<16x16xf32>
    %35 = vector.broadcast %33 : vector<1x16xf32> to vector<16x16xf32>
    %36 = arith.addf %34, %35 : vector<16x16xf32>
    %cst_14 = arith.constant 0.000000e+00 : f32
    %37 = vector.broadcast %cst_14 : f32 to vector<16x16xf32>
    %38 = arith.cmpf ogt, %36, %37 : vector<16x16xf32>
    %cst_15 = arith.constant 2.000000e-01 : f32
    %39 = vector.broadcast %cst_15 : f32 to vector<16x16xf32>
    %40 = arith.mulf %39, %36 : vector<16x16xf32>
    %41 = arith.select %38, %36, %40 : vector<16x16xi1>, vector<16x16xf32>
    %42 = arith.addf %41, %6 : vector<16x16xf32>
    %cst_16 = arith.constant dense<0xFF800000> : vector<16xf32>
    %43 = vector.multi_reduction <maximumf>, %42, %cst_16 [1] : vector<16x16xf32> to vector<16xf32>
    %44 = vector.shape_cast %43 : vector<16xf32> to vector<16x1xf32>
    %45 = vector.broadcast %44 : vector<16x1xf32> to vector<16x16xf32>
    %46 = arith.subf %42, %45 : vector<16x16xf32>
    %47 = math.exp %46 : vector<16x16xf32>
    %cst_17 = arith.constant dense<0.000000e+00> : vector<16xf32>
    %48 = vector.multi_reduction <add>, %47, %cst_17 [1] : vector<16x16xf32> to vector<16xf32>
    %49 = vector.shape_cast %48 : vector<16xf32> to vector<16x1xf32>
    %50 = tpu.reciprocal %49 {approx = true} : vector<16x1xf32> -> vector<16x1xf32>
    %51 = vector.broadcast %50 : vector<16x1xf32> to vector<16x16xf32>
    %52 = arith.mulf %47, %51 : vector<16x16xf32>
    %53 = vector.extract_strided_slice %3 {offsets = [0, 32], sizes = [16, 32], strides = [1, 1]} : vector<16x128xf32> to vector<16x32xf32>
    %cst_18 = arith.constant dense<0.000000e+00> : vector<16x32xf32>
    %54 = tpu.matmul %52, %53, %cst_18 {dimension_numbers = #tpu.dot_dimension_numbers<[1], [0], [0], [1], [0, 0, 1, 1], [], []>} : vector<16x16xf32>, vector<16x32xf32>, vector<16x32xf32> -> vector<16x32xf32>
    %55 = vector.extract_strided_slice %5 {offsets = [0, 2], sizes = [16, 1], strides = [1, 1]} : vector<16x8xf32> to vector<16x1xf32>
    %56 = vector.extract_strided_slice %5 {offsets = [0, 6], sizes = [16, 1], strides = [1, 1]} : vector<16x8xf32> to vector<16x1xf32>
    %57 = tpu.transpose %56, [1, 0] : vector<16x1xf32> -> vector<1x16xf32>
    %58 = vector.broadcast %55 : vector<16x1xf32> to vector<16x16xf32>
    %59 = vector.broadcast %57 : vector<1x16xf32> to vector<16x16xf32>
    %60 = arith.addf %58, %59 : vector<16x16xf32>
    %cst_19 = arith.constant 0.000000e+00 : f32
    %61 = vector.broadcast %cst_19 : f32 to vector<16x16xf32>
    %62 = arith.cmpf ogt, %60, %61 : vector<16x16xf32>
    %cst_20 = arith.constant 2.000000e-01 : f32
    %63 = vector.broadcast %cst_20 : f32 to vector<16x16xf32>
    %64 = arith.mulf %63, %60 : vector<16x16xf32>
    %65 = arith.select %62, %60, %64 : vector<16x16xi1>, vector<16x16xf32>
    %66 = arith.addf %65, %6 : vector<16x16xf32>
    %cst_21 = arith.constant dense<0xFF800000> : vector<16xf32>
    %67 = vector.multi_reduction <maximumf>, %66, %cst_21 [1] : vector<16x16xf32> to vector<16xf32>
    %68 = vector.shape_cast %67 : vector<16xf32> to vector<16x1xf32>
    %69 = vector.broadcast %68 : vector<16x1xf32> to vector<16x16xf32>
    %70 = arith.subf %66, %69 : vector<16x16xf32>
    %71 = math.exp %70 : vector<16x16xf32>
    %cst_22 = arith.constant dense<0.000000e+00> : vector<16xf32>
    %72 = vector.multi_reduction <add>, %71, %cst_22 [1] : vector<16x16xf32> to vector<16xf32>
    %73 = vector.shape_cast %72 : vector<16xf32> to vector<16x1xf32>
    %74 = tpu.reciprocal %73 {approx = true} : vector<16x1xf32> -> vector<16x1xf32>
    %75 = vector.broadcast %74 : vector<16x1xf32> to vector<16x16xf32>
    %76 = arith.mulf %71, %75 : vector<16x16xf32>
    %77 = vector.extract_strided_slice %3 {offsets = [0, 64], sizes = [16, 32], strides = [1, 1]} : vector<16x128xf32> to vector<16x32xf32>
    %cst_23 = arith.constant dense<0.000000e+00> : vector<16x32xf32>
    %78 = tpu.matmul %76, %77, %cst_23 {dimension_numbers = #tpu.dot_dimension_numbers<[1], [0], [0], [1], [0, 0, 1, 1], [], []>} : vector<16x16xf32>, vector<16x32xf32>, vector<16x32xf32> -> vector<16x32xf32>
    %79 = vector.extract_strided_slice %5 {offsets = [0, 3], sizes = [16, 1], strides = [1, 1]} : vector<16x8xf32> to vector<16x1xf32>
    %80 = vector.extract_strided_slice %5 {offsets = [0, 7], sizes = [16, 1], strides = [1, 1]} : vector<16x8xf32> to vector<16x1xf32>
    %81 = tpu.transpose %80, [1, 0] : vector<16x1xf32> -> vector<1x16xf32>
    %82 = vector.broadcast %79 : vector<16x1xf32> to vector<16x16xf32>
    %83 = vector.broadcast %81 : vector<1x16xf32> to vector<16x16xf32>
    %84 = arith.addf %82, %83 : vector<16x16xf32>
    %cst_24 = arith.constant 0.000000e+00 : f32
    %85 = vector.broadcast %cst_24 : f32 to vector<16x16xf32>
    %86 = arith.cmpf ogt, %84, %85 : vector<16x16xf32>
    %cst_25 = arith.constant 2.000000e-01 : f32
    %87 = vector.broadcast %cst_25 : f32 to vector<16x16xf32>
    %88 = arith.mulf %87, %84 : vector<16x16xf32>
    %89 = arith.select %86, %84, %88 : vector<16x16xi1>, vector<16x16xf32>
    %90 = arith.addf %89, %6 : vector<16x16xf32>
    %cst_26 = arith.constant dense<0xFF800000> : vector<16xf32>
    %91 = vector.multi_reduction <maximumf>, %90, %cst_26 [1] : vector<16x16xf32> to vector<16xf32>
    %92 = vector.shape_cast %91 : vector<16xf32> to vector<16x1xf32>
    %93 = vector.broadcast %92 : vector<16x1xf32> to vector<16x16xf32>
    %94 = arith.subf %90, %93 : vector<16x16xf32>
    %95 = math.exp %94 : vector<16x16xf32>
    %cst_27 = arith.constant dense<0.000000e+00> : vector<16xf32>
    %96 = vector.multi_reduction <add>, %95, %cst_27 [1] : vector<16x16xf32> to vector<16xf32>
    %97 = vector.shape_cast %96 : vector<16xf32> to vector<16x1xf32>
    %98 = tpu.reciprocal %97 {approx = true} : vector<16x1xf32> -> vector<16x1xf32>
    %99 = vector.broadcast %98 : vector<16x1xf32> to vector<16x16xf32>
    %100 = arith.mulf %95, %99 : vector<16x16xf32>
    %101 = vector.extract_strided_slice %3 {offsets = [0, 96], sizes = [16, 32], strides = [1, 1]} : vector<16x128xf32> to vector<16x32xf32>
    %cst_28 = arith.constant dense<0.000000e+00> : vector<16x32xf32>
    %102 = tpu.matmul %100, %101, %cst_28 {dimension_numbers = #tpu.dot_dimension_numbers<[1], [0], [0], [1], [0, 0, 1, 1], [], []>} : vector<16x16xf32>, vector<16x32xf32>, vector<16x32xf32> -> vector<16x32xf32>
    %103 = tpu.concatenate %30, %54, %78, %102 in 1 : vector<16x32xf32>, vector<16x32xf32>, vector<16x32xf32>, vector<16x32xf32> -> vector<16x128xf32>
    %cst_29 = arith.constant 0.000000e+00 : f32
    %104 = vector.broadcast %cst_29 : f32 to vector<16x128xf32>
    %105 = arith.cmpf ogt, %103, %104 : vector<16x128xf32>
    %cst_30 = arith.constant 0.000000e+00 : f32
    %106 = vector.broadcast %cst_30 : f32 to vector<16x128xf32>
    %107 = arith.minimumf %103, %106 : vector<16x128xf32>
    %108 = math.exp %107 : vector<16x128xf32>
    %cst_31 = arith.constant 1.000000e+00 : f32
    %109 = vector.broadcast %cst_31 : f32 to vector<16x128xf32>
    %110 = arith.subf %108, %109 : vector<16x128xf32>
    %111 = arith.select %105, %103, %110 : vector<16x128xi1>, vector<16x128xf32>
    %c0_32 = arith.constant 0 : index
    %c0_33 = arith.constant 0 : index
    %c0_34 = arith.constant 0 : index
    %112 = vector.load %arg5[%c0_32, %c0_33, %c0_34] : memref<1x16x128xf32, #tpu.memory_space<vmem>>, vector<1x16x128xf32>
    %113 = vector.shape_cast %112 : vector<1x16x128xf32> to vector<16x128xf32>
    %114 = vector.shape_cast %111 : vector<16x128xf32> to vector<1x16x128xf32>
    tpu.vector_store %arg5[%c0_32, %c0_33, %c0_34], %114 {strides = array<i32>} : memref<1x16x128xf32, #tpu.memory_space<vmem>>, vector<1x16x128xf32>,
    return
  }
  func.func @transform_0(%arg0: i32) -> (i32, i32, i32) {
    %c0_i32 = arith.constant 0 : i32
    %c0_i32_0 = arith.constant 0 : i32
    %c0_i32_1 = arith.constant 0 : i32
    return %arg0, %c0_i32, %c0_i32_0 : i32, i32, i32
  }
  func.func @transform_1(%arg0: i32) -> (i32, i32) {
    %c0_i32 = arith.constant 0 : i32
    %c0_i32_0 = arith.constant 0 : i32
    %c0_i32_1 = arith.constant 0 : i32
    return %c0_i32, %c0_i32_0 : i32, i32
  }
  func.func @transform_2(%arg0: i32) -> (i32, i32) {
    %c0_i32 = arith.constant 0 : i32
    %c0_i32_0 = arith.constant 0 : i32
    %c0_i32_1 = arith.constant 0 : i32
    return %c0_i32, %c0_i32_0 : i32, i32
  }
  func.func @transform_3(%arg0: i32) -> (i32, i32) {
    %c0_i32 = arith.constant 0 : i32
    %c0_i32_0 = arith.constant 0 : i32
    %c0_i32_1 = arith.constant 0 : i32
    return %c0_i32, %c0_i32_0 : i32, i32
  }
  func.func @transform_4(%arg0: i32) -> (i32, i32, i32) {
    %c0_i32 = arith.constant 0 : i32
    %c0_i32_0 = arith.constant 0 : i32
    %c0_i32_1 = arith.constant 0 : i32
    return %arg0, %c0_i32, %c0_i32_0 : i32, i32, i32
  }
}

module attributes {stable_mosaic.version = 11 : i64} {
  func.func @_gat_kernel(%arg0: i32, %arg1: memref<1x32x128xf32, #tpu.memory_space<vmem>>, %arg2: memref<128x128xf32, #tpu.memory_space<vmem>>, %arg3: memref<128x8xf32, #tpu.memory_space<vmem>>, %arg4: memref<32x32xf32, #tpu.memory_space<vmem>>, %arg5: memref<1x32x128xf32, #tpu.memory_space<vmem>>) attributes {dimension_semantics = [#tpu.dimension_semantics<parallel>], iteration_bounds = array<i64: 2>, scalar_prefetch = 0 : i64, scratch_operands = 0 : i64, tpu.core_type = #tpu.core_type<tc>, window_params = [{transform_indices = @transform_0, window_bounds = array<i64: 1, 32, 128>}, {pipeline_mode = #tpu.pipeline_mode<synchronous>, transform_indices = @transform_1, window_bounds = array<i64: 128, 128>}, {pipeline_mode = #tpu.pipeline_mode<synchronous>, transform_indices = @transform_2, window_bounds = array<i64: 128, 8>}, {pipeline_mode = #tpu.pipeline_mode<synchronous>, transform_indices = @transform_3, window_bounds = array<i64: 32, 32>}, {transform_indices = @transform_4, window_bounds = array<i64: 1, 32, 128>}]} {
    %c0 = arith.constant 0 : index
    %c0_0 = arith.constant 0 : index
    %c0_1 = arith.constant 0 : index
    %0 = vector.load %arg1[%c0, %c0_0, %c0_1] : memref<1x32x128xf32, #tpu.memory_space<vmem>>, vector<1x32x128xf32>
    %1 = vector.shape_cast %0 : vector<1x32x128xf32> to vector<32x128xf32>
    %c0_2 = arith.constant 0 : index
    %c0_3 = arith.constant 0 : index
    %2 = vector.load %arg2[%c0_2, %c0_3] : memref<128x128xf32, #tpu.memory_space<vmem>>, vector<128x128xf32>
    %cst = arith.constant dense<0.000000e+00> : vector<32x128xf32>
    %3 = tpu.matmul %1, %2, %cst {dimension_numbers = #tpu.dot_dimension_numbers<[1], [0], [0], [1], [0, 0, 1, 1], [], []>} : vector<32x128xf32>, vector<128x128xf32>, vector<32x128xf32> -> vector<32x128xf32>
    %c0_4 = arith.constant 0 : index
    %c0_5 = arith.constant 0 : index
    %4 = vector.load %arg3[%c0_4, %c0_5] : memref<128x8xf32, #tpu.memory_space<vmem>>, vector<128x8xf32>
    %cst_6 = arith.constant dense<0.000000e+00> : vector<32x8xf32>
    %5 = tpu.matmul %3, %4, %cst_6 {dimension_numbers = #tpu.dot_dimension_numbers<[1], [0], [0], [1], [0, 0, 1, 1], [], []>} : vector<32x128xf32>, vector<128x8xf32>, vector<32x8xf32> -> vector<32x8xf32>
    %c0_7 = arith.constant 0 : index
    %c0_8 = arith.constant 0 : index
    %6 = vector.load %arg4[%c0_7, %c0_8] : memref<32x32xf32, #tpu.memory_space<vmem>>, vector<32x32xf32>
    %7 = vector.extract_strided_slice %5 {offsets = [0, 0], sizes = [32, 1], strides = [1, 1]} : vector<32x8xf32> to vector<32x1xf32>
    %8 = vector.extract_strided_slice %5 {offsets = [0, 4], sizes = [32, 1], strides = [1, 1]} : vector<32x8xf32> to vector<32x1xf32>
    %9 = tpu.transpose %8, [1, 0] : vector<32x1xf32> -> vector<1x32xf32>
    %10 = vector.broadcast %7 : vector<32x1xf32> to vector<32x32xf32>
    %11 = vector.broadcast %9 : vector<1x32xf32> to vector<32x32xf32>
    %12 = arith.addf %10, %11 : vector<32x32xf32>
    %cst_9 = arith.constant 0.000000e+00 : f32
    %13 = vector.broadcast %cst_9 : f32 to vector<32x32xf32>
    %14 = arith.cmpf ogt, %12, %13 : vector<32x32xf32>
    %cst_10 = arith.constant 2.000000e-01 : f32
    %15 = vector.broadcast %cst_10 : f32 to vector<32x32xf32>
    %16 = arith.mulf %15, %12 : vector<32x32xf32>
    %17 = arith.select %14, %12, %16 : vector<32x32xi1>, vector<32x32xf32>
    %18 = arith.addf %17, %6 : vector<32x32xf32>
    %cst_11 = arith.constant dense<0xFF800000> : vector<32xf32>
    %19 = vector.multi_reduction <maximumf>, %18, %cst_11 [1] : vector<32x32xf32> to vector<32xf32>
    %20 = vector.shape_cast %19 : vector<32xf32> to vector<32x1xf32>
    %21 = vector.broadcast %20 : vector<32x1xf32> to vector<32x32xf32>
    %22 = arith.subf %18, %21 : vector<32x32xf32>
    %23 = math.exp %22 : vector<32x32xf32>
    %cst_12 = arith.constant dense<0.000000e+00> : vector<32xf32>
    %24 = vector.multi_reduction <add>, %23, %cst_12 [1] : vector<32x32xf32> to vector<32xf32>
    %25 = vector.shape_cast %24 : vector<32xf32> to vector<32x1xf32>
    %26 = tpu.reciprocal %25 {approx = true} : vector<32x1xf32> -> vector<32x1xf32>
    %27 = vector.broadcast %26 : vector<32x1xf32> to vector<32x32xf32>
    %28 = arith.mulf %23, %27 : vector<32x32xf32>
    %29 = vector.extract_strided_slice %3 {offsets = [0, 0], sizes = [32, 32], strides = [1, 1]} : vector<32x128xf32> to vector<32x32xf32>
    %cst_13 = arith.constant dense<0.000000e+00> : vector<32x32xf32>
    %30 = tpu.matmul %28, %29, %cst_13 {dimension_numbers = #tpu.dot_dimension_numbers<[1], [0], [0], [1], [0, 0, 1, 1], [], []>} : vector<32x32xf32>, vector<32x32xf32>, vector<32x32xf32> -> vector<32x32xf32>
    %31 = vector.extract_strided_slice %5 {offsets = [0, 1], sizes = [32, 1], strides = [1, 1]} : vector<32x8xf32> to vector<32x1xf32>
    %32 = vector.extract_strided_slice %5 {offsets = [0, 5], sizes = [32, 1], strides = [1, 1]} : vector<32x8xf32> to vector<32x1xf32>
    %33 = tpu.transpose %32, [1, 0] : vector<32x1xf32> -> vector<1x32xf32>
    %34 = vector.broadcast %31 : vector<32x1xf32> to vector<32x32xf32>
    %35 = vector.broadcast %33 : vector<1x32xf32> to vector<32x32xf32>
    %36 = arith.addf %34, %35 : vector<32x32xf32>
    %cst_14 = arith.constant 0.000000e+00 : f32
    %37 = vector.broadcast %cst_14 : f32 to vector<32x32xf32>
    %38 = arith.cmpf ogt, %36, %37 : vector<32x32xf32>
    %cst_15 = arith.constant 2.000000e-01 : f32
    %39 = vector.broadcast %cst_15 : f32 to vector<32x32xf32>
    %40 = arith.mulf %39, %36 : vector<32x32xf32>
    %41 = arith.select %38, %36, %40 : vector<32x32xi1>, vector<32x32xf32>
    %42 = arith.addf %41, %6 : vector<32x32xf32>
    %cst_16 = arith.constant dense<0xFF800000> : vector<32xf32>
    %43 = vector.multi_reduction <maximumf>, %42, %cst_16 [1] : vector<32x32xf32> to vector<32xf32>
    %44 = vector.shape_cast %43 : vector<32xf32> to vector<32x1xf32>
    %45 = vector.broadcast %44 : vector<32x1xf32> to vector<32x32xf32>
    %46 = arith.subf %42, %45 : vector<32x32xf32>
    %47 = math.exp %46 : vector<32x32xf32>
    %cst_17 = arith.constant dense<0.000000e+00> : vector<32xf32>
    %48 = vector.multi_reduction <add>, %47, %cst_17 [1] : vector<32x32xf32> to vector<32xf32>
    %49 = vector.shape_cast %48 : vector<32xf32> to vector<32x1xf32>
    %50 = tpu.reciprocal %49 {approx = true} : vector<32x1xf32> -> vector<32x1xf32>
    %51 = vector.broadcast %50 : vector<32x1xf32> to vector<32x32xf32>
    %52 = arith.mulf %47, %51 : vector<32x32xf32>
    %53 = vector.extract_strided_slice %3 {offsets = [0, 32], sizes = [32, 32], strides = [1, 1]} : vector<32x128xf32> to vector<32x32xf32>
    %cst_18 = arith.constant dense<0.000000e+00> : vector<32x32xf32>
    %54 = tpu.matmul %52, %53, %cst_18 {dimension_numbers = #tpu.dot_dimension_numbers<[1], [0], [0], [1], [0, 0, 1, 1], [], []>} : vector<32x32xf32>, vector<32x32xf32>, vector<32x32xf32> -> vector<32x32xf32>
    %55 = vector.extract_strided_slice %5 {offsets = [0, 2], sizes = [32, 1], strides = [1, 1]} : vector<32x8xf32> to vector<32x1xf32>
    %56 = vector.extract_strided_slice %5 {offsets = [0, 6], sizes = [32, 1], strides = [1, 1]} : vector<32x8xf32> to vector<32x1xf32>
    %57 = tpu.transpose %56, [1, 0] : vector<32x1xf32> -> vector<1x32xf32>
    %58 = vector.broadcast %55 : vector<32x1xf32> to vector<32x32xf32>
    %59 = vector.broadcast %57 : vector<1x32xf32> to vector<32x32xf32>
    %60 = arith.addf %58, %59 : vector<32x32xf32>
    %cst_19 = arith.constant 0.000000e+00 : f32
    %61 = vector.broadcast %cst_19 : f32 to vector<32x32xf32>
    %62 = arith.cmpf ogt, %60, %61 : vector<32x32xf32>
    %cst_20 = arith.constant 2.000000e-01 : f32
    %63 = vector.broadcast %cst_20 : f32 to vector<32x32xf32>
    %64 = arith.mulf %63, %60 : vector<32x32xf32>
    %65 = arith.select %62, %60, %64 : vector<32x32xi1>, vector<32x32xf32>
    %66 = arith.addf %65, %6 : vector<32x32xf32>
    %cst_21 = arith.constant dense<0xFF800000> : vector<32xf32>
    %67 = vector.multi_reduction <maximumf>, %66, %cst_21 [1] : vector<32x32xf32> to vector<32xf32>
    %68 = vector.shape_cast %67 : vector<32xf32> to vector<32x1xf32>
    %69 = vector.broadcast %68 : vector<32x1xf32> to vector<32x32xf32>
    %70 = arith.subf %66, %69 : vector<32x32xf32>
    %71 = math.exp %70 : vector<32x32xf32>
    %cst_22 = arith.constant dense<0.000000e+00> : vector<32xf32>
    %72 = vector.multi_reduction <add>, %71, %cst_22 [1] : vector<32x32xf32> to vector<32xf32>
    %73 = vector.shape_cast %72 : vector<32xf32> to vector<32x1xf32>
    %74 = tpu.reciprocal %73 {approx = true} : vector<32x1xf32> -> vector<32x1xf32>
    %75 = vector.broadcast %74 : vector<32x1xf32> to vector<32x32xf32>
    %76 = arith.mulf %71, %75 : vector<32x32xf32>
    %77 = vector.extract_strided_slice %3 {offsets = [0, 64], sizes = [32, 32], strides = [1, 1]} : vector<32x128xf32> to vector<32x32xf32>
    %cst_23 = arith.constant dense<0.000000e+00> : vector<32x32xf32>
    %78 = tpu.matmul %76, %77, %cst_23 {dimension_numbers = #tpu.dot_dimension_numbers<[1], [0], [0], [1], [0, 0, 1, 1], [], []>} : vector<32x32xf32>, vector<32x32xf32>, vector<32x32xf32> -> vector<32x32xf32>
    %79 = vector.extract_strided_slice %5 {offsets = [0, 3], sizes = [32, 1], strides = [1, 1]} : vector<32x8xf32> to vector<32x1xf32>
    %80 = vector.extract_strided_slice %5 {offsets = [0, 7], sizes = [32, 1], strides = [1, 1]} : vector<32x8xf32> to vector<32x1xf32>
    %81 = tpu.transpose %80, [1, 0] : vector<32x1xf32> -> vector<1x32xf32>
    %82 = vector.broadcast %79 : vector<32x1xf32> to vector<32x32xf32>
    %83 = vector.broadcast %81 : vector<1x32xf32> to vector<32x32xf32>
    %84 = arith.addf %82, %83 : vector<32x32xf32>
    %cst_24 = arith.constant 0.000000e+00 : f32
    %85 = vector.broadcast %cst_24 : f32 to vector<32x32xf32>
    %86 = arith.cmpf ogt, %84, %85 : vector<32x32xf32>
    %cst_25 = arith.constant 2.000000e-01 : f32
    %87 = vector.broadcast %cst_25 : f32 to vector<32x32xf32>
    %88 = arith.mulf %87, %84 : vector<32x32xf32>
    %89 = arith.select %86, %84, %88 : vector<32x32xi1>, vector<32x32xf32>
    %90 = arith.addf %89, %6 : vector<32x32xf32>
    %cst_26 = arith.constant dense<0xFF800000> : vector<32xf32>
    %91 = vector.multi_reduction <maximumf>, %90, %cst_26 [1] : vector<32x32xf32> to vector<32xf32>
    %92 = vector.shape_cast %91 : vector<32xf32> to vector<32x1xf32>
    %93 = vector.broadcast %92 : vector<32x1xf32> to vector<32x32xf32>
    %94 = arith.subf %90, %93 : vector<32x32xf32>
    %95 = math.exp %94 : vector<32x32xf32>
    %cst_27 = arith.constant dense<0.000000e+00> : vector<32xf32>
    %96 = vector.multi_reduction <add>, %95, %cst_27 [1] : vector<32x32xf32> to vector<32xf32>
    %97 = vector.shape_cast %96 : vector<32xf32> to vector<32x1xf32>
    %98 = tpu.reciprocal %97 {approx = true} : vector<32x1xf32> -> vector<32x1xf32>
    %99 = vector.broadcast %98 : vector<32x1xf32> to vector<32x32xf32>
    %100 = arith.mulf %95, %99 : vector<32x32xf32>
    %101 = vector.extract_strided_slice %3 {offsets = [0, 96], sizes = [32, 32], strides = [1, 1]} : vector<32x128xf32> to vector<32x32xf32>
    %cst_28 = arith.constant dense<0.000000e+00> : vector<32x32xf32>
    %102 = tpu.matmul %100, %101, %cst_28 {dimension_numbers = #tpu.dot_dimension_numbers<[1], [0], [0], [1], [0, 0, 1, 1], [], []>} : vector<32x32xf32>, vector<32x32xf32>, vector<32x32xf32> -> vector<32x32xf32>
    %103 = tpu.concatenate %30, %54, %78, %102 in 1 : vector<32x32xf32>, vector<32x32xf32>, vector<32x32xf32>, vector<32x32xf32> -> vector<32x128xf32>
    %cst_29 = arith.constant 0.000000e+00 : f32
    %104 = vector.broadcast %cst_29 : f32 to vector<32x128xf32>
    %105 = arith.cmpf ogt, %103, %104 : vector<32x128xf32>
    %cst_30 = arith.constant 0.000000e+00 : f32
    %106 = vector.broadcast %cst_30 : f32 to vector<32x128xf32>
    %107 = arith.minimumf %103, %106 : vector<32x128xf32>
    %108 = math.exp %107 : vector<32x128xf32>
    %cst_31 = arith.constant 1.000000e+00 : f32
    %109 = vector.broadcast %cst_31 : f32 to vector<32x128xf32>
    %110 = arith.subf %108, %109 : vector<32x128xf32>
    %111 = arith.select %105, %103, %110 : vector<32x128xi1>, vector<32x128xf32>
    %c0_32 = arith.constant 0 : index
    %c0_33 = arith.constant 0 : index
    %c0_34 = arith.constant 0 : index
    %112 = vector.load %arg5[%c0_32, %c0_33, %c0_34] : memref<1x32x128xf32, #tpu.memory_space<vmem>>, vector<1x32x128xf32>
    %113 = vector.shape_cast %112 : vector<1x32x128xf32> to vector<32x128xf32>
    %114 = vector.shape_cast %111 : vector<32x128xf32> to vector<1x32x128xf32>
    tpu.vector_store %arg5[%c0_32, %c0_33, %c0_34], %114 {strides = array<i32>} : memref<1x32x128xf32, #tpu.memory_space<vmem>>, vector<1x32x128xf32>,
    return
  }
  func.func @transform_0(%arg0: i32) -> (i32, i32, i32) {
    %c0_i32 = arith.constant 0 : i32
    %c0_i32_0 = arith.constant 0 : i32
    %c0_i32_1 = arith.constant 0 : i32
    return %arg0, %c0_i32, %c0_i32_0 : i32, i32, i32
  }
  func.func @transform_1(%arg0: i32) -> (i32, i32) {
    %c0_i32 = arith.constant 0 : i32
    %c0_i32_0 = arith.constant 0 : i32
    %c0_i32_1 = arith.constant 0 : i32
    return %c0_i32, %c0_i32_0 : i32, i32
  }
  func.func @transform_2(%arg0: i32) -> (i32, i32) {
    %c0_i32 = arith.constant 0 : i32
    %c0_i32_0 = arith.constant 0 : i32
    %c0_i32_1 = arith.constant 0 : i32
    return %c0_i32, %c0_i32_0 : i32, i32
  }
  func.func @transform_3(%arg0: i32) -> (i32, i32) {
    %c0_i32 = arith.constant 0 : i32
    %c0_i32_0 = arith.constant 0 : i32
    %c0_i32_1 = arith.constant 0 : i32
    return %c0_i32, %c0_i32_0 : i32, i32
  }
  func.func @transform_4(%arg0: i32) -> (i32, i32, i32) {
    %c0_i32 = arith.constant 0 : i32
    %c0_i32_0 = arith.constant 0 : i32
    %c0_i32_1 = arith.constant 0 : i32
    return %arg0, %c0_i32, %c0_i32_0 : i32, i32, i32
  }
}

module attributes {stable_mosaic.version = 11 : i64} {
  func.func @_classifier_ce_kernel(%arg0: memref<96x128xf32, #tpu.memory_space<vmem>>, %arg1: memref<128x128xf32, #tpu.memory_space<vmem>>, %arg2: memref<1x128xf32, #tpu.memory_space<vmem>>, %arg3: memref<128x8xf32, #tpu.memory_space<vmem>>, %arg4: memref<1x8xf32, #tpu.memory_space<vmem>>, %arg5: memref<96x1xi32, #tpu.memory_space<vmem>>, %arg6: memref<1x2xf32, #tpu.memory_space<smem>>) attributes {dimension_semantics = [], scalar_prefetch = 0 : i64, scratch_operands = 0 : i64, tpu.core_type = #tpu.core_type<tc>} {
    %c0 = arith.constant 0 : index
    %c0_0 = arith.constant 0 : index
    %0 = vector.load %arg0[%c0, %c0_0] : memref<96x128xf32, #tpu.memory_space<vmem>>, vector<96x128xf32>
    %c0_1 = arith.constant 0 : index
    %c0_2 = arith.constant 0 : index
    %1 = vector.load %arg1[%c0_1, %c0_2] : memref<128x128xf32, #tpu.memory_space<vmem>>, vector<128x128xf32>
    %cst = arith.constant dense<0.000000e+00> : vector<96x128xf32>
    %2 = tpu.matmul %0, %1, %cst {dimension_numbers = #tpu.dot_dimension_numbers<[1], [0], [0], [1], [0, 0, 1, 1], [], []>} : vector<96x128xf32>, vector<128x128xf32>, vector<96x128xf32> -> vector<96x128xf32>
    %c0_3 = arith.constant 0 : index
    %c0_4 = arith.constant 0 : index
    %3 = vector.load %arg2[%c0_3, %c0_4] : memref<1x128xf32, #tpu.memory_space<vmem>>, vector<1x128xf32>
    %4 = vector.broadcast %3 : vector<1x128xf32> to vector<96x128xf32>
    %5 = arith.addf %2, %4 : vector<96x128xf32>
    %cst_5 = arith.constant 0.000000e+00 : f32
    %6 = vector.broadcast %cst_5 : f32 to vector<96x128xf32>
    %7 = arith.maximumf %5, %6 : vector<96x128xf32>
    %c0_6 = arith.constant 0 : index
    %c0_7 = arith.constant 0 : index
    %8 = vector.load %arg3[%c0_6, %c0_7] : memref<128x8xf32, #tpu.memory_space<vmem>>, vector<128x8xf32>
    %cst_8 = arith.constant dense<0.000000e+00> : vector<96x8xf32>
    %9 = tpu.matmul %7, %8, %cst_8 {dimension_numbers = #tpu.dot_dimension_numbers<[1], [0], [0], [1], [0, 0, 1, 1], [], []>} : vector<96x128xf32>, vector<128x8xf32>, vector<96x8xf32> -> vector<96x8xf32>
    %c0_9 = arith.constant 0 : index
    %c0_10 = arith.constant 0 : index
    %10 = vector.load %arg4[%c0_9, %c0_10] : memref<1x8xf32, #tpu.memory_space<vmem>>, vector<1x8xf32>
    %11 = vector.broadcast %10 : vector<1x8xf32> to vector<96x8xf32>
    %12 = arith.addf %9, %11 : vector<96x8xf32>
    %cst_11 = arith.constant 0.000000e+00 : f32
    %13 = vector.broadcast %cst_11 : f32 to vector<96x8xf32>
    %14 = arith.subf %13, %12 : vector<96x8xf32>
    %15 = math.exp %14 : vector<96x8xf32>
    %cst_12 = arith.constant 1.000000e+00 : f32
    %16 = vector.broadcast %cst_12 : f32 to vector<96x8xf32>
    %17 = arith.addf %16, %15 : vector<96x8xf32>
    %cst_13 = arith.constant 1.000000e+00 : f32
    %18 = vector.broadcast %cst_13 : f32 to vector<96x8xf32>
    %19 = arith.divf %18, %17 : vector<96x8xf32>
    %cst_14 = arith.constant dense<0xFF800000> : vector<96xf32>
    %20 = vector.multi_reduction <maximumf>, %19, %cst_14 [1] : vector<96x8xf32> to vector<96xf32>
    %21 = vector.shape_cast %20 : vector<96xf32> to vector<96x1xf32>
    %22 = vector.broadcast %21 : vector<96x1xf32> to vector<96x8xf32>
    %23 = arith.subf %19, %22 : vector<96x8xf32>
    %24 = math.exp %23 : vector<96x8xf32>
    %cst_15 = arith.constant dense<0.000000e+00> : vector<96xf32>
    %25 = vector.multi_reduction <add>, %24, %cst_15 [1] : vector<96x8xf32> to vector<96xf32>
    %26 = vector.shape_cast %25 : vector<96xf32> to vector<96x1xf32>
    %27 = math.log %26 : vector<96x1xf32>
    %28 = arith.addf %21, %27 : vector<96x1xf32>
    %29 = tpu.iota {dimensions = array<i32: 1>} : vector<96x8xi32>
    %c0_16 = arith.constant 0 : index
    %c0_17 = arith.constant 0 : index
    %30 = vector.load %arg5[%c0_16, %c0_17] : memref<96x1xi32, #tpu.memory_space<vmem>>, vector<96x1xi32>
    %31 = vector.broadcast %30 : vector<96x1xi32> to vector<96x8xi32>
    %32 = arith.cmpi eq, %29, %31 : vector<96x8xi32>
    %cst_18 = arith.constant 0.000000e+00 : f32
    %33 = vector.broadcast %cst_18 : f32 to vector<96x8xf32>
    %34 = arith.select %32, %19, %33 : vector<96x8xi1>, vector<96x8xf32>
    %cst_19 = arith.constant dense<0.000000e+00> : vector<96xf32>
    %35 = vector.multi_reduction <add>, %34, %cst_19 [1] : vector<96x8xf32> to vector<96xf32>
    %36 = vector.shape_cast %35 : vector<96xf32> to vector<96x1xf32>
    %37 = arith.subf %28, %36 : vector<96x1xf32>
    %38 = tpu.iota {dimensions = array<i32: 0>} : vector<96x1xi32>
    %c64_i32 = arith.constant 64 : i32
    %39 = vector.broadcast %c64_i32 : i32 to vector<96x1xi32>
    %40 = arith.cmpi slt, %38, %39 : vector<96x1xi32>
    %cst_20 = arith.constant 0.000000e+00 : f32
    %41 = vector.broadcast %cst_20 : f32 to vector<96x1xf32>
    %42 = arith.select %40, %37, %41 : vector<96x1xi1>, vector<96x1xf32>
    %43 = vector.shape_cast %42 : vector<96x1xf32> to vector<1x96x1xf32>
    %cst_21 = arith.constant dense<0.000000e+00> : vector<1xf32>
    %44 = vector.multi_reduction <add>, %43, %cst_21 [1, 2] : vector<1x96x1xf32> to vector<1xf32>
    %45 = vector.shape_cast %44 : vector<1xf32> to vector<1x1x1xf32>
    %46 = vector.extract %45[0, 0, 0] : f32 from vector<1x1x1xf32>
    %cst_22 = arith.constant 6.400000e+01 : f32
    %47 = arith.divf %46, %cst_22 : f32
    %c0_23 = arith.constant 0 : index
    %c0_24 = arith.constant 0 : index
    %48 = memref.load %arg6[%c0_23, %c0_24] : memref<1x2xf32, #tpu.memory_space<smem>>
    memref.store %47, %arg6[%c0_23, %c0_24] : memref<1x2xf32, #tpu.memory_space<smem>>
    %cst_25 = arith.constant 0.000000e+00 : f32
    %49 = vector.broadcast %cst_25 : f32 to vector<96x1xf32>
    %50 = arith.select %40, %49, %37 : vector<96x1xi1>, vector<96x1xf32>
    %51 = vector.shape_cast %50 : vector<96x1xf32> to vector<1x96x1xf32>
    %cst_26 = arith.constant dense<0.000000e+00> : vector<1xf32>
    %52 = vector.multi_reduction <add>, %51, %cst_26 [1, 2] : vector<1x96x1xf32> to vector<1xf32>
    %53 = vector.shape_cast %52 : vector<1xf32> to vector<1x1x1xf32>
    %54 = vector.extract %53[0, 0, 0] : f32 from vector<1x1x1xf32>
    %cst_27 = arith.constant 3.200000e+01 : f32
    %55 = arith.divf %54, %cst_27 : f32
    %c0_28 = arith.constant 0 : index
    %c1 = arith.constant 1 : index
    %56 = memref.load %arg6[%c0_28, %c1] : memref<1x2xf32, #tpu.memory_space<smem>>
    memref.store %55, %arg6[%c0_28, %c1] : memref<1x2xf32, #tpu.memory_space<smem>>
    return
  }
}

</mosaic_0001>

<bundles_post_ra>
// kernel: model_forward.5
= control target key start
LH: loop header
LB: loop body
LE: loop exit
PB: predicated region body
PF: predicated region fallthrough
CT: control target
= control target key end

     0   :  { %v353_v0 = vmov 0.0   ;;  %vm354_vm0 = vmmov 0   ;;  %vm128_vm1 = vcmask 261120   ;;  %vm42_vm2 = vcmask 523264   ;;  %s482_s3 = inlined_call_operand.vmem [shape: f32[64,128], index: 3, kind: input, shape index: {}]   ;;  %s483_s5 = inlined_call_operand.vmem [shape: f32[32,128], index: 5, kind: input, shape index: {}]   ;;  %s484_s2 = inlined_call_operand.vmem [shape: f32[2,32], index: 2, kind: input, shape index: {}]   ;;  %s485_s1 = inlined_call_operand.vmem [shape: f32[2,64], index: 1, kind: input, shape index: {}]   ;;  %s486_s6 = inlined_call_operand.vmem [shape: f32[1,128], index: 6, kind: input, shape index: {}]   ;;  %s487_s4 = inlined_call_operand.vmem [shape: f32[1,128], index: 4, kind: input, shape index: {}]   ;;  %s488_s0 = inlined_call_operand.vmem [shape: f32[2,24,128], index: 0, kind: input, shape index: {}]   ;;  %s489_s7 = inlined_call_operand.vmem [shape: f32[2,24,128], index: 7, kind: output, shape index: {}]  }
   0x1   :  { %320 = vmatprep.subr.mxu0 %v353_v0  ;;  %v34_v1 = vld [vmem:[%s482_s3 + $0x38] sm:$0xff]  ;;  %v33_v2 = vld [vmem:[%s482_s3 + $0x30] sm:$0xff]  ;;  %339 = vmatprep.subr.mxu1 %v353_v0  ;;  %v32_v4 = vld [vmem:[%s482_s3 + $0x28] sm:$0xff]  ;;  %v355_v15 = vmov 1966171168   ;;  %v218_v17 = vlaneseq }
   0x2   :  { %321 = vmatpush3.msra.mxu0 %v34_v1  ;;  %v120_v3 = vld [vmem:[%s483_s5 + $0x18] sm:$0xff]  ;;  %336 = vmatprep.mubr.msk.f32.mxu0 %vm354_vm0, %v353_v0  ;;  %v119_v5 = vld [vmem:[%s483_s5 + $0x10] sm:$0xff]  ;;  %v118_v6 = vld [vmem:[%s483_s5 + $0x8] sm:$0xff]  ;;  %v216_v16 = vunpack.c.l.s4 %v355_v15 }
   0x3   :  { %322 = vmatprep.subr.mxu0 %v353_v0  ;;  %340 = vmatpush3.msra.mxu1 %v120_v3  ;;  %v31_v7 = vld [vmem:[%s482_s3 + $0x20] sm:$0xff]  ;;  %v30_v9 = vld [vmem:[%s482_s3 + $0x18] sm:$0xff]  ;;  %v29_v11 = vld [vmem:[%s482_s3 + $0x10] sm:$0xff]  ;;  %v219_v19 = vshrl.u32 %v218_v17, 7 }
   0x4   :  { %323 = vmatpush3.msra.mxu0 %v33_v2  ;;  %341 = vmatprep.subr.mxu1 %v353_v0  ;;  %v117_v8 = vld [vmem:[%s483_s5] sm:$0xff]  ;;  %v28_v12 = vld [vmem:[%s482_s3 + $0x8] sm:$0xff]  ;;  %v217_v18 = vunpack.c.0.s8 %v216_v16  ;;  %v204_v32 = vld [vmem:[%s488_s0 + $0x10] sm:$0xff] }
   0x5   :  { %324 = vmatprep.subr.mxu0 %v353_v0  ;;  %342 = vmatpush3.msra.mxu1 %v119_v5  ;;  %v116_v10 = vld [vmem:[%s484_s2] sm:$0x3]  ;;  %v203_v31 = vld [vmem:[%s488_s0 + $0x8] sm:$0xff]  ;;  %v205_v34 = vld [vmem:[%s488_s0 + $0x18] sm:$0xff]  ;;  %v239_v37 = vsub.s32 0, %v219_v19  ;;  %v210_v43 = vmul.f32 3.0, %v204_v32 }
   0x6   :  { %325 = vmatpush3.msra.mxu0 %v32_v4  ;;  %343 = vmatprep.subr.mxu1 %v353_v0  ;;  %v27_v13 = vld [vmem:[%s482_s3] sm:$0xff]  ;;  %v220_v22 = vsub.s32 %v217_v18, %v219_v19  ;;  %v207_v39 = vld [vmem:[%s488_s0 + $0x28] sm:$0xff]  ;;  %v209_v42 = vmul.f32 3.0, %v203_v31  ;;  %v211_v46 = vmul.f32 3.0, %v205_v34 }
   0x7   :  { %326 = vmatprep.subr.mxu0 %v353_v0  ;;  %344 = vmatpush3.msra.mxu1 %v118_v6  ;;  %v26_v14 = vld [vmem:[%s485_s1] sm:$0x3]  ;;  %v213_v48 = vmul.f32 3.0, %v207_v39 }
   0x8   :  { %327 = vmatpush3.msra.mxu0 %v31_v7  ;;  %345 = vmatprep.subr.mxu1 %v353_v0  ;;  %v304_v20 = vld [vmem:[%s486_s6] ss:$0 sm:$0xff] }
   0x9   :  { %328 = vmatprep.subr.mxu0 %v353_v0  ;;  %346 = vmatpush3.msra.mxu1 %v117_v8  ;;  %v302_v26 = vld [vmem:[%s487_s4] ss:$0 sm:$0xff] }
   0xa   :  { %329 = vmatpush3.msra.mxu0 %v30_v9  ;;  %347 = vmatprep.mubr.msk.f32.mxu1 %vm354_vm0, %v353_v0  ;;  %v202_v30 = vld [vmem:[%s488_s0] sm:$0xff] }
   0xb   :  { %330 = vmatprep.subr.mxu0 %v353_v0  ;;  %348 = vmatmul.mubr.msk.f32.vlgmr.msra.gmra.mxu1 %vm128_vm1, %v116_v10  ;;  %v206_v35 = vld [vmem:[%s488_s0 + $0x20] sm:$0xff]  ;;  %v208_v40 = vmul.f32 3.0, %v202_v30 }
   0xc   :  { %331 = vmatpush3.msra.mxu0 %v29_v11  ;;  %v212_v47 = vmul.f32 3.0, %v206_v35 }
   0xd   :  { %332 = vmatprep.subr.mxu0 %v353_v0 }
   0xe   :  { %333 = vmatpush3.msra.mxu0 %v28_v12 }
   0xf   :  { %334 = vmatprep.subr.mxu0 %v353_v0 }
  0x10   :  { %335 = vmatpush3.msra.mxu0 %v27_v13 }
  0x11   :  { %337 = vmatmul.mubr.msk.f32.vlgmr.msra.gmra.mxu0 %vm42_vm2, %v26_v14 }
  0xcb   :  { %v198_v21 = vpop.f32.mrf.mxu1 }
  0xcc   :  { %v199_v23 = vadd.f32 %v304_v20, %v198_v21 }
  0xcd   :  { %v349_v24 = vpop.f32.mrf.mxu1 }
  0xce   :  { %v260_v25 = vrot.slane %v199_v23, %v220_v22 }
  0xd0   :  { %v261_v28 = vcombine.high %v260_v25, %v260_v25  ;;  %v268_v38 = vrot.slane %v260_v25, %v220_v22 }
  0xd1   :  { %v112_v27 = vpop.f32.mrf.mxu0 }
  0xd2   :  { %v113_v29 = vadd.f32 %v302_v26, %v112_v27  ;;  %v275_v41 = vrot.slane %v261_v28, %v220_v22  ;;  %v279_v51 = vrot.slane %v268_v38, %v239_v37 }
  0xd3   :  { %v338_v33 = vpop.f32.mrf.mxu0 }
  0xd4   :  { %v221_v36 = vrot.slane %v113_v29, %v220_v22  ;;  %v283_v52 = vrot.slane %v275_v41, %v239_v37 }
  0xd6   :  { %v222_v44 = vcombine.high %v221_v36, %v221_v36  ;;  %v229_v45 = vrot.slane %v221_v36, %v220_v22 }
  0xd8   :  { %v236_v49 = vrot.slane %v222_v44, %v220_v22  ;;  %v240_v50 = vrot.slane %v229_v45, %v239_v37 }
  0xda   :  { %v244_v53 = vrot.slane %v236_v49, %v239_v37  ;;  %v247_v54 = vadd.f32 %v240_v50, %v208_v40  ;;  %v248_v55 = vadd.f32 %v240_v50, %v209_v42  ;;  %v249_v56 = vadd.f32 %v240_v50, %v210_v43 }
  0xdc   :  { %v250_v57 = vadd.f32 %v244_v53, %v211_v46  ;;  %v251_v58 = vadd.f32 %v244_v53, %v212_v47  ;;  %v252_v59 = vadd.f32 %v244_v53, %v213_v48  ;;  %v286_v60 = vadd.f32 %v279_v51, %v247_v54 }
  0xdd   :  { %v287_v61 = vadd.f32 %v279_v51, %v248_v55  ;;  %v288_v62 = vadd.f32 %v279_v51, %v249_v56 }
  0xde   :  { %v289_v63 = vadd.f32 %v283_v52, %v250_v57  ;;  %v290_v0 = vadd.f32 %v283_v52, %v251_v58  ;;  %v291_v1 = vadd.f32 %v283_v52, %v252_v59  ;;  %292 = vst [vmem:[%s489_s7] sm:$0xff] %v286_v60 }
  0xdf   :  { %293 = vst [vmem:[%s489_s7 + $0x8] sm:$0xff] %v287_v61  ;;  %294 = vst [vmem:[%s489_s7 + $0x10] sm:$0xff] %v288_v62 }
  0xe0   :  { %295 = vst [vmem:[%s489_s7 + $0x18] sm:$0xff] %v289_v63  ;;  %296 = vst [vmem:[%s489_s7 + $0x20] sm:$0xff] %v290_v0 }
  0xe1   :  { %297 = vst [vmem:[%s489_s7 + $0x28] sm:$0xff] %v291_v1 }

// kernel: model_forward.6
= control target key start
LH: loop header
LB: loop body
LE: loop exit
PB: predicated region body
PF: predicated region fallthrough
CT: control target
= control target key end

     0   :  { %s1220_s15 = smov 0   ;;  %s1420_s0 = inlined_call_operand.vmem [shape: f32[2,8,128], index: 0, kind: input, shape index: {}]   ;;  %s1421_s1 = inlined_call_operand.vmem [shape: f32[128,128], index: 1, kind: input, shape index: {}]   ;;  %s1422_s2 = inlined_call_operand.vmem [shape: f32[128,8], index: 2, kind: input, shape index: {}]   ;;  %s1423_s3 = inlined_call_operand.vmem [shape: f32[8,8], index: 3, kind: input, shape index: {}]   ;;  %s1424_s4 = inlined_call_operand.vmem [shape: f32[2,8,128], index: 4, kind: output, shape index: {}]  }
   0x1 LB: > { %s985_s16 = sadd.s32 4294967295, %s1180_s15   ;;  %p989_p0 = scmp.ge.s32.totalorder %s1180_s15, 1  ;;  %s1180_s15 = sphi %s1220_s15, %s14_s15  }
   0x2   : > { %p161_p1 = scmp.lt.s32.totalorder %s1180_s15, 3 }
   0x4   : > { %p162_p2 = pnand %p989_p0, %p161_p1 }
   0x5   : > { %p185_p3 = scmp.lt.s32.totalorder (!%p162_p2), %s985_s16, 1  ;;  %s1186_s11 = smov (!%p162_p2), 122  }
   0x6   : > { %165 = sbr.rel (%p162_p2) target bundleno = 1331 (0x533), region = 36  ;;  %s1187_s12 = smov (!%p162_p2), 124  }
   0x7   : > { %s1188_s13 = smov (!%p162_p2), 121   ;;  %s1189_s14 = smov (!%p162_p2), 123  }
   0x8   : > { %s1192_s20 = smov (!%p162_p2), 96   ;;  %s1193_s21 = smov (!%p162_p2), 32  }
   0x9   : > { %s1194_s22 = smov (!%p162_p2), 64  }
   0xb   : > { %v209_v0 = vld [vmem:[%s1421_s1 + $0x78] sm:$0xff]  ;;  %v1182_v1 = vmov 0.0   ;;  %v208_v2 = vld [vmem:[%s1421_s1 + $0x70] sm:$0xff]  ;;  %vm1183_vm0 = vmmov 0   ;;  %v207_v3 = vld [vmem:[%s1421_s1 + $0x68] sm:$0xff]  ;;  %s1426_s16 = smov (!%p185_p3, %s985_s16), 1  ;;  %v407_v46 = vlaneseq }
   0xc   : > { %1041 = vmatprep.subr.mxu0 %v1182_v1  ;;  %1073 = vmatprep.mubr.msk.f32.mxu0 %vm1183_vm0, %v1182_v1  ;;  %v206_v4 = vld [vmem:[%s1421_s1 + $0x60] sm:$0xff]  ;;  %v295_v5 = vld [vmem:[%s1422_s2 + $0x78] sm:$0xff]  ;;  %v294_v6 = vld [vmem:[%s1422_s2 + $0x70] sm:$0xff]  ;;  %s990_s17 = sshll.u32 %s1426_s16, 3  ;;  %v1184_v36 = vmov 1   ;;  %v1185_v37 = vmov 0  }
   0xd   : > { %1042 = vmatpush3.msra.mxu0 %v209_v0  ;;  %1076 = vmatprep.subr.mxu1 %v1182_v1  ;;  %v205_v7 = vld [vmem:[%s1421_s1 + $0x58] sm:$0xff]  ;;  %v293_v8 = vld [vmem:[%s1422_s2 + $0x68] sm:$0xff]  ;;  %v204_v9 = vld [vmem:[%s1421_s1 + $0x50] sm:$0xff]  ;;  %s188_s26 = scalar_lea.vmem %s1420_s0, %s990_s17  ;;  %v1190_v40 = vmov 2   ;;  %v1191_v41 = vmov 3   ;;  %v408_v48 = vshrl.u32 %v407_v46, 7  ;;  %s192_s25 = scalar_lea.vmem %s1424_s4, %s990_s17 }
   0xe   : > { %1043 = vmatprep.subr.mxu0 %v1182_v1  ;;  %1108 = vmatprep.mubr.msk.f32.mxu1 %vm1183_vm0, %v1182_v1  ;;  %v292_v10 = vld [vmem:[%s1422_s2 + $0x60] sm:$0xff]  ;;  %v203_v11 = vld [vmem:[%s1421_s1 + $0x48] sm:$0xff]  ;;  %v291_v12 = vld [vmem:[%s1422_s2 + $0x58] sm:$0xff]  ;;  %vm416_vm2 = vcmask 64512   ;;  %vm919_vm6 = vcmask 261120   ;;  %vm921_vm7 = vcmask 523264  }
   0xf   : > { %1044 = vmatpush3.msra.mxu0 %v208_v2  ;;  %1077 = vmatpush3.msra.mxu1 %v295_v5  ;;  %v202_v13 = vld [vmem:[%s1421_s1 + $0x40] sm:$0xff]  ;;  %v290_v14 = vld [vmem:[%s1422_s2 + $0x50] sm:$0xff]  ;;  %v201_v15 = vld [vmem:[%s1421_s1 + $0x38] sm:$0xff]  ;;  %v409_v51 = vsub.s32 0, %v408_v48  ;;  %vm923_vm8 = vcmask 785408  }
  0x10   : > { %1045 = vmatprep.subr.mxu0 %v1182_v1  ;;  %1078 = vmatprep.subr.mxu1 %v1182_v1  ;;  %v289_v16 = vld [vmem:[%s1422_s2 + $0x48] sm:$0xff]  ;;  %v200_v17 = vld [vmem:[%s1421_s1 + $0x30] sm:$0xff]  ;;  %v288_v18 = vld [vmem:[%s1422_s2 + $0x40] sm:$0xff] }
  0x11   : > { %1046 = vmatpush3.msra.mxu0 %v207_v3  ;;  %1079 = vmatpush3.msra.mxu1 %v294_v6  ;;  %v199_v19 = vld [vmem:[%s1421_s1 + $0x28] sm:$0xff]  ;;  %v287_v20 = vld [vmem:[%s1422_s2 + $0x38] sm:$0xff]  ;;  %v198_v21 = vld [vmem:[%s1421_s1 + $0x20] sm:$0xff] }
  0x12   : > { %1047 = vmatprep.subr.mxu0 %v1182_v1  ;;  %1080 = vmatprep.subr.mxu1 %v1182_v1  ;;  %v286_v22 = vld [vmem:[%s1422_s2 + $0x30] sm:$0xff]  ;;  %v197_v23 = vld [vmem:[%s1421_s1 + $0x18] sm:$0xff]  ;;  %v285_v24 = vld [vmem:[%s1422_s2 + $0x28] sm:$0xff] }
  0x13   : > { %1048 = vmatpush3.msra.mxu0 %v206_v4  ;;  %1081 = vmatpush3.msra.mxu1 %v293_v8  ;;  %v196_v25 = vld [vmem:[%s1421_s1 + $0x10] sm:$0xff]  ;;  %v284_v26 = vld [vmem:[%s1422_s2 + $0x20] sm:$0xff]  ;;  %v195_v27 = vld [vmem:[%s1421_s1 + $0x8] sm:$0xff] }
  0x14   : > { %1049 = vmatprep.subr.mxu0 %v1182_v1  ;;  %1082 = vmatprep.subr.mxu1 %v1182_v1  ;;  %v283_v28 = vld [vmem:[%s1422_s2 + $0x18] sm:$0xff]  ;;  %v194_v29 = vld [vmem:[%s1421_s1] sm:$0xff]  ;;  %v282_v30 = vld [vmem:[%s1422_s2 + $0x10] sm:$0xff] }
  0x15   : > { %1050 = vmatpush3.msra.mxu0 %v205_v7  ;;  %1083 = vmatpush3.msra.mxu1 %v292_v10  ;;  %v193_v31 = vld [vmem:[%s188_s26] sm:$0xff]  ;;  %v281_v32 = vld [vmem:[%s1422_s2 + $0x8] sm:$0xff] }
  0x16   : > { %1051 = vmatprep.subr.mxu0 %v1182_v1  ;;  %1084 = vmatprep.subr.mxu1 %v1182_v1  ;;  %v280_v33 = vld [vmem:[%s1422_s2] sm:$0xff] }
  0x17   : > { %1052 = vmatpush3.msra.mxu0 %v204_v9  ;;  %1085 = vmatpush3.msra.mxu1 %v291_v12  ;;  %v366_v61 = vld [vmem:[%s1423_s3] sm:$0xff] }
  0x18   : > { %1053 = vmatprep.subr.mxu0 %v1182_v1  ;;  %1086 = vmatprep.subr.mxu1 %v1182_v1 }
  0x19   : > { %1054 = vmatpush3.msra.mxu0 %v203_v11  ;;  %1087 = vmatpush3.msra.mxu1 %v290_v14 }
  0x1a   : > { %1055 = vmatprep.subr.mxu0 %v1182_v1  ;;  %1088 = vmatprep.subr.mxu1 %v1182_v1 }
  0x1b   : > { %1056 = vmatpush3.msra.mxu0 %v202_v13  ;;  %1089 = vmatpush3.msra.mxu1 %v289_v16 }
  0x1c   : > { %1057 = vmatprep.subr.mxu0 %v1182_v1  ;;  %1090 = vmatprep.subr.mxu1 %v1182_v1 }
  0x1d   : > { %1058 = vmatpush3.msra.mxu0 %v201_v15  ;;  %1091 = vmatpush3.msra.mxu1 %v288_v18 }
  0x1e   : > { %1059 = vmatprep.subr.mxu0 %v1182_v1  ;;  %1092 = vmatprep.subr.mxu1 %v1182_v1 }
  0x1f   : > { %1060 = vmatpush3.msra.mxu0 %v200_v17  ;;  %1093 = vmatpush3.msra.mxu1 %v287_v20 }
  0x20   : > { %1061 = vmatprep.subr.mxu0 %v1182_v1  ;;  %1094 = vmatprep.subr.mxu1 %v1182_v1 }
  0x21   : > { %1062 = vmatpush3.msra.mxu0 %v199_v19  ;;  %1095 = vmatpush3.msra.mxu1 %v286_v22 }
  0x22   : > { %1063 = vmatprep.subr.mxu0 %v1182_v1  ;;  %1096 = vmatprep.subr.mxu1 %v1182_v1 }
  0x23   : > { %1064 = vmatpush3.msra.mxu0 %v198_v21  ;;  %1097 = vmatpush3.msra.mxu1 %v285_v24 }
  0x24   : > { %1065 = vmatprep.subr.mxu0 %v1182_v1  ;;  %1098 = vmatprep.subr.mxu1 %v1182_v1 }
  0x25   : > { %1066 = vmatpush3.msra.mxu0 %v197_v23  ;;  %1099 = vmatpush3.msra.mxu1 %v284_v26 }
  0x26   : > { %1067 = vmatprep.subr.mxu0 %v1182_v1  ;;  %1100 = vmatprep.subr.mxu1 %v1182_v1 }
  0x27   : > { %1068 = vmatpush3.msra.mxu0 %v196_v25  ;;  %1101 = vmatpush3.msra.mxu1 %v283_v28 }
  0x28   : > { %1069 = vmatprep.subr.mxu0 %v1182_v1  ;;  %1102 = vmatprep.subr.mxu1 %v1182_v1 }
  0x29   : > { %1070 = vmatpush3.msra.mxu0 %v195_v27  ;;  %1103 = vmatpush3.msra.mxu1 %v282_v30 }
  0x2a   : > { %1071 = vmatprep.subr.mxu0 %v1182_v1  ;;  %1104 = vmatprep.subr.mxu1 %v1182_v1 }
  0x2b   : > { %1072 = vmatpush3.msra.mxu0 %v194_v29  ;;  %1105 = vmatpush3.msra.mxu1 %v281_v32 }
  0x2c   : > { %1074 = vmatmul.mubr.f32.vlgmr.msra.gmra.mxu0 %v193_v31  ;;  %1111 = vmatprep.subr.mxu0 %v1182_v1 }
  0x2d   : > { %1106 = vmatprep.subr.mxu1 %v1182_v1  ;;  %1113 = vmatprep.mubr.msk.f32.mxu0 %vm1183_vm0, %v1182_v1 }
  0x2e   : > { %1107 = vmatpush3.msra.mxu1 %v280_v33  ;;  %1153 = vset.pattern.permute.xlu1 %v1184_v36 }
  0x2f   : > { %1116 = vmatprep.subr.mxu1 %v1182_v1  ;;  %1152 = vset.pattern.permute.xlu0 %v1185_v37 }
  0xec   : > { %v1376_v34 = vpop.f32.mrf.mxu0 }
  0xed   : > { %1109 = vmatmul.mubr.f32.vlgmr.msra.gmra.mxu1 %v1376_v34  ;;  %1112 = vmatpush3.msra.mxu0 %v1376_v34 }
  0xee   : > { %v1075_v35 = vpop.f32.mrf.mxu0  ;;  %1121 = vmatprep.subr.mxu0 %v1182_v1  ;;  %1118 = vmatprep.mubr.msk.f32.mxu1 %vm1183_vm0, %v1182_v1 }
 0x1ad   : > { %v362_v38 = vpop.f32.mrf.mxu1 }
 0x1ae   : > { %637 = vrot.lane.b32.xlu1 %v362_v38, %s1186_s11  ;;  %368 = vrot.lane.b32.xlu0 %v362_v38, %s1187_s12 }
 0x1af   : > { %v1110_v39 = vpop.f32.mrf.mxu1 }
 0x1b2   : > { %772 = vrot.lane.b32.xlu1 %v362_v38, %s1188_s13  ;;  %501 = vrot.lane.b32.xlu0 %v362_v38, %s1189_s14 }
 0x1b6   : > { %537 = vperm.xlu1 %1153, %v362_v38   ;;  %404 = vperm.xlu0 %1152, %v362_v38  }
 0x1ba   : > { %1154 = vset.pattern.permute.xlu1 %v1190_v40  ;;  %1155 = vset.pattern.permute.xlu0 %v1191_v41 }
 0x1bb   : > { %673 = vperm.xlu1 %1154, %v362_v38   ;;  %808 = vperm.xlu0 %1155, %v362_v38  }
 0x220   : > { %v638_v42 = vpop.permute.xlu1 %637  ;;  %v369_v43 = vpop.permute.xlu0 %368 }
 0x221   : > { %371 = vxpose.xlu1.b32.start.end [1/1] (short) (narrow) %v369_v43, 8 }
 0x224   : > { %v773_v44 = vpop.permute.xlu1 %772  ;;  %v502_v45 = vpop.permute.xlu0 %501 }
 0x225   : > { %775 = vxpose.xlu1.b32.start.end [1/1] (short) (narrow) %v773_v44, 8  ;;  %504 = vxpose.xlu0.b32.start.end [1/1] (short) (narrow) %v502_v45, 8 }
 0x229   : > { %640 = vxpose.xlu0.b32.start.end [1/1] (short) (narrow) %v638_v42, 8 }
 0x231   : > { %v538_v47 = vpop.permute.xlu1 %537  ;;  %v405_v49 = vpop.permute.xlu0 %404 }
 0x236   : > { %v674_v50 = vpop.permute.xlu1 %673  ;;  %v809_v52 = vpop.permute.xlu0 %808 }
 0x29d   : > { %v387_v53 = vpop.trf.xlu1 }
 0x29e   : > { %v410_v54 = vrot.slane %v387_v53, %v409_v51 }
 0x2a0   : > { %v411_v55 = vadd.f32 %v410_v54, %v405_v49 }
 0x2a1   : > { %v791_v56 = vpop.trf.xlu1  ;;  %v520_v57 = vpop.trf.xlu0 }
 0x2a2   : > { %v413_v58 = vmul.f32 0.2, %v411_v55  ;;  %v814_v59 = vrot.slane %v791_v56, %v409_v51  ;;  %v543_v60 = vrot.slane %v520_v57, %v409_v51  ;;  %vm412_vm1 = vcmp.gt.f32.partialorder %v411_v55, 0.0 }
 0x2a4   : > { %v815_v62 = vadd.f32 %v814_v59, %v809_v52  ;;  %v544_v63 = vadd.f32 %v543_v60, %v538_v47  ;;  %v414_v0 = vsel %vm412_vm1, %v411_v55, %v413_v58 }
 0x2a5   : > { %v656_v2 = vpop.trf.xlu0  ;;  %v415_v3 = vadd.f32 %v414_v0, %v366_v61 }
 0x2a6   : > { %v817_v4 = vmul.f32 0.2, %v815_v62  ;;  %v546_v5 = vmul.f32 0.2, %v544_v63  ;;  %v679_v6 = vrot.slane %v656_v2, %v409_v51  ;;  %vm816_vm3 = vcmp.gt.f32.partialorder %v815_v62, 0.0 }
 0x2a7   : > { %v417_v7 = vsel %vm416_vm2, %v415_v3, -inf  ;;  %vm545_vm4 = vcmp.gt.f32.partialorder %v544_v63, 0.0 }
 0x2a8   : > { %v680_v8 = vadd.f32 %v679_v6, %v674_v50  ;;  %418 = vmax.xlane.f32.xlu0 %v417_v7  ;;  %v818_v9 = vsel %vm816_vm3, %v815_v62, %v817_v4  ;;  %v547_v10 = vsel %vm545_vm4, %v544_v63, %v546_v5 }
 0x2a9   : > { %v819_v11 = vadd.f32 %v818_v9, %v366_v61  ;;  %v548_v12 = vadd.f32 %v547_v10, %v366_v61 }
 0x2aa   : > { %v682_v13 = vmul.f32 0.2, %v680_v8  ;;  %vm681_vm5 = vcmp.gt.f32.partialorder %v680_v8, 0.0 }
 0x2ab   : > { %v820_v14 = vsel %vm416_vm2, %v819_v11, -inf  ;;  %v549_v15 = vsel %vm416_vm2, %v548_v12, -inf }
 0x2ac   : > { %821 = vmax.xlane.f32.xlu0 %v820_v14  ;;  %550 = vmax.xlane.f32.xlu1 %v549_v15  ;;  %v683_v16 = vsel %vm681_vm5, %v680_v8, %v682_v13 }
 0x2ad   : > { %v684_v17 = vadd.f32 %v683_v16, %v366_v61 }
 0x2af   : > { %v685_v18 = vsel %vm416_vm2, %v684_v17, -inf }
 0x2b0   : > { %686 = vmax.xlane.f32.xlu1 %v685_v18 }
 0x2c1   : > { %561 = vrot.lane.b32.xlu1 %v1376_v34, %s1192_s20 }
 0x331   : > { %v419_v19 = vpop.xlane.xlu0 %418 }
 0x332   : > { %v420_v20 = vsub.f32 %v415_v3, %v419_v19 }
 0x334   : > { %v421_v21 = vmul.f32 1.442695, %v420_v20 }
 0x335   : > { %v551_v22 = vpop.xlane.xlu1 %550  ;;  %v822_v23 = vpop.xlane.xlu0 %821 }
 0x336   : > { %1156 = vpow2.f32 %v421_v21  ;;  %v552_v24 = vsub.f32 %v548_v12, %v551_v22  ;;  %v823_v25 = vsub.f32 %v819_v11, %v822_v23 }
 0x338   : > { %v553_v26 = vmul.f32 1.442695, %v552_v24  ;;  %v824_v27 = vmul.f32 1.442695, %v823_v25 }
 0x339   : > { %v687_v28 = vpop.xlane.xlu1 %686 }
 0x33a   : > { %1158 = vpow2.f32 %v553_v26  ;;  %v688_v29 = vsub.f32 %v684_v17, %v687_v28 }
 0x33b   : > { %1160 = vpow2.f32 %v824_v27 }
 0x33c   : > { %v689_v30 = vmul.f32 1.442695, %v688_v29 }
 0x33d   : > { %v562_v31 = vpop.permute.xlu1 %561 }
 0x33e   : > { %1162 = vpow2.f32 %v689_v30  ;;  %1117 = vmatpush3.msra.mxu1 %v562_v31 }
 0x33f   : > { %1126 = vmatprep.subr.mxu1 %v1182_v1 }
 0x343   : > { %v1157_v32 = vpop.eup %1156 }
 0x344   : > { %v423_v33 = vsel %vm416_vm2, %v1157_v32, 0.0 }
 0x345   : > { %424 = vadd.xlane.f32.xlu1 %v423_v33 }
 0x347   : > { %v1159_v35 = vpop.eup %1158 }
 0x348   : > { %v555_v36 = vsel %vm416_vm2, %v1159_v35, 0.0  ;;  %v1161_v37 = vpop.eup %1160 }
 0x349   : > { %556 = vadd.xlane.f32.xlu0 %v555_v36  ;;  %v826_v40 = vsel %vm416_vm2, %v1161_v37, 0.0 }
 0x34b   : > { %v1163_v38 = vpop.eup %1162 }
 0x34c   : > { %v691_v39 = vsel %vm416_vm2, %v1163_v38, 0.0 }
 0x34d   : > { %692 = vadd.xlane.f32.xlu1 %v691_v39  ;;  %827 = vadd.xlane.f32.xlu0 %v826_v40 }
 0x35e   : > { %831 = vrot.lane.b32.xlu1 %v1376_v34, %s1193_s21 }
 0x363   : > { %696 = vrot.lane.b32.xlu0 %v1376_v34, %s1194_s22 }
 0x3ce   : > { %v425_v41 = vpop.xlane.xlu1 %424 }
 0x3cf   : > { %1164 = vrcp.f32 %v425_v41 }
 0x3d2   : > { %v557_v42 = vpop.xlane.xlu0 %556 }
 0x3d3   : > { %1166 = vrcp.f32 %v557_v42 }
 0x3d6   : > { %v693_v43 = vpop.xlane.xlu1 %692  ;;  %v828_v44 = vpop.xlane.xlu0 %827 }
 0x3d7   : > { %1168 = vrcp.f32 %v693_v43 }
 0x3d8   : > { %1170 = vrcp.f32 %v828_v44 }
 0x3da   : > { %v697_v47 = vpop.permute.xlu0 %696  ;;  %v832_v34 = vpop.permute.xlu1 %831 }
 0x3dc   : > { %v1165_v45 = vpop.eup %1164 }
 0x3dd   : > { %v427_v46 = vmul.f32 %v1165_v45, %v1157_v32 }
 0x3df   : > { %1114 = vmatmul.mubr.msk.f32.vlgmr.msra.gmra.mxu0 %vm416_vm2, %v427_v46 }
 0x3e0   : > { %v1167_v48 = vpop.eup %1166  ;;  %1122 = vmatpush3.msra.mxu0 %v697_v47  ;;  %1123 = vmatprep.mubr.msk.f32.mxu0 %vm1183_vm0, %v1182_v1 }
 0x3e1   : > { %v559_v49 = vmul.f32 %v1167_v48, %v1159_v35 }
 0x3e3   : > { %1119 = vmatmul.mubr.msk.f32.vlgmr.msra.gmra.mxu1 %vm416_vm2, %v559_v49 }
 0x3e4   : > { %v1169_v50 = vpop.eup %1168  ;;  %1127 = vmatpush3.msra.mxu1 %v832_v34  ;;  %1128 = vmatprep.mubr.msk.f32.mxu1 %vm1183_vm0, %v1182_v1 }
 0x3e5   : > { %v1171_v51 = vpop.eup %1170  ;;  %v695_v52 = vmul.f32 %v1169_v50, %v1163_v38 }
 0x3e6   : > { %v830_v53 = vmul.f32 %v1171_v51, %v1161_v37 }
 0x3e7   : > { %1124 = vmatmul.mubr.msk.f32.vlgmr.msra.gmra.mxu0 %vm416_vm2, %v695_v52 }
 0x3e8   : > { %1129 = vmatmul.mubr.msk.f32.vlgmr.msra.gmra.mxu1 %vm416_vm2, %v830_v53 }
 0x49f   : > { %v497_v54 = vpop.f32.mrf.mxu0 }
 0x4a1   : > { %v1115_v55 = vpop.f32.mrf.mxu0 }
 0x4a3   : > { %v633_v56 = vpop.f32.mrf.mxu1 }
 0x4a4   : > { %908 = vrot.lane.b32.xlu1 %v633_v56, %s1193_s21 }
 0x4a5   : > { %v1120_v57 = vpop.f32.mrf.mxu1 }
 0x4a7   : > { %v768_v58 = vpop.f32.mrf.mxu0 }
 0x4a8   : > { %v903_v59 = vpop.f32.mrf.mxu1  ;;  %912 = vrot.lane.b32.xlu0 %v768_v58, %s1194_s22 }
 0x4a9   : > { %916 = vrot.lane.b32.xlu1 %v903_v59, %s1192_s20  ;;  %v1125_v1 = vpop.f32.mrf.mxu0 }
 0x4aa   : > { %v1130_v60 = vpop.f32.mrf.mxu1 }
 0x516   : > { %v909_v61 = vpop.permute.xlu1 %908 }
 0x517   : > { %v920_v62 = vsel %vm919_vm6, %v497_v54, %v909_v61 }
 0x51a   : > { %v913_v63 = vpop.permute.xlu0 %912 }
 0x51b   : > { %v917_v0 = vpop.permute.xlu1 %916  ;;  %v922_v2 = vsel %vm921_vm7, %v920_v62, %v913_v63 }
 0x51c   : > { %v924_v3 = vsel %vm923_vm8, %v922_v2, %v917_v0 }
 0x51d   : > { %v926_v4 = vmin.f32 %v924_v3, 0.0  ;;  %vm925_vm9 = vcmp.gt.f32.partialorder %v924_v3, 0.0 }
 0x51f   : > { %v927_v5 = vmul.f32 1.442695, %v926_v4 }
 0x521   : > { %1172 = vpow2.f32 %v927_v5 }
 0x52e   : > { %v1173_v6 = vpop.eup %1172 }
 0x52f   : > { %v996_v7 = vadd.f32 -1.0, %v1173_v6 }
 0x531   : > { %v930_v8 = vsel %vm925_vm9, %v924_v3, %v996_v7 }
 0x532   : > { %931 = vst [vmem:[%s192_s25] sm:$0xff] %v930_v8 }
 0x533 PF: > { %s14_s15 = sadd.s32 1, %s1180_s15  }
 0x534   : > { %p11_p4 = scmp.ge.s32.totalorder %s14_s15, 4  }
 0x536   :  { %13 = sbr.rel (!%p11_p4) target bundleno = 1 (0x1), region = 66 }

// kernel: model_forward.7
= control target key start
LH: loop header
LB: loop body
LE: loop exit
PB: predicated region body
PF: predicated region fallthrough
CT: control target
= control target key end

     0   :  { %s1442_s15 = smov 0   ;;  %s1624_s0 = inlined_call_operand.vmem [shape: f32[2,16,128], index: 0, kind: input, shape index: {}]   ;;  %s1625_s1 = inlined_call_operand.vmem [shape: f32[128,128], index: 1, kind: input, shape index: {}]   ;;  %s1626_s2 = inlined_call_operand.vmem [shape: f32[128,8], index: 2, kind: input, shape index: {}]   ;;  %s1627_s3 = inlined_call_operand.vmem [shape: f32[16,16], index: 3, kind: input, shape index: {}]   ;;  %s1628_s4 = inlined_call_operand.vmem [shape: f32[2,16,128], index: 4, kind: output, shape index: {}]  }
   0x1 LB: > { %s1161_s16 = sadd.s32 4294967295, %s1404_s15   ;;  %p1165_p0 = scmp.ge.s32.totalorder %s1404_s15, 1  ;;  %s1404_s15 = sphi %s1442_s15, %s14_s15  }
   0x2   : > { %p162_p1 = scmp.lt.s32.totalorder %s1404_s15, 3 }
   0x4   : > { %p163_p2 = pnand %p1165_p0, %p162_p1 }
   0x5   : > { %p188_p3 = scmp.lt.s32.totalorder (!%p163_p2), %s1161_s16, 1  ;;  %s1408_s14 = smov (!%p163_p2), 122  }
   0x6   : > { %166 = sbr.rel (%p163_p2) target bundleno = 1364 (0x554), region = 36  ;;  %s1409_s17 = smov (!%p163_p2), 124  }
   0x7   : > { %s1410_s18 = smov (!%p163_p2), 123   ;;  %s1411_s19 = smov (!%p163_p2), 121  }
   0x8   : > { %s1414_s24 = smov (!%p163_p2), 96   ;;  %s1415_s26 = smov (!%p163_p2), 64  }
   0x9   : > { %s1416_s27 = smov (!%p163_p2), 32  }
   0xb   : > { %v215_v0 = vld [vmem:[%s1625_s1 + $0x78] sm:$0xff]  ;;  %v214_v1 = vld [vmem:[%s1625_s1 + $0x70] sm:$0xff]  ;;  %v213_v2 = vld [vmem:[%s1625_s1 + $0x68] sm:$0xff]  ;;  %s1630_s16 = smov (!%p188_p3, %s1161_s16), 1  ;;  %v1406_v36 = vmov 1   ;;  %v1407_v37 = vmov 0   ;;  %v432_v54 = vlaneseq }
   0xc   : > { %1236 = vmatprep.subr.mxu0 %v215_v0  ;;  %v212_v3 = vld [vmem:[%s1625_s1 + $0x60] sm:$0xff]  ;;  %s1182_s25 = sshll.u32 %s1630_s16, 4  ;;  %v306_v4 = vld [vmem:[%s1626_s2 + $0x78] sm:$0xff]  ;;  %v305_v7 = vld [vmem:[%s1626_s2 + $0x70] sm:$0xff]  ;;  %1355 = vset.pattern.permute.xlu0 %v1406_v36  ;;  %v1412_v40 = vmov 2   ;;  %v1413_v41 = vmov 3  }
   0xd   : > { %1237 = vmatpush3.msra.mxu0 %v215_v0  ;;  %s1470_s28 = scalar_lea.vmem %s1624_s0, %s1182_s25  ;;  %v211_v5 = vld [vmem:[%s1625_s1 + $0x58] sm:$0xff]  ;;  %1271 = vmatprep.subr.mxu1 %v306_v4  ;;  %v210_v8 = vld [vmem:[%s1625_s1 + $0x50] sm:$0xff]  ;;  %v304_v9 = vld [vmem:[%s1626_s2 + $0x68] sm:$0xff]  ;;  %v433_v56 = vshrl.u32 %v432_v54, 7  ;;  %vm446_vm1 = vcmask 130048   ;;  %vm1083_vm9 = vcmask 261120   ;;  %s197_s5 = scalar_lea.vmem %s1628_s4, %s1182_s25 }
   0xe   : > { %1238 = vmatprep.subr.mxu0 %v214_v1  ;;  %v198_v6 = vld [vmem:[%s1470_s28] sm:$0xff]  ;;  %1272 = vmatpush3.msra.mxu1 %v306_v4  ;;  %v209_v10 = vld [vmem:[%s1625_s1 + $0x48] sm:$0xff]  ;;  %v302_v13 = vld [vmem:[%s1626_s2 + $0x58] sm:$0xff]  ;;  %vm1086_vm10 = vcmask 523264   ;;  %vm1089_vm11 = vcmask 785408  }
   0xf   : > { %1239 = vmatpush3.msra.mxu0 %v214_v1  ;;  %1268 = vmatprep.mubr.f32.mxu0 %v198_v6  ;;  %v303_v11 = vld [vmem:[%s1626_s2 + $0x60] sm:$0xff]  ;;  %v207_v14 = vld [vmem:[%s1625_s1 + $0x38] sm:$0xff]  ;;  %v301_v15 = vld [vmem:[%s1626_s2 + $0x50] sm:$0xff]  ;;  %v434_v59 = vsub.s32 0, %v433_v56 }
  0x10   : > { %1240 = vmatprep.subr.mxu0 %v213_v2  ;;  %1273 = vmatprep.subr.mxu1 %v305_v7  ;;  %v208_v12 = vld [vmem:[%s1625_s1 + $0x40] sm:$0xff]  ;;  %v206_v16 = vld [vmem:[%s1625_s1 + $0x30] sm:$0xff]  ;;  %v300_v17 = vld [vmem:[%s1626_s2 + $0x48] sm:$0xff] }
  0x11   : > { %1241 = vmatpush3.msra.mxu0 %v213_v2  ;;  %1274 = vmatpush3.msra.mxu1 %v305_v7  ;;  %v205_v18 = vld [vmem:[%s1625_s1 + $0x28] sm:$0xff]  ;;  %v299_v19 = vld [vmem:[%s1626_s2 + $0x40] sm:$0xff]  ;;  %v298_v21 = vld [vmem:[%s1626_s2 + $0x38] sm:$0xff] }
  0x12   : > { %1242 = vmatprep.subr.mxu0 %v212_v3  ;;  %1275 = vmatprep.subr.mxu1 %v304_v9  ;;  %v204_v20 = vld [vmem:[%s1625_s1 + $0x20] sm:$0xff]  ;;  %v203_v22 = vld [vmem:[%s1625_s1 + $0x18] sm:$0xff]  ;;  %v297_v23 = vld [vmem:[%s1626_s2 + $0x30] sm:$0xff] }
  0x13   : > { %1243 = vmatpush3.msra.mxu0 %v212_v3  ;;  %1276 = vmatpush3.msra.mxu1 %v304_v9  ;;  %v202_v24 = vld [vmem:[%s1625_s1 + $0x10] sm:$0xff]  ;;  %v296_v25 = vld [vmem:[%s1626_s2 + $0x28] sm:$0xff]  ;;  %v295_v27 = vld [vmem:[%s1626_s2 + $0x20] sm:$0xff] }
  0x14   : > { %1244 = vmatprep.subr.mxu0 %v211_v5  ;;  %1277 = vmatprep.subr.mxu1 %v303_v11  ;;  %v201_v26 = vld [vmem:[%s1625_s1 + $0x8] sm:$0xff]  ;;  %v200_v28 = vld [vmem:[%s1625_s1] sm:$0xff]  ;;  %v294_v29 = vld [vmem:[%s1626_s2 + $0x18] sm:$0xff] }
  0x15   : > { %1245 = vmatpush3.msra.mxu0 %v211_v5  ;;  %1278 = vmatpush3.msra.mxu1 %v303_v11  ;;  %v199_v30 = vld [vmem:[%s1470_s28 + $0x8] sm:$0xff]  ;;  %v293_v31 = vld [vmem:[%s1626_s2 + $0x10] sm:$0xff]  ;;  %v291_v33 = vld [vmem:[%s1626_s2] sm:$0xff] }
  0x16   : > { %1246 = vmatprep.subr.mxu0 %v210_v8  ;;  %1279 = vmatprep.subr.mxu1 %v302_v13  ;;  %v292_v32 = vld [vmem:[%s1626_s2 + $0x8] sm:$0xff]  ;;  %v382_v6 = vld [vmem:[%s1627_s3] sm:$0xff] }
  0x17   : > { %1247 = vmatpush3.msra.mxu0 %v210_v8  ;;  %1280 = vmatpush3.msra.mxu1 %v302_v13  ;;  %v383_v2 = vld [vmem:[%s1627_s3 + $0x8] sm:$0xff] }
  0x18   : > { %1248 = vmatprep.subr.mxu0 %v209_v10  ;;  %1281 = vmatprep.subr.mxu1 %v301_v15 }
  0x19   : > { %1249 = vmatpush3.msra.mxu0 %v209_v10  ;;  %1282 = vmatpush3.msra.mxu1 %v301_v15 }
  0x1a   : > { %1250 = vmatprep.subr.mxu0 %v208_v12  ;;  %1283 = vmatprep.subr.mxu1 %v300_v17 }
  0x1b   : > { %1251 = vmatpush3.msra.mxu0 %v208_v12  ;;  %1284 = vmatpush3.msra.mxu1 %v300_v17 }
  0x1c   : > { %1252 = vmatprep.subr.mxu0 %v207_v14  ;;  %1285 = vmatprep.subr.mxu1 %v299_v19 }
  0x1d   : > { %1253 = vmatpush3.msra.mxu0 %v207_v14  ;;  %1286 = vmatpush3.msra.mxu1 %v299_v19 }
  0x1e   : > { %1254 = vmatprep.subr.mxu0 %v206_v16  ;;  %1287 = vmatprep.subr.mxu1 %v298_v21 }
  0x1f   : > { %1255 = vmatpush3.msra.mxu0 %v206_v16  ;;  %1288 = vmatpush3.msra.mxu1 %v298_v21 }
  0x20   : > { %1256 = vmatprep.subr.mxu0 %v205_v18  ;;  %1289 = vmatprep.subr.mxu1 %v297_v23 }
  0x21   : > { %1257 = vmatpush3.msra.mxu0 %v205_v18  ;;  %1290 = vmatpush3.msra.mxu1 %v297_v23 }
  0x22   : > { %1258 = vmatprep.subr.mxu0 %v204_v20  ;;  %1291 = vmatprep.subr.mxu1 %v296_v25 }
  0x23   : > { %1259 = vmatpush3.msra.mxu0 %v204_v20  ;;  %1292 = vmatpush3.msra.mxu1 %v296_v25 }
  0x24   : > { %1260 = vmatprep.subr.mxu0 %v203_v22  ;;  %1293 = vmatprep.subr.mxu1 %v295_v27 }
  0x25   : > { %1261 = vmatpush3.msra.mxu0 %v203_v22  ;;  %1294 = vmatpush3.msra.mxu1 %v295_v27 }
  0x26   : > { %1262 = vmatprep.subr.mxu0 %v202_v24  ;;  %1295 = vmatprep.subr.mxu1 %v294_v29 }
  0x27   : > { %1263 = vmatpush3.msra.mxu0 %v202_v24  ;;  %1296 = vmatpush3.msra.mxu1 %v294_v29 }
  0x28   : > { %1264 = vmatprep.subr.mxu0 %v201_v26  ;;  %1297 = vmatprep.subr.mxu1 %v293_v31 }
  0x29   : > { %1265 = vmatpush3.msra.mxu0 %v201_v26  ;;  %1298 = vmatpush3.msra.mxu1 %v293_v31 }
  0x2a   : > { %1266 = vmatprep.subr.mxu0 %v200_v28  ;;  %1299 = vmatprep.subr.mxu1 %v292_v32 }
  0x2b   : > { %1267 = vmatpush3.msra.mxu0 %v200_v28  ;;  %1300 = vmatpush3.msra.mxu1 %v292_v32 }
  0x2c   : > { %1269 = vmatmul.mubr.f32.vlgmr.msra.gmra.mxu0 %v199_v30  ;;  %1301 = vmatprep.subr.mxu1 %v291_v33 }
  0x2d   : > { %1302 = vmatpush3.msra.mxu1 %v291_v33  ;;  %1354 = vset.pattern.permute.xlu1 %v1407_v37 }
  0xec   : > { %v1558_v34 = vpop.f32.mrf.mxu0 }
  0xed   : > { %1306 = vmatprep.subr.mxu0 %v1558_v34 }
  0xee   : > { %v1561_v35 = vpop.f32.mrf.mxu0  ;;  %1307 = vmatpush3.msra.mxu0 %v1558_v34 }
  0xef   : > { %1303 = vmatprep.mubr.f32.mxu1 %v1561_v35  ;;  %1308 = vmatprep.subr.mxu0 %v1561_v35 }
  0xf0   : > { %1304 = vmatmul.mubr.f32.vlgmr.msra.gmra.mxu1 %v1558_v34  ;;  %1309 = vmatpush3.msra.mxu0 %v1561_v35 }
 0x1b0   : > { %v1305_v38 = vpop.f32.mrf.mxu1 }
 0x1b1   : > { %723 = vrot.lane.b32.xlu0 %v1305_v38, %s1408_s14  ;;  %388 = vrot.lane.b32.xlu1 %v1305_v38, %s1409_s17 }
 0x1b2   : > { %v373_v39 = vpop.f32.mrf.mxu1 }
 0x1b5   : > { %593 = vperm.xlu0 %1355, %v1305_v38   ;;  %552 = vrot.lane.b32.xlu1 %v1305_v38, %s1410_s18 }
 0x1b9   : > { %892 = vrot.lane.b32.xlu1 %v1305_v38, %s1411_s19  ;;  %386 = vrot.lane.b32.xlu0 %v373_v39, %s1409_s17 }
 0x1ba   : > { %1358 = vset.pattern.permute.xlu0 %v1407_v37 }
 0x1bd   : > { %429 = vperm.xlu1 %1354, %v1305_v38   ;;  %550 = vrot.lane.b32.xlu0 %v373_v39, %s1410_s18 }
 0x1c1   : > { %1356 = vset.pattern.permute.xlu1 %v1412_v40  ;;  %721 = vrot.lane.b32.xlu0 %v373_v39, %s1408_s14 }
 0x1c2   : > { %764 = vperm.xlu1 %1356, %v1305_v38  }
 0x1c5   : > { %425 = vperm.xlu0 %1358, %v373_v39  }
 0x1c6   : > { %1357 = vset.pattern.permute.xlu1 %v1413_v41 }
 0x1c7   : > { %933 = vperm.xlu1 %1357, %v1305_v38  }
 0x1c9   : > { %1361 = vset.pattern.permute.xlu0 %v1413_v41 }
 0x1ca   : > { %929 = vperm.xlu0 %1361, %v373_v39  }
 0x1cb   : > { %890 = vrot.lane.b32.xlu1 %v373_v39, %s1411_s19 }
 0x1cc   : > { %1359 = vset.pattern.permute.xlu1 %v1406_v36 }
 0x1cf   : > { %589 = vperm.xlu1 %1359, %v373_v39  }
 0x1d3   : > { %1360 = vset.pattern.permute.xlu1 %v1412_v40 }
 0x1d4   : > { %760 = vperm.xlu1 %1360, %v373_v39  }
 0x223   : > { %v389_v42 = vpop.permute.xlu1 %388  ;;  %v724_v43 = vpop.permute.xlu0 %723 }
 0x227   : > { %v553_v44 = vpop.permute.xlu1 %552 }
 0x22b   : > { %v893_v46 = vpop.permute.xlu1 %892 }
 0x230   : > { %v594_v45 = vpop.permute.xlu0 %593 }
 0x234   : > { %v387_v47 = vpop.permute.xlu0 %386 }
 0x235   : > { %392 = vxpose.xlu1.b32.start [1/2] (short) (narrow) %v387_v47, 8 }
 0x238   : > { %v430_v48 = vpop.permute.xlu1 %429  ;;  %v551_v49 = vpop.permute.xlu0 %550 }
 0x239   : > { %393 = vxpose.xlu1.b32.end [2/2] (short) (narrow) %v389_v42, 8  ;;  %556 = vxpose.xlu0.b32.start [1/2] (short) (narrow) %v551_v49, 8 }
 0x23c   : > { %v722_v51 = vpop.permute.xlu0 %721 }
 0x23d   : > { %v765_v50 = vpop.permute.xlu1 %764  ;;  %557 = vxpose.xlu0.b32.end [2/2] (short) (narrow) %v553_v44, 8 }
 0x240   : > { %v426_v57 = vpop.permute.xlu0 %425 }
 0x241   : > { %727 = vxpose.xlu0.b32.start [1/2] (short) (narrow) %v722_v51, 8 }
 0x242   : > { %v934_v52 = vpop.permute.xlu1 %933 }
 0x245   : > { %728 = vxpose.xlu0.b32.end [2/2] (short) (narrow) %v724_v43, 8  ;;  %v930_v60 = vpop.permute.xlu0 %929 }
 0x246   : > { %v891_v53 = vpop.permute.xlu1 %890 }
 0x247   : > { %896 = vxpose.xlu1.b32.start [1/2] (short) (narrow) %v891_v53, 8 }
 0x24a   : > { %v590_v55 = vpop.permute.xlu1 %589 }
 0x24b   : > { %897 = vxpose.xlu1.b32.end [2/2] (short) (narrow) %v893_v46, 8 }
 0x24f   : > { %v761_v58 = vpop.permute.xlu1 %760 }
 0x2b1   : > { %v408_v61 = vpop.trf.xlu1 }
 0x2b2   : > { %v435_v62 = vrot.slane %v408_v61, %v434_v59 }
 0x2b4   : > { %v436_v63 = vadd.f32 %v435_v62, %v426_v57  ;;  %v437_v0 = vadd.f32 %v435_v62, %v430_v48 }
 0x2b5   : > { %v572_v1 = vpop.trf.xlu0 }
 0x2b6   : > { %v440_v3 = vmul.f32 0.2, %v436_v63  ;;  %v441_v4 = vmul.f32 0.2, %v437_v0  ;;  %v599_v5 = vrot.slane %v572_v1, %v434_v59  ;;  %vm439_vm0 = vcmp.gt.f32.partialorder %v437_v0, 0.0 }
 0x2b7   : > { %vm438_vm2 = vcmp.gt.f32.partialorder %v436_v63, 0.0 }
 0x2b8   : > { %v600_v7 = vadd.f32 %v599_v5, %v590_v55  ;;  %v601_v8 = vadd.f32 %v599_v5, %v594_v45  ;;  %v443_v9 = vsel %vm439_vm0, %v437_v0, %v441_v4  ;;  %v442_v10 = vsel %vm438_vm2, %v436_v63, %v440_v3 }
 0x2b9   : > { %v445_v11 = vadd.f32 %v443_v9, %v383_v2  ;;  %v444_v12 = vadd.f32 %v442_v10, %v382_v6 }
 0x2ba   : > { %v604_v13 = vmul.f32 0.2, %v600_v7  ;;  %v605_v14 = vmul.f32 0.2, %v601_v8  ;;  %vm603_vm3 = vcmp.gt.f32.partialorder %v601_v8, 0.0  ;;  %vm602_vm4 = vcmp.gt.f32.partialorder %v600_v7, 0.0 }
 0x2bb   : > { %v450_v15 = vsel %vm446_vm1, %v445_v11, -inf  ;;  %v447_v16 = vsel %vm446_vm1, %v444_v12, -inf }
 0x2bc   : > { %451 = vmax.xlane.f32.xlu1 %v450_v15  ;;  %448 = vmax.xlane.f32.xlu0 %v447_v16  ;;  %v607_v17 = vsel %vm603_vm3, %v601_v8, %v605_v14  ;;  %v606_v18 = vsel %vm602_vm4, %v600_v7, %v604_v13 }
 0x2bd   : > { %v743_v19 = vpop.trf.xlu0  ;;  %v609_v20 = vadd.f32 %v607_v17, %v383_v2  ;;  %v608_v21 = vadd.f32 %v606_v18, %v382_v6 }
 0x2be   : > { %v770_v22 = vrot.slane %v743_v19, %v434_v59 }
 0x2bf   : > { %v613_v23 = vsel %vm446_vm1, %v609_v20, -inf  ;;  %v610_v24 = vsel %vm446_vm1, %v608_v21, -inf }
 0x2c0   : > { %v771_v25 = vadd.f32 %v770_v22, %v761_v58  ;;  %v772_v26 = vadd.f32 %v770_v22, %v765_v50  ;;  %614 = vmax.xlane.f32.xlu1 %v613_v23  ;;  %611 = vmax.xlane.f32.xlu0 %v610_v24 }
 0x2c2   : > { %v775_v27 = vmul.f32 0.2, %v771_v25  ;;  %v776_v28 = vmul.f32 0.2, %v772_v26  ;;  %vm774_vm5 = vcmp.gt.f32.partialorder %v772_v26, 0.0  ;;  %vm773_vm6 = vcmp.gt.f32.partialorder %v771_v25, 0.0 }
 0x2c3   : > { %v912_v29 = vpop.trf.xlu1 }
 0x2c4   : > { %v939_v30 = vrot.slane %v912_v29, %v434_v59  ;;  %v778_v31 = vsel %vm774_vm5, %v772_v26, %v776_v28  ;;  %v777_v32 = vsel %vm773_vm6, %v771_v25, %v775_v27 }
 0x2c5   : > { %v780_v33 = vadd.f32 %v778_v31, %v383_v2  ;;  %v779_v36 = vadd.f32 %v777_v32, %v382_v6 }
 0x2c6   : > { %v940_v37 = vadd.f32 %v939_v30, %v930_v60  ;;  %v941_v38 = vadd.f32 %v939_v30, %v934_v52 }
 0x2c7   : > { %v784_v39 = vsel %vm446_vm1, %v780_v33, -inf  ;;  %v781_v40 = vsel %vm446_vm1, %v779_v36, -inf }
 0x2c8   : > { %v944_v41 = vmul.f32 0.2, %v940_v37  ;;  %v945_v42 = vmul.f32 0.2, %v941_v38  ;;  %785 = vmax.xlane.f32.xlu1 %v784_v39  ;;  %782 = vmax.xlane.f32.xlu0 %v781_v40  ;;  %vm943_vm7 = vcmp.gt.f32.partialorder %v941_v38, 0.0  ;;  %vm942_vm8 = vcmp.gt.f32.partialorder %v940_v37, 0.0 }
 0x2ca   : > { %v947_v43 = vsel %vm943_vm7, %v941_v38, %v945_v42  ;;  %v946_v44 = vsel %vm942_vm8, %v940_v37, %v944_v41 }
 0x2cb   : > { %v949_v45 = vadd.f32 %v947_v43, %v383_v2  ;;  %v948_v46 = vadd.f32 %v946_v44, %v382_v6 }
 0x2cd   : > { %v953_v47 = vsel %vm446_vm1, %v949_v45, -inf  ;;  %v950_v48 = vsel %vm446_vm1, %v948_v46, -inf }
 0x2ce   : > { %954 = vmax.xlane.f32.xlu1 %v953_v47  ;;  %951 = vmax.xlane.f32.xlu0 %v950_v48 }
 0x2df   : > { %634 = vrot.lane.b32.xlu1 %v1561_v35, %s1414_s24 }
 0x2e3   : > { %805 = vrot.lane.b32.xlu1 %v1558_v34, %s1415_s26 }
 0x2e4   : > { %636 = vrot.lane.b32.xlu0 %v1558_v34, %s1414_s24 }
 0x2e8   : > { %974 = vrot.lane.b32.xlu0 %v1558_v34, %s1416_s27 }
 0x345   : > { %v452_v49 = vpop.xlane.xlu1 %451  ;;  %v449_v50 = vpop.xlane.xlu0 %448 }
 0x346   : > { %v454_v51 = vsub.f32 %v445_v11, %v452_v49  ;;  %v453_v52 = vsub.f32 %v444_v12, %v449_v50 }
 0x348   : > { %v457_v53 = vmul.f32 1.442695, %v454_v51  ;;  %v455_v54 = vmul.f32 1.442695, %v453_v52 }
 0x349   : > { %v615_v55 = vpop.xlane.xlu1 %614  ;;  %v612_v56 = vpop.xlane.xlu0 %611 }
 0x34a   : > { %1362 = vpow2.f32 %v457_v53  ;;  %v617_v57 = vsub.f32 %v609_v20, %v615_v55  ;;  %v616_v58 = vsub.f32 %v608_v21, %v612_v56 }
 0x34b   : > { %1364 = vpow2.f32 %v455_v54 }
 0x34c   : > { %v620_v59 = vmul.f32 1.442695, %v617_v57  ;;  %v618_v60 = vmul.f32 1.442695, %v616_v58 }
 0x34e   : > { %1366 = vpow2.f32 %v620_v59 }
 0x34f   : > { %1368 = vpow2.f32 %v618_v60 }
 0x351   : > { %v786_v61 = vpop.xlane.xlu1 %785  ;;  %v783_v62 = vpop.xlane.xlu0 %782 }
 0x352   : > { %v788_v63 = vsub.f32 %v780_v33, %v786_v61  ;;  %v787_v34 = vsub.f32 %v779_v36, %v783_v62 }
 0x354   : > { %v791_v0 = vmul.f32 1.442695, %v788_v63  ;;  %v789_v1 = vmul.f32 1.442695, %v787_v34 }
 0x356   : > { %1370 = vpow2.f32 %v791_v0 }
 0x357   : > { %v1363_v2 = vpop.eup %1362  ;;  %1372 = vpow2.f32 %v789_v1  ;;  %v955_v3 = vpop.xlane.xlu1 %954 }
 0x358   : > { %v952_v4 = vpop.xlane.xlu0 %951  ;;  %v1365_v5 = vpop.eup %1364  ;;  %v957_v6 = vsub.f32 %v949_v45, %v955_v3  ;;  %v462_v8 = vsel %vm446_vm1, %v1363_v2, 0.0 }
 0x359   : > { %v956_v7 = vsub.f32 %v948_v46, %v952_v4  ;;  %463 = vadd.xlane.f32.xlu1 %v462_v8  ;;  %v459_v9 = vsel %vm446_vm1, %v1365_v5, 0.0 }
 0x35a   : > { %v960_v10 = vmul.f32 1.442695, %v957_v6  ;;  %460 = vadd.xlane.f32.xlu0 %v459_v9 }
 0x35b   : > { %v958_v11 = vmul.f32 1.442695, %v956_v7  ;;  %v1367_v12 = vpop.eup %1366  ;;  %v635_v13 = vpop.permute.xlu1 %634 }
 0x35c   : > { %v637_v14 = vpop.permute.xlu0 %636  ;;  %v1369_v15 = vpop.eup %1368  ;;  %1374 = vpow2.f32 %v960_v10  ;;  %v625_v16 = vsel %vm446_vm1, %v1367_v12, 0.0 }
 0x35d   : > { %1313 = vmatprep.subr.mxu1 %v637_v14  ;;  %1376 = vpow2.f32 %v958_v11  ;;  %626 = vadd.xlane.f32.xlu1 %v625_v16  ;;  %v622_v17 = vsel %vm446_vm1, %v1369_v15, 0.0 }
 0x35e   : > { %1314 = vmatpush3.msra.mxu1 %v637_v14  ;;  %623 = vadd.xlane.f32.xlu0 %v622_v17 }
 0x35f   : > { %1315 = vmatprep.subr.mxu1 %v635_v13  ;;  %v806_v18 = vpop.permute.xlu1 %805 }
 0x360   : > { %1316 = vmatpush3.msra.mxu1 %v635_v13  ;;  %v975_v19 = vpop.permute.xlu0 %974  ;;  %1320 = vmatprep.subr.mxu0 %v806_v18 }
 0x361   : > { %1327 = vmatprep.subr.mxu1 %v975_v19 }
 0x363   : > { %v1371_v20 = vpop.eup %1370 }
 0x364   : > { %v1373_v21 = vpop.eup %1372  ;;  %v796_v22 = vsel %vm446_vm1, %v1371_v20, 0.0 }
 0x365   : > { %797 = vadd.xlane.f32.xlu1 %v796_v22  ;;  %v793_v23 = vsel %vm446_vm1, %v1373_v21, 0.0 }
 0x366   : > { %794 = vadd.xlane.f32.xlu0 %v793_v23 }
 0x369   : > { %v1375_v24 = vpop.eup %1374 }
 0x36a   : > { %v1377_v25 = vpop.eup %1376  ;;  %v965_v26 = vsel %vm446_vm1, %v1375_v24, 0.0 }
 0x36b   : > { %966 = vadd.xlane.f32.xlu1 %v965_v26  ;;  %v962_v27 = vsel %vm446_vm1, %v1377_v25, 0.0 }
 0x36c   : > { %963 = vadd.xlane.f32.xlu0 %v962_v27 }
 0x37c   : > { %803 = vrot.lane.b32.xlu1 %v1561_v35, %s1415_s26 }
 0x382   : > { %972 = vrot.lane.b32.xlu0 %v1561_v35, %s1416_s27 }
 0x3e2   : > { %v464_v28 = vpop.xlane.xlu1 %463 }
 0x3e3   : > { %1378 = vrcp.f32 %v464_v28  ;;  %v461_v29 = vpop.xlane.xlu0 %460 }
 0x3e4   : > { %1380 = vrcp.f32 %v461_v29 }
 0x3e6   : > { %v627_v30 = vpop.xlane.xlu1 %626 }
 0x3e7   : > { %1382 = vrcp.f32 %v627_v30  ;;  %v624_v31 = vpop.xlane.xlu0 %623 }
 0x3e8   : > { %1384 = vrcp.f32 %v624_v31 }
 0x3ee   : > { %v798_v32 = vpop.xlane.xlu1 %797 }
 0x3ef   : > { %1386 = vrcp.f32 %v798_v32  ;;  %v795_v33 = vpop.xlane.xlu0 %794 }
 0x3f0   : > { %v1379_v36 = vpop.eup %1378  ;;  %1388 = vrcp.f32 %v795_v33 }
 0x3f1   : > { %v1381_v37 = vpop.eup %1380  ;;  %v468_v38 = vmul.f32 %v1379_v36, %v1363_v2 }
 0x3f2   : > { %v467_v39 = vmul.f32 %v1381_v37, %v1365_v5 }
 0x3f4   : > { %v1383_v40 = vpop.eup %1382  ;;  %1310 = vmatprep.mubr.msk.f32.mxu0 %vm446_vm1, %v467_v39  ;;  %v967_v35 = vpop.xlane.xlu1 %966 }
 0x3f5   : > { %v1385_v41 = vpop.eup %1384  ;;  %1390 = vrcp.f32 %v967_v35  ;;  %1311 = vmatmul.mubr.msk.f32.vlgmr.msra.gmra.mxu0 %vm446_vm1, %v468_v38  ;;  %v964_v42 = vpop.xlane.xlu0 %963  ;;  %v631_v43 = vmul.f32 %v1383_v40, %v1367_v12 }
 0x3f6   : > { %1321 = vmatpush3.msra.mxu0 %v806_v18  ;;  %1392 = vrcp.f32 %v964_v42  ;;  %v630_v44 = vmul.f32 %v1385_v41, %v1369_v15 }
 0x3f8   : > { %1317 = vmatprep.mubr.msk.f32.mxu1 %vm446_vm1, %v630_v44  ;;  %v804_v45 = vpop.permute.xlu1 %803 }
 0x3f9   : > { %1318 = vmatmul.mubr.msk.f32.vlgmr.msra.gmra.mxu1 %vm446_vm1, %v631_v43  ;;  %v973_v46 = vpop.permute.xlu0 %972  ;;  %1322 = vmatprep.subr.mxu0 %v804_v45 }
 0x3fa   : > { %1328 = vmatpush3.msra.mxu1 %v975_v19  ;;  %1323 = vmatpush3.msra.mxu0 %v804_v45 }
 0x3fb   : > { %1329 = vmatprep.subr.mxu1 %v973_v46 }
 0x3fc   : > { %v1387_v47 = vpop.eup %1386  ;;  %1330 = vmatpush3.msra.mxu1 %v973_v46 }
 0x3fd   : > { %v1389_v48 = vpop.eup %1388  ;;  %v802_v49 = vmul.f32 %v1387_v47, %v1371_v20 }
 0x3fe   : > { %v801_v50 = vmul.f32 %v1389_v48, %v1373_v21 }
 0x400   : > { %1324 = vmatprep.mubr.msk.f32.mxu0 %vm446_vm1, %v801_v50 }
 0x401   : > { %1325 = vmatmul.mubr.msk.f32.vlgmr.msra.gmra.mxu0 %vm446_vm1, %v802_v49 }
 0x402   : > { %v1391_v51 = vpop.eup %1390 }
 0x403   : > { %v1393_v52 = vpop.eup %1392  ;;  %v971_v53 = vmul.f32 %v1391_v51, %v1375_v24 }
 0x404   : > { %v970_v54 = vmul.f32 %v1393_v52, %v1377_v25 }
 0x406   : > { %1331 = vmatprep.mubr.msk.f32.mxu1 %vm446_vm1, %v970_v54 }
 0x407   : > { %1332 = vmatmul.mubr.msk.f32.vlgmr.msra.gmra.mxu1 %vm446_vm1, %v971_v53 }
 0x4b5   : > { %v1312_v56 = vpop.f32.mrf.mxu0 }
 0x4b7   : > { %v541_v58 = vpop.f32.mrf.mxu0 }
 0x4b9   : > { %v1319_v55 = vpop.f32.mrf.mxu1 }
 0x4ba   : > { %1063 = vrot.lane.b32.xlu0 %v1319_v55, %s1416_s27 }
 0x4bb   : > { %v712_v57 = vpop.f32.mrf.mxu1 }
 0x4bc   : > { %1061 = vrot.lane.b32.xlu1 %v712_v57, %s1416_s27 }
 0x4c1   : > { %v1326_v59 = vpop.f32.mrf.mxu0 }
 0x4c2   : > { %1071 = vrot.lane.b32.xlu0 %v1326_v59, %s1415_s26 }
 0x4c3   : > { %v881_v60 = vpop.f32.mrf.mxu0 }
 0x4c4   : > { %1069 = vrot.lane.b32.xlu1 %v881_v60, %s1415_s26 }
 0x4c7   : > { %v1333_v61 = vpop.f32.mrf.mxu1 }
 0x4c8   : > { %1079 = vrot.lane.b32.xlu0 %v1333_v61, %s1414_s24 }
 0x4c9   : > { %v1050_v62 = vpop.f32.mrf.mxu1 }
 0x4ca   : > { %1077 = vrot.lane.b32.xlu1 %v1050_v62, %s1414_s24 }
 0x52c   : > { %v1064_v63 = vpop.permute.xlu0 %1063 }
 0x52d   : > { %v1085_v2 = vsel %vm1083_vm9, %v1312_v56, %v1064_v63 }
 0x52e   : > { %v1062_v34 = vpop.permute.xlu1 %1061 }
 0x52f   : > { %v1084_v5 = vsel %vm1083_vm9, %v541_v58, %v1062_v34 }
 0x534   : > { %v1072_v0 = vpop.permute.xlu0 %1071 }
 0x535   : > { %v1088_v3 = vsel %vm1086_vm10, %v1085_v2, %v1072_v0 }
 0x536   : > { %v1070_v1 = vpop.permute.xlu1 %1069 }
 0x537   : > { %v1087_v7 = vsel %vm1086_vm10, %v1084_v5, %v1070_v1 }
 0x53a   : > { %v1080_v4 = vpop.permute.xlu0 %1079 }
 0x53b   : > { %v1091_v6 = vsel %vm1089_vm11, %v1088_v3, %v1080_v4 }
 0x53c   : > { %v1095_v8 = vmin.f32 %v1091_v6, 0.0  ;;  %v1078_v9 = vpop.permute.xlu1 %1077  ;;  %vm1093_vm12 = vcmp.gt.f32.partialorder %v1091_v6, 0.0 }
 0x53d   : > { %v1090_v10 = vsel %vm1089_vm11, %v1087_v7, %v1078_v9 }
 0x53e   : > { %v1098_v11 = vmul.f32 1.442695, %v1095_v8  ;;  %v1094_v12 = vmin.f32 %v1090_v10, 0.0  ;;  %vm1092_vm13 = vcmp.gt.f32.partialorder %v1090_v10, 0.0 }
 0x540   : > { %1394 = vpow2.f32 %v1098_v11  ;;  %v1096_v13 = vmul.f32 1.442695, %v1094_v12 }
 0x542   : > { %1396 = vpow2.f32 %v1096_v13 }
 0x54d   : > { %v1395_v14 = vpop.eup %1394 }
 0x54e   : > { %v1179_v15 = vadd.f32 -1.0, %v1395_v14 }
 0x54f   : > { %v1397_v16 = vpop.eup %1396 }
 0x550   : > { %v1103_v17 = vsel %vm1093_vm12, %v1091_v6, %v1179_v15  ;;  %v1178_v18 = vadd.f32 -1.0, %v1397_v16 }
 0x551   : > { %1105 = vst [vmem:[%s197_s5 + $0x8] sm:$0xff] %v1103_v17 }
 0x552   : > { %v1102_v19 = vsel %vm1092_vm13, %v1090_v10, %v1178_v18 }
 0x553   : > { %1104 = vst [vmem:[%s197_s5] sm:$0xff] %v1102_v19 }
 0x554 PF: > { %s14_s15 = sadd.s32 1, %s1404_s15  }
 0x555   : > { %p11_p4 = scmp.ge.s32.totalorder %s14_s15, 4  }
 0x557   :  { %13 = sbr.rel (!%p11_p4) target bundleno = 1 (0x1), region = 66 }

// kernel: model_forward.8
= control target key start
LH: loop header
LB: loop body
LE: loop exit
PB: predicated region body
PF: predicated region fallthrough
CT: control target
= control target key end

     0   :  { %s1887_s15 = smov 0   ;;  %s2340_s0 = inlined_call_operand.vmem [shape: f32[2,32,128], index: 0, kind: input, shape index: {}]   ;;  %s2341_s1 = inlined_call_operand.vmem [shape: f32[128,128], index: 1, kind: input, shape index: {}]   ;;  %s2342_s2 = inlined_call_operand.vmem [shape: f32[128,8], index: 2, kind: input, shape index: {}]   ;;  %s2343_s3 = inlined_call_operand.vmem [shape: f32[32,32], index: 3, kind: input, shape index: {}]   ;;  %s2344_s4 = inlined_call_operand.vmem [shape: f32[2,32,128], index: 4, kind: output, shape index: {}]  }
   0x1 LB: > { %s1498_s16 = sadd.s32 4294967295, %s1849_s15   ;;  %p1502_p0 = scmp.ge.s32.totalorder %s1849_s15, 1  ;;  %s1849_s15 = sphi %s1887_s15, %s14_s15  }
   0x2   : > { %p162_p1 = scmp.lt.s32.totalorder %s1849_s15, 3 }
   0x4   : > { %p163_p2 = pnand %p1502_p0, %p162_p1 }
   0x5   : > { %p188_p3 = scmp.lt.s32.totalorder (!%p163_p2), %s1498_s16, 1  ;;  %s1851_s17 = smov (!%p163_p2), 96  }
   0x6   : > { %166 = sbr.rel (%p163_p2) target bundleno = 1420 (0x58c), region = 36  ;;  %s1853_s18 = smov (!%p163_p2), 32  }
   0x7   : > { %s1856_s19 = smov (!%p163_p2), 124   ;;  %s1857_s20 = smov (!%p163_p2), 122  }
   0x8   : > { %s1858_s21 = smov (!%p163_p2), 123   ;;  %s1859_s22 = smov (!%p163_p2), 121  }
   0xb   : > { %v217_v0 = vld [vmem:[%s2341_s1 + $0x78] sm:$0xff]  ;;  %v216_v1 = vld [vmem:[%s2341_s1 + $0x70] sm:$0xff]  ;;  %v215_v2 = vld [vmem:[%s2341_s1 + $0x68] sm:$0xff]  ;;  %s2346_s16 = smov (!%p188_p3, %s1498_s16), 1  ;;  %v1854_v40 = vmov 1   ;;  %v1855_v41 = vmov 0  }
   0xc   : > { %1603 = vmatprep.subr.mxu0 %v217_v0  ;;  %v214_v3 = vld [vmem:[%s2341_s1 + $0x60] sm:$0xff]  ;;  %s1529_s25 = sshll.u32 %s2346_s16, 5  ;;  %v318_v4 = vld [vmem:[%s2342_s2 + $0x78] sm:$0xff]  ;;  %v317_v7 = vld [vmem:[%s2342_s2 + $0x70] sm:$0xff]  ;;  %1756 = vset.pattern.permute.xlu0 %v1854_v40  ;;  %v1860_v49 = vmov 3   ;;  %v1861_v51 = vmov 2  }
   0xd   : > { %1604 = vmatpush3.msra.mxu0 %v217_v0  ;;  %s1915_s28 = scalar_lea.vmem %s2340_s0, %s1529_s25  ;;  %v213_v5 = vld [vmem:[%s2341_s1 + $0x58] sm:$0xff]  ;;  %1641 = vmatprep.subr.mxu1 %v318_v4  ;;  %v212_v8 = vld [vmem:[%s2341_s1 + $0x50] sm:$0xff]  ;;  %v316_v9 = vld [vmem:[%s2342_s2 + $0x68] sm:$0xff]  ;;  %vm496_vm3 = vcmask 261120   ;;  %s197_s9 = scalar_lea.vmem %s2344_s4, %s1529_s25 }
   0xe   : > { %1605 = vmatprep.subr.mxu0 %v216_v1  ;;  %v198_v6 = vld [vmem:[%s1915_s28] sm:$0xff]  ;;  %1642 = vmatpush3.msra.mxu1 %v318_v4  ;;  %v211_v10 = vld [vmem:[%s2341_s1 + $0x48] sm:$0xff]  ;;  %v314_v13 = vld [vmem:[%s2342_s2 + $0x58] sm:$0xff] }
   0xf   : > { %1606 = vmatpush3.msra.mxu0 %v216_v1  ;;  %1635 = vmatprep.mubr.f32.mxu0 %v198_v6  ;;  %v315_v11 = vld [vmem:[%s2342_s2 + $0x60] sm:$0xff]  ;;  %v209_v14 = vld [vmem:[%s2341_s1 + $0x38] sm:$0xff]  ;;  %v313_v15 = vld [vmem:[%s2342_s2 + $0x50] sm:$0xff] }
  0x10   : > { %1607 = vmatprep.subr.mxu0 %v215_v2  ;;  %1643 = vmatprep.subr.mxu1 %v317_v7  ;;  %v210_v12 = vld [vmem:[%s2341_s1 + $0x40] sm:$0xff]  ;;  %v208_v16 = vld [vmem:[%s2341_s1 + $0x30] sm:$0xff]  ;;  %v312_v17 = vld [vmem:[%s2342_s2 + $0x48] sm:$0xff] }
  0x11   : > { %1608 = vmatpush3.msra.mxu0 %v215_v2  ;;  %1644 = vmatpush3.msra.mxu1 %v317_v7  ;;  %v207_v18 = vld [vmem:[%s2341_s1 + $0x28] sm:$0xff]  ;;  %v311_v19 = vld [vmem:[%s2342_s2 + $0x40] sm:$0xff]  ;;  %v310_v21 = vld [vmem:[%s2342_s2 + $0x38] sm:$0xff] }
  0x12   : > { %1609 = vmatprep.subr.mxu0 %v214_v3  ;;  %1645 = vmatprep.subr.mxu1 %v316_v9  ;;  %v206_v20 = vld [vmem:[%s2341_s1 + $0x20] sm:$0xff]  ;;  %v205_v22 = vld [vmem:[%s2341_s1 + $0x18] sm:$0xff]  ;;  %v309_v23 = vld [vmem:[%s2342_s2 + $0x30] sm:$0xff] }
  0x13   : > { %1610 = vmatpush3.msra.mxu0 %v214_v3  ;;  %1646 = vmatpush3.msra.mxu1 %v316_v9  ;;  %v204_v24 = vld [vmem:[%s2341_s1 + $0x10] sm:$0xff]  ;;  %v308_v25 = vld [vmem:[%s2342_s2 + $0x28] sm:$0xff]  ;;  %v307_v27 = vld [vmem:[%s2342_s2 + $0x20] sm:$0xff] }
  0x14   : > { %1611 = vmatprep.subr.mxu0 %v213_v5  ;;  %1647 = vmatprep.subr.mxu1 %v315_v11  ;;  %v203_v26 = vld [vmem:[%s2341_s1 + $0x8] sm:$0xff]  ;;  %v202_v28 = vld [vmem:[%s2341_s1] sm:$0xff]  ;;  %v306_v29 = vld [vmem:[%s2342_s2 + $0x18] sm:$0xff] }
  0x15   : > { %1612 = vmatpush3.msra.mxu0 %v213_v5  ;;  %1648 = vmatpush3.msra.mxu1 %v315_v11  ;;  %v199_v30 = vld [vmem:[%s1915_s28 + $0x8] sm:$0xff]  ;;  %v305_v31 = vld [vmem:[%s2342_s2 + $0x10] sm:$0xff]  ;;  %v201_v33 = vld [vmem:[%s1915_s28 + $0x18] sm:$0xff] }
  0x16   : > { %1613 = vmatprep.subr.mxu0 %v212_v8  ;;  %1649 = vmatprep.subr.mxu1 %v314_v13  ;;  %v200_v32 = vld [vmem:[%s1915_s28 + $0x10] sm:$0xff]  ;;  %v304_v34 = vld [vmem:[%s2342_s2 + $0x8] sm:$0xff]  ;;  %v303_v35 = vld [vmem:[%s2342_s2] sm:$0xff]  ;;  %s1852_s28 = smov 64  }
  0x17   : > { %1614 = vmatpush3.msra.mxu0 %v212_v8  ;;  %1650 = vmatpush3.msra.mxu1 %v314_v13 }
  0x18   : > { %1615 = vmatprep.subr.mxu0 %v211_v10  ;;  %1651 = vmatprep.subr.mxu1 %v313_v15 }
  0x19   : > { %1616 = vmatpush3.msra.mxu0 %v211_v10  ;;  %1652 = vmatpush3.msra.mxu1 %v313_v15 }
  0x1a   : > { %1617 = vmatprep.subr.mxu0 %v210_v12  ;;  %1653 = vmatprep.subr.mxu1 %v312_v17 }
  0x1b   : > { %1618 = vmatpush3.msra.mxu0 %v210_v12  ;;  %1654 = vmatpush3.msra.mxu1 %v312_v17 }
  0x1c   : > { %1619 = vmatprep.subr.mxu0 %v209_v14  ;;  %1655 = vmatprep.subr.mxu1 %v311_v19 }
  0x1d   : > { %1620 = vmatpush3.msra.mxu0 %v209_v14  ;;  %1656 = vmatpush3.msra.mxu1 %v311_v19 }
  0x1e   : > { %1621 = vmatprep.subr.mxu0 %v208_v16  ;;  %1657 = vmatprep.subr.mxu1 %v310_v21 }
  0x1f   : > { %1622 = vmatpush3.msra.mxu0 %v208_v16  ;;  %1658 = vmatpush3.msra.mxu1 %v310_v21 }
  0x20   : > { %1623 = vmatprep.subr.mxu0 %v207_v18  ;;  %1659 = vmatprep.subr.mxu1 %v309_v23 }
  0x21   : > { %1624 = vmatpush3.msra.mxu0 %v207_v18  ;;  %1660 = vmatpush3.msra.mxu1 %v309_v23 }
  0x22   : > { %1625 = vmatprep.subr.mxu0 %v206_v20  ;;  %1661 = vmatprep.subr.mxu1 %v308_v25 }
  0x23   : > { %1626 = vmatpush3.msra.mxu0 %v206_v20  ;;  %1662 = vmatpush3.msra.mxu1 %v308_v25  ;;  %v472_v20 = vlaneseq }
  0x24   : > { %1627 = vmatprep.subr.mxu0 %v205_v22  ;;  %1663 = vmatprep.subr.mxu1 %v307_v27 }
  0x25   : > { %1628 = vmatpush3.msra.mxu0 %v205_v22  ;;  %1664 = vmatpush3.msra.mxu1 %v307_v27  ;;  %v473_v22 = vshrl.u32 %v472_v20, 7 }
  0x26   : > { %1629 = vmatprep.subr.mxu0 %v204_v24  ;;  %1665 = vmatprep.subr.mxu1 %v306_v29 }
  0x27   : > { %1630 = vmatpush3.msra.mxu0 %v204_v24  ;;  %1666 = vmatpush3.msra.mxu1 %v306_v29  ;;  %v2073_v24 = vsub.s32 0, %v473_v22 }
  0x28   : > { %1631 = vmatprep.subr.mxu0 %v203_v26  ;;  %1667 = vmatprep.subr.mxu1 %v305_v31 }
  0x29   : > { %1632 = vmatpush3.msra.mxu0 %v203_v26  ;;  %1668 = vmatpush3.msra.mxu1 %v305_v31  ;;  %v2079_v31 = vld [vmem:[%s2343_s3 + $0x8] sm:$0xff] }
  0x2a   : > { %1633 = vmatprep.subr.mxu0 %v202_v28  ;;  %1669 = vmatprep.subr.mxu1 %v304_v34 }
  0x2b   : > { %1634 = vmatpush3.msra.mxu0 %v202_v28  ;;  %1670 = vmatpush3.msra.mxu1 %v304_v34 }
  0x2c   : > { %1636 = vmatmul.mubr.f32.vlgmr.msra.gmra.mxu0 %v199_v30  ;;  %1671 = vmatprep.subr.mxu1 %v303_v35 }
  0x2d   : > { %1638 = vmatprep.mubr.f32.mxu0 %v200_v32  ;;  %1672 = vmatpush3.msra.mxu1 %v303_v35  ;;  %v2084_v32 = vld [vmem:[%s2343_s3] sm:$0xff] }
  0x2e   : > { %1755 = vset.pattern.permute.xlu1 %v1855_v41 }
  0x30   : > { %1639 = vmatmul.mubr.f32.gmra.mxu0 %v201_v33 }
  0xec   : > { %v2005_v36 = vpop.f32.mrf.mxu0 }
  0xed   : > { %772 = vrot.lane.b32.xlu1 %v2005_v36, %s1851_s17 }
  0xee   : > { %v2009_v37 = vpop.f32.mrf.mxu0 }
  0xef   : > { %1673 = vmatprep.mubr.f32.mxu1 %v2009_v37 }
  0xf0   : > { %v1640_v38 = vpop.f32.mrf.mxu0  ;;  %1674 = vmatmul.mubr.f32.vlgmr.msra.gmra.mxu1 %v2005_v36 }
  0xf1   : > { %770 = vrot.lane.b32.xlu1 %v2009_v37, %s1851_s17  ;;  %1679 = vmatprep.subr.mxu0 %v1640_v38 }
  0xf2   : > { %v294_v39 = vpop.f32.mrf.mxu0  ;;  %1680 = vmatpush3.msra.mxu0 %v1640_v38  ;;  %1013 = vrot.lane.b32.xlu0 %v1640_v38, %s1852_s28 }
  0xf3   : > { %1681 = vmatprep.subr.mxu0 %v294_v39  ;;  %1676 = vmatprep.mubr.f32.mxu1 %v294_v39 }
  0xf4   : > { %1682 = vmatpush3.msra.mxu0 %v294_v39  ;;  %1677 = vmatmul.mubr.f32.gmra.mxu1 %v1640_v38 }
  0xf5   : > { %776 = vrot.lane.b32.xlu1 %v1640_v38, %s1851_s17  ;;  %1683 = vmatprep.subr.mxu0 %v2005_v36 }
  0xf6   : > { %1684 = vmatpush3.msra.mxu0 %v2005_v36  ;;  %774 = vrot.lane.b32.xlu0 %v294_v39, %s1851_s17 }
  0xf7   : > { %1685 = vmatprep.subr.mxu0 %v2009_v37 }
  0xf8   : > { %1686 = vmatpush3.msra.mxu0 %v2009_v37 }
  0xf9   : > { %1250 = vrot.lane.b32.xlu1 %v1640_v38, %s1853_s18 }
  0xfa   : > { %1011 = vrot.lane.b32.xlu0 %v294_v39, %s1852_s28 }
  0xfd   : > { %1248 = vrot.lane.b32.xlu1 %v294_v39, %s1853_s18 }
 0x15f   : > { %v773_v42 = vpop.permute.xlu1 %772 }
 0x163   : > { %v771_v43 = vpop.permute.xlu1 %770 }
 0x164   : > { %v2026_v44 = vpop.permute.xlu0 %1013 }
 0x165   : > { %1707 = vmatprep.subr.mxu0 %v2026_v44 }
 0x167   : > { %v777_v45 = vpop.permute.xlu1 %776 }
 0x168   : > { %1693 = vmatprep.subr.mxu1 %v777_v45  ;;  %v775_v46 = vpop.permute.xlu0 %774 }
 0x169   : > { %1694 = vmatpush3.msra.mxu1 %v777_v45 }
 0x16a   : > { %1695 = vmatprep.subr.mxu1 %v775_v46 }
 0x16b   : > { %1696 = vmatpush3.msra.mxu1 %v775_v46  ;;  %v2029_v47 = vpop.permute.xlu1 %1250 }
 0x16c   : > { %1697 = vmatprep.subr.mxu1 %v773_v42  ;;  %v2053_v55 = vpop.permute.xlu0 %1011 }
 0x16d   : > { %1698 = vmatpush3.msra.mxu1 %v773_v42 }
 0x16e   : > { %1699 = vmatprep.subr.mxu1 %v771_v43 }
 0x16f   : > { %1700 = vmatpush3.msra.mxu1 %v771_v43  ;;  %v2051_v54 = vpop.permute.xlu1 %1248 }
 0x170   : > { %1721 = vmatprep.subr.mxu1 %v2029_v47 }
 0x1b0   : > { %v1675_v48 = vpop.f32.mrf.mxu1 }
 0x1b1   : > { %414 = vrot.lane.b32.xlu1 %v1675_v48, %s1856_s19  ;;  %881 = vrot.lane.b32.xlu0 %v1675_v48, %s1857_s20 }
 0x1b2   : > { %v385_v50 = vpop.f32.mrf.mxu1 }
 0x1b4   : > { %v1678_v52 = vpop.f32.mrf.mxu1 }
 0x1b5   : > { %640 = vrot.lane.b32.xlu1 %v1675_v48, %s1858_s21  ;;  %687 = vperm.xlu0 %1756, %v1675_v48  }
 0x1b6   : > { %v395_v53 = vpop.f32.mrf.mxu1 }
 0x1b9   : > { %1118 = vrot.lane.b32.xlu1 %v1675_v48, %s1859_s22  ;;  %1758 = vset.pattern.permute.xlu0 %v1860_v49 }
 0x1ba   : > { %1165 = vperm.xlu0 %1758, %v1675_v48  }
 0x1bd   : > { %461 = vperm.xlu1 %1755, %v1675_v48  }
 0x1be   : > { %412 = vrot.lane.b32.xlu0 %v385_v50, %s1856_s19 }
 0x1bf   : > { %1759 = vset.pattern.permute.xlu0 %v1855_v41 }
 0x1c1   : > { %1757 = vset.pattern.permute.xlu1 %v1861_v51 }
 0x1c2   : > { %928 = vperm.xlu1 %1757, %v1675_v48   ;;  %638 = vrot.lane.b32.xlu0 %v385_v50, %s1858_s21 }
 0x1c6   : > { %1116 = vrot.lane.b32.xlu1 %v385_v50, %s1859_s22  ;;  %879 = vrot.lane.b32.xlu0 %v385_v50, %s1857_s20 }
 0x1c7   : > { %1760 = vset.pattern.permute.xlu1 %v1854_v40 }
 0x1ca   : > { %683 = vperm.xlu1 %1760, %v385_v50   ;;  %457 = vperm.xlu0 %1759, %v385_v50  }
 0x1ce   : > { %1762 = vset.pattern.permute.xlu1 %v1860_v49  ;;  %1761 = vset.pattern.permute.xlu0 %v1861_v51 }
 0x1cf   : > { %1161 = vperm.xlu1 %1762, %v385_v50   ;;  %924 = vperm.xlu0 %1761, %v385_v50  }
 0x1d3   : > { %644 = vrot.lane.b32.xlu1 %v1678_v52, %s1858_s21  ;;  %418 = vrot.lane.b32.xlu0 %v1678_v52, %s1856_s19 }
 0x1d4   : > { %1763 = vset.pattern.permute.xlu1 %v1855_v41  ;;  %1768 = vset.pattern.permute.xlu0 %v1854_v40 }
 0x1d7   : > { %1122 = vrot.lane.b32.xlu1 %v1678_v52, %s1859_s22  ;;  %885 = vrot.lane.b32.xlu0 %v1678_v52, %s1857_s20 }
 0x1db   : > { %469 = vperm.xlu1 %1763, %v1678_v52   ;;  %416 = vrot.lane.b32.xlu0 %v395_v53, %s1856_s19 }
 0x1df   : > { %1764 = vset.pattern.permute.xlu1 %v1854_v40  ;;  %883 = vrot.lane.b32.xlu0 %v395_v53, %s1857_s20  ;;  %v2089_v40 = vld [vmem:[%s2343_s3 + $0x10] sm:$0xff] }
 0x1e0   : > { %695 = vperm.xlu1 %1764, %v1678_v52  }
 0x1e3   : > { %691 = vperm.xlu0 %1768, %v395_v53  }
 0x1e4   : > { %1765 = vset.pattern.permute.xlu1 %v1861_v51 }
 0x1e5   : > { %936 = vperm.xlu1 %1765, %v1678_v52  }
 0x1e7   : > { %1770 = vset.pattern.permute.xlu0 %v1860_v49 }
 0x1e8   : > { %1169 = vperm.xlu0 %1770, %v395_v53  }
 0x1e9   : > { %1766 = vset.pattern.permute.xlu1 %v1860_v49 }
 0x1ea   : > { %1173 = vperm.xlu1 %1766, %v1678_v52  }
 0x1ee   : > { %642 = vrot.lane.b32.xlu1 %v395_v53, %s1858_s21 }
 0x1ef   : > { %1767 = vset.pattern.permute.xlu1 %v1855_v41 }
 0x1f2   : > { %1120 = vrot.lane.b32.xlu1 %v395_v53, %s1859_s22 }
 0x1f6   : > { %465 = vperm.xlu1 %1767, %v395_v53  }
 0x1fa   : > { %1769 = vset.pattern.permute.xlu1 %v1861_v51 }
 0x1fb   : > { %932 = vperm.xlu1 %1769, %v395_v53  }
 0x223   : > { %v415_v56 = vpop.permute.xlu1 %414  ;;  %v882_v57 = vpop.permute.xlu0 %881 }
 0x227   : > { %v641_v58 = vpop.permute.xlu1 %640 }
 0x22b   : > { %v1119_v60 = vpop.permute.xlu1 %1118 }
 0x230   : > { %v2055_v59 = vpop.permute.xlu0 %687 }
 0x235   : > { %v2057_v61 = vpop.permute.xlu0 %1165 }
 0x238   : > { %v462_v62 = vpop.permute.xlu1 %461 }
 0x239   : > { %v413_v63 = vpop.permute.xlu0 %412 }
 0x23a   : > { %424 = vxpose.xlu0.b32.start [1/4] (short) (narrow) %v413_v63, 8 }
 0x23d   : > { %v2059_v0 = vpop.permute.xlu1 %928  ;;  %v639_v1 = vpop.permute.xlu0 %638 }
 0x23e   : > { %650 = vxpose.xlu1.b32.start [1/4] (short) (narrow) %v639_v1, 8  ;;  %425 = vxpose.xlu0.b32.cont [2/4] (short) (narrow) %v415_v56, 8 }
 0x241   : > { %v1117_v2 = vpop.permute.xlu1 %1116  ;;  %v880_v3 = vpop.permute.xlu0 %879 }
 0x242   : > { %651 = vxpose.xlu1.b32.cont [2/4] (short) (narrow) %v641_v58, 8 }
 0x245   : > { %v2061_v4 = vpop.permute.xlu1 %683  ;;  %v458_v5 = vpop.permute.xlu0 %457 }
 0x24a   : > { %v2063_v6 = vpop.permute.xlu1 %1161  ;;  %v925_v7 = vpop.permute.xlu0 %924 }
 0x24e   : > { %v645_v8 = vpop.permute.xlu1 %644  ;;  %v419_v9 = vpop.permute.xlu0 %418 }
 0x252   : > { %v1123_v10 = vpop.permute.xlu1 %1122  ;;  %v886_v11 = vpop.permute.xlu0 %885 }
 0x256   : > { %v470_v12 = vpop.permute.xlu1 %469  ;;  %v417_v13 = vpop.permute.xlu0 %416 }
 0x257   : > { %426 = vxpose.xlu0.b32.cont [3/4] (short) (narrow) %v417_v13, 8 }
 0x25a   : > { %v884_v17 = vpop.permute.xlu0 %883 }
 0x25b   : > { %v2065_v14 = vpop.permute.xlu1 %695  ;;  %427 = vxpose.xlu0.b32.end [4/4] (short) (narrow) %v419_v9, 8 }
 0x25e   : > { %v692_v21 = vpop.permute.xlu0 %691 }
 0x25f   : > { %891 = vxpose.xlu0.b32.start [1/4] (short) (narrow) %v880_v3, 8 }
 0x260   : > { %v2067_v15 = vpop.permute.xlu1 %936 }
 0x263   : > { %892 = vxpose.xlu0.b32.cont [2/4] (short) (narrow) %v882_v57, 8  ;;  %v2071_v23 = vpop.permute.xlu0 %1169 }
 0x265   : > { %v2069_v16 = vpop.permute.xlu1 %1173 }
 0x267   : > { %893 = vxpose.xlu0.b32.cont [3/4] (short) (narrow) %v884_v17, 8 }
 0x269   : > { %v643_v18 = vpop.permute.xlu1 %642 }
 0x26a   : > { %652 = vxpose.xlu1.b32.cont [3/4] (short) (narrow) %v643_v18, 8 }
 0x26b   : > { %894 = vxpose.xlu0.b32.end [4/4] (short) (narrow) %v886_v11, 8 }
 0x26d   : > { %v1121_v19 = vpop.permute.xlu1 %1120 }
 0x26e   : > { %653 = vxpose.xlu1.b32.end [4/4] (short) (narrow) %v645_v8, 8 }
 0x271   : > { %v466_v27 = vpop.permute.xlu1 %465 }
 0x272   : > { %1128 = vxpose.xlu1.b32.start [1/4] (short) (narrow) %v1117_v2, 8 }
 0x276   : > { %1129 = vxpose.xlu1.b32.cont [2/4] (short) (narrow) %v1119_v60, 8  ;;  %v933_v50 = vpop.permute.xlu1 %932 }
 0x27a   : > { %1130 = vxpose.xlu1.b32.cont [3/4] (short) (narrow) %v1121_v19, 8 }
 0x27e   : > { %1131 = vxpose.xlu1.b32.end [4/4] (short) (narrow) %v1123_v10, 8 }
 0x2cb   : > { %v440_v25 = vpop.trf.xlu0 }
 0x2cc   : > { %v475_v26 = vrot.slane %v440_v25, %v2073_v24 }
 0x2ce   : > { %v477_v28 = vadd.f32 %v475_v26, %v462_v62  ;;  %v476_v29 = vadd.f32 %v475_v26, %v458_v5  ;;  %v478_v30 = vadd.f32 %v475_v26, %v466_v27  ;;  %v479_v57 = vadd.f32 %v475_v26, %v470_v12 }
 0x2d0   : > { %vm481_vm0 = vcmp.gt.f32.partialorder %v477_v28, 0.0  ;;  %v485_v33 = vmul.f32 0.2, %v477_v28  ;;  %vm480_vm1 = vcmp.gt.f32.partialorder %v476_v29, 0.0  ;;  %v484_v34 = vmul.f32 0.2, %v476_v29 }
 0x2d1   : > { %vm482_vm2 = vcmp.gt.f32.partialorder %v478_v30, 0.0  ;;  %v486_v35 = vmul.f32 0.2, %v478_v30  ;;  %v487_v2 = vmul.f32 0.2, %v479_v57  ;;  %vm483_vm8 = vcmp.gt.f32.partialorder %v479_v57, 0.0 }
 0x2d2   : > { %v489_v38 = vsel %vm481_vm0, %v477_v28, %v485_v33  ;;  %v488_v39 = vsel %vm480_vm1, %v476_v29, %v484_v34  ;;  %vm1405_vm1 = vcmask 523264  }
 0x2d3   : > { %v2092_v41 = vadd.f32 %v489_v38, %v2079_v31  ;;  %v2095_v42 = vadd.f32 %v488_v39, %v2084_v32  ;;  %v490_v43 = vsel %vm482_vm2, %v478_v30, %v486_v35  ;;  %v491_v13 = vsel %vm483_vm8, %v479_v57, %v487_v2 }
 0x2d4   : > { %v2102_v48 = vadd.f32 %v490_v43, %v2089_v40  ;;  %vm1410_vm2 = vcmask 785408  }
 0x2d5   : > { %v500_v45 = vsel %vm496_vm3, %v2092_v41, -inf  ;;  %v497_v46 = vsel %vm496_vm3, %v2095_v42, -inf }
 0x2d6   : > { %501 = vmax.xlane.f32.xlu1 %v500_v45  ;;  %498 = vmax.xlane.f32.xlu0 %v497_v46  ;;  %v503_v49 = vsel %vm496_vm3, %v2102_v48, -inf }
 0x2da   : > { %504 = vmax.xlane.f32.xlu1 %v503_v49 }
 0x2db   : > { %v907_v51 = vpop.trf.xlu0 }
 0x2dc   : > { %v942_v52 = vrot.slane %v907_v51, %v2073_v24 }
 0x2de   : > { %v666_v53 = vpop.trf.xlu1  ;;  %v943_v56 = vadd.f32 %v942_v52, %v925_v7  ;;  %v944_v17 = vadd.f32 %v942_v52, %v2059_v0  ;;  %v945_v28 = vadd.f32 %v942_v52, %v933_v50  ;;  %v946_v43 = vadd.f32 %v942_v52, %v2067_v15 }
 0x2df   : > { %v701_v58 = vrot.slane %v666_v53, %v2073_v24 }
 0x2e0   : > { %v951_v1 = vmul.f32 0.2, %v943_v56  ;;  %vm947_vm4 = vcmp.gt.f32.partialorder %v943_v56, 0.0  ;;  %v952_v27 = vmul.f32 0.2, %v944_v17  ;;  %vm948_vm10 = vcmp.gt.f32.partialorder %v944_v17, 0.0 }
 0x2e1   : > { %v704_v60 = vadd.f32 %v701_v58, %v692_v21  ;;  %v702_v62 = vadd.f32 %v701_v58, %v2061_v4  ;;  %v703_v63 = vadd.f32 %v701_v58, %v2055_v59  ;;  %v705_v11 = vadd.f32 %v701_v58, %v2065_v14  ;;  %v407_v21 = vld [vmem:[%s2343_s3 + $0x18] sm:$0xff] }
 0x2e2   : > { %v955_v10 = vsel %vm947_vm4, %v943_v56, %v951_v1  ;;  %v2131_v0 = vadd.f32 %v491_v13, %v407_v21  ;;  %v956_v38 = vsel %vm948_vm10, %v944_v17, %v952_v27  ;;  %v953_v39 = vmul.f32 0.2, %v945_v28 }
 0x2e3   : > { %vm708_vm5 = vcmp.gt.f32.partialorder %v704_v60, 0.0  ;;  %v712_v3 = vmul.f32 0.2, %v704_v60  ;;  %vm706_vm6 = vcmp.gt.f32.partialorder %v702_v62, 0.0  ;;  %v710_v5 = vmul.f32 0.2, %v702_v62 }
 0x2e4   : > { %vm707_vm7 = vcmp.gt.f32.partialorder %v703_v63, 0.0  ;;  %v711_v8 = vmul.f32 0.2, %v703_v63  ;;  %v2126_v14 = vadd.f32 %v955_v10, %v2084_v32  ;;  %v713_v22 = vmul.f32 0.2, %v705_v11 }
 0x2e5   : > { %v716_v9 = vsel %vm708_vm5, %v704_v60, %v712_v3  ;;  %v714_v7 = vsel %vm706_vm6, %v702_v62, %v710_v5  ;;  %vm709_vm9 = vcmp.gt.f32.partialorder %v705_v11, 0.0  ;;  %v506_v34 = vsel %vm496_vm3, %v2131_v0, -inf }
 0x2e6   : > { %v2112_v12 = vadd.f32 %v716_v9, %v2089_v40  ;;  %v2115_v59 = vadd.f32 %v714_v7, %v2084_v32  ;;  %v715_v4 = vsel %vm707_vm7, %v703_v63, %v711_v8  ;;  %v963_v26 = vsel %vm496_vm3, %v2126_v14, -inf }
 0x2e7   : > { %v2123_v20 = vadd.f32 %v715_v4, %v2079_v31  ;;  %v717_v29 = vsel %vm709_vm9, %v705_v11, %v713_v22  ;;  %vm949_vm11 = vcmp.gt.f32.partialorder %v945_v28, 0.0  ;;  %v2149_v53 = vadd.f32 %v956_v38, %v2079_v31 }
 0x2e8   : > { %v728_v18 = vsel %vm496_vm3, %v2112_v12, -inf  ;;  %v722_v19 = vsel %vm496_vm3, %v2115_v59, -inf  ;;  %v2140_v35 = vadd.f32 %v717_v29, %v407_v21  ;;  %v957_v56 = vsel %vm949_vm11, %v945_v28, %v953_v39 }
 0x2e9   : > { %729 = vmax.xlane.f32.xlu1 %v728_v18  ;;  %723 = vmax.xlane.f32.xlu0 %v722_v19  ;;  %v725_v25 = vsel %vm496_vm3, %v2123_v20, -inf  ;;  %v954_v15 = vmul.f32 0.2, %v946_v43  ;;  %vm950_vm14 = vcmp.gt.f32.partialorder %v946_v43, 0.0  ;;  %v966_v58 = vsel %vm496_vm3, %v2149_v53, -inf }
 0x2ea   : > { %v731_v51 = vsel %vm496_vm3, %v2140_v35, -inf  ;;  %v2163_v63 = vadd.f32 %v957_v56, %v2089_v40 }
 0x2ec   : > { %v969_v3 = vsel %vm496_vm3, %v2163_v63, -inf }
 0x2ed   : > { %726 = vmax.xlane.f32.xlu0 %v725_v25  ;;  %964 = vmax.xlane.f32.xlu1 %v963_v26 }
 0x2ee   : > { %v1144_v30 = vpop.trf.xlu1 }
 0x2ef   : > { %v1179_v33 = vrot.slane %v1144_v30, %v2073_v24 }
 0x2f1   : > { %507 = vmax.xlane.f32.xlu0 %v506_v34  ;;  %v1180_v45 = vadd.f32 %v1179_v33, %v2063_v6  ;;  %v1181_v46 = vadd.f32 %v1179_v33, %v2057_v61  ;;  %v1182_v49 = vadd.f32 %v1179_v33, %v2071_v23  ;;  %v1183_v61 = vadd.f32 %v1179_v33, %v2069_v16 }
 0x2f2   : > { %v958_v16 = vsel %vm950_vm14, %v946_v43, %v954_v15 }
 0x2f3   : > { %vm1184_vm12 = vcmp.gt.f32.partialorder %v1180_v45, 0.0  ;;  %v1188_v50 = vmul.f32 0.2, %v1180_v45  ;;  %vm1185_vm13 = vcmp.gt.f32.partialorder %v1181_v46, 0.0  ;;  %v1189_v24 = vmul.f32 0.2, %v1181_v46 }
 0x2f4   : > { %v1190_v57 = vmul.f32 0.2, %v1182_v49  ;;  %vm1186_vm15 = vcmp.gt.f32.partialorder %v1182_v49, 0.0  ;;  %vm1187_vm0 = vcmp.gt.f32.partialorder %v1183_v61, 0.0  ;;  %v2169_v5 = vadd.f32 %v958_v16, %v407_v21 }
 0x2f5   : > { %732 = vmax.xlane.f32.xlu0 %v731_v51  ;;  %v1192_v52 = vsel %vm1184_vm12, %v1180_v45, %v1188_v50  ;;  %v1193_v6 = vsel %vm1185_vm13, %v1181_v46, %v1189_v24 }
 0x2f6   : > { %v2153_v23 = vadd.f32 %v1192_v52, %v2084_v32  ;;  %v2160_v62 = vadd.f32 %v1193_v6, %v2079_v31  ;;  %v1194_v1 = vsel %vm1186_vm15, %v1182_v49, %v1190_v57  ;;  %v1191_v32 = vmul.f32 0.2, %v1183_v61 }
 0x2f7   : > { %v2172_v31 = vadd.f32 %v1194_v1, %v2089_v40  ;;  %v972_v9 = vsel %vm496_vm3, %v2169_v5, -inf }
 0x2f8   : > { %v1200_v60 = vsel %vm496_vm3, %v2153_v23, -inf  ;;  %v1203_v2 = vsel %vm496_vm3, %v2160_v62, -inf  ;;  %v1195_v8 = vsel %vm1187_vm0, %v1183_v61, %v1191_v32 }
 0x2f9   : > { %967 = vmax.xlane.f32.xlu0 %v966_v58  ;;  %1201 = vmax.xlane.f32.xlu1 %v1200_v60  ;;  %v1206_v7 = vsel %vm496_vm3, %v2172_v31, -inf  ;;  %v2178_v10 = vadd.f32 %v1195_v8, %v407_v21 }
 0x2fb   : > { %v1209_v11 = vsel %vm496_vm3, %v2178_v10, -inf }
 0x2fd   : > { %1204 = vmax.xlane.f32.xlu0 %v1203_v2  ;;  %970 = vmax.xlane.f32.xlu1 %v969_v3 }
 0x301   : > { %973 = vmax.xlane.f32.xlu0 %v972_v9  ;;  %1207 = vmax.xlane.f32.xlu1 %v1206_v7 }
 0x305   : > { %1210 = vmax.xlane.f32.xlu0 %v1209_v11 }
 0x312   : > { %1246 = vrot.lane.b32.xlu1 %v2005_v36, %s1853_s18 }
 0x31b   : > { %1009 = vrot.lane.b32.xlu0 %v2005_v36, %s1852_s28 }
 0x35f   : > { %v502_v40 = vpop.xlane.xlu1 %501  ;;  %v499_v4 = vpop.xlane.xlu0 %498 }
 0x360   : > { %v510_v13 = vsub.f32 %v2092_v41, %v502_v40  ;;  %v509_v17 = vsub.f32 %v2095_v42, %v499_v4 }
 0x362   : > { %v515_v18 = vmul.f32 1.442695, %v510_v13  ;;  %v513_v19 = vmul.f32 1.442695, %v509_v17 }
 0x363   : > { %v505_v21 = vpop.xlane.xlu1 %504 }
 0x364   : > { %1771 = vpow2.f32 %v515_v18  ;;  %v511_v26 = vsub.f32 %v2102_v48, %v505_v21 }
 0x365   : > { %1773 = vpow2.f32 %v513_v19 }
 0x366   : > { %v517_v30 = vmul.f32 1.442695, %v511_v26 }
 0x371   : > { %v2188_v22 = vpop.eup %1771 }
 0x372   : > { %v2190_v25 = vpop.eup %1773  ;;  %v730_v27 = vpop.xlane.xlu1 %729  ;;  %v524_v36 = vsel %vm496_vm3, %v2188_v22, 0.0 }
 0x373   : > { %v724_v28 = vpop.xlane.xlu0 %723  ;;  %525 = vadd.xlane.f32.xlu0 %v524_v36  ;;  %v521_v42 = vsel %vm496_vm3, %v2190_v25, 0.0  ;;  %v736_v33 = vsub.f32 %v2112_v12, %v730_v27 }
 0x374   : > { %v734_v41 = vsub.f32 %v2115_v59, %v724_v28  ;;  %522 = vadd.xlane.f32.xlu1 %v521_v42 }
 0x375   : > { %v742_v43 = vmul.f32 1.442695, %v736_v33 }
 0x376   : > { %v738_v29 = vmul.f32 1.442695, %v734_v41  ;;  %v965_v38 = vpop.xlane.xlu1 %964 }
 0x377   : > { %v727_v34 = vpop.xlane.xlu0 %726  ;;  %v975_v45 = vsub.f32 %v2126_v14, %v965_v38 }
 0x378   : > { %v735_v48 = vsub.f32 %v2123_v20, %v727_v34  ;;  %1775 = vpow2.f32 %v738_v29 }
 0x379   : > { %1777 = vpow2.f32 %v517_v30  ;;  %v979_v50 = vmul.f32 1.442695, %v975_v45 }
 0x37a   : > { %v740_v39 = vmul.f32 1.442695, %v735_v48 }
 0x37b   : > { %v508_v59 = vpop.xlane.xlu0 %507 }
 0x37c   : > { %v512_v46 = vsub.f32 %v2131_v0, %v508_v59  ;;  %1779 = vpow2.f32 %v740_v39 }
 0x37d   : > { %1781 = vpow2.f32 %v742_v43 }
 0x37e   : > { %v519_v49 = vmul.f32 1.442695, %v512_v46 }
 0x37f   : > { %v733_v24 = vpop.xlane.xlu0 %732 }
 0x380   : > { %1783 = vpow2.f32 %v519_v49  ;;  %v737_v12 = vsub.f32 %v2140_v35, %v733_v24 }
 0x381   : > { %1785 = vpow2.f32 %v979_v50 }
 0x382   : > { %v744_v51 = vmul.f32 1.442695, %v737_v12  ;;  %v1202_v20 = vpop.xlane.xlu1 %1201 }
 0x383   : > { %v968_v56 = vpop.xlane.xlu0 %967  ;;  %v1212_v15 = vsub.f32 %v2153_v23, %v1202_v20 }
 0x384   : > { %1787 = vpow2.f32 %v744_v51  ;;  %v976_v14 = vsub.f32 %v2149_v53, %v968_v56 }
 0x385   : > { %v2205_v52 = vpop.eup %1775  ;;  %v1216_v0 = vmul.f32 1.442695, %v1212_v15 }
 0x386   : > { %v981_v6 = vmul.f32 1.442695, %v976_v14  ;;  %v971_v57 = vpop.xlane.xlu1 %970  ;;  %v746_v61 = vsel %vm496_vm3, %v2205_v52, 0.0  ;;  %v2209_v60 = vpop.eup %1777 }
 0x387   : > { %v1205_v58 = vpop.xlane.xlu0 %1204  ;;  %1789 = vpow2.f32 %v1216_v0  ;;  %v977_v35 = vsub.f32 %v2163_v63, %v971_v57  ;;  %747 = vadd.xlane.f32.xlu1 %v746_v61  ;;  %v527_v2 = vsel %vm496_vm3, %v2209_v60, 0.0 }
 0x388   : > { %v1213_v16 = vsub.f32 %v2160_v62, %v1205_v58  ;;  %1791 = vpow2.f32 %v981_v6 }
 0x389   : > { %v2213_v23 = vpop.eup %1779  ;;  %v983_v53 = vmul.f32 1.442695, %v977_v35 }
 0x38a   : > { %v1218_v1 = vmul.f32 1.442695, %v1213_v16  ;;  %v1208_v32 = vpop.xlane.xlu1 %1207  ;;  %v749_v3 = vsel %vm496_vm3, %v2213_v23, 0.0  ;;  %v2219_v9 = vpop.eup %1781 }
 0x38b   : > { %v974_v8 = vpop.xlane.xlu0 %973  ;;  %1793 = vpow2.f32 %v983_v53  ;;  %v1214_v63 = vsub.f32 %v2172_v31, %v1208_v32  ;;  %528 = vadd.xlane.f32.xlu1 %v527_v2  ;;  %750 = vadd.xlane.f32.xlu0 %v749_v3  ;;  %v752_v13 = vsel %vm496_vm3, %v2219_v9, 0.0 }
 0x38c   : > { %v978_v62 = vsub.f32 %v2169_v5, %v974_v8  ;;  %1795 = vpow2.f32 %v1218_v1 }
 0x38d   : > { %v2223_v7 = vpop.eup %1783  ;;  %v1220_v11 = vmul.f32 1.442695, %v1214_v63 }
 0x38e   : > { %v985_v40 = vmul.f32 1.442695, %v978_v62  ;;  %v530_v4 = vsel %vm496_vm3, %v2223_v7, 0.0  ;;  %v2229_v18 = vpop.eup %1785  ;;  %v1247_v59 = vpop.permute.xlu1 %1246 }
 0x38f   : > { %v1211_v17 = vpop.xlane.xlu0 %1210  ;;  %1797 = vpow2.f32 %v1220_v11  ;;  %753 = vadd.xlane.f32.xlu1 %v752_v13  ;;  %531 = vadd.xlane.f32.xlu0 %v530_v4  ;;  %v987_v26 = vsel %vm496_vm3, %v2229_v18, 0.0 }
 0x390   : > { %v1215_v31 = vsub.f32 %v2178_v10, %v1211_v17  ;;  %1799 = vpow2.f32 %v985_v40 }
 0x391   : > { %v2232_v5 = vpop.eup %1787 }
 0x392   : > { %v1222_v19 = vmul.f32 1.442695, %v1215_v31  ;;  %v755_v21 = vsel %vm496_vm3, %v2232_v5, 0.0 }
 0x393   : > { %988 = vadd.xlane.f32.xlu1 %v987_v26  ;;  %756 = vadd.xlane.f32.xlu0 %v755_v21  ;;  %v1010_v45 = vpop.permute.xlu0 %1009 }
 0x394   : > { %1801 = vpow2.f32 %v1222_v19  ;;  %v2238_v27 = vpop.eup %1789 }
 0x395   : > { %v2240_v28 = vpop.eup %1791  ;;  %v1224_v10 = vsel %vm496_vm3, %v2238_v27, 0.0 }
 0x396   : > { %v990_v36 = vsel %vm496_vm3, %v2240_v28, 0.0 }
 0x397   : > { %1225 = vadd.xlane.f32.xlu1 %v1224_v10  ;;  %991 = vadd.xlane.f32.xlu0 %v990_v36 }
 0x398   : > { %v2246_v41 = vpop.eup %1793 }
 0x399   : > { %v2248_v42 = vpop.eup %1795  ;;  %v993_v29 = vsel %vm496_vm3, %v2246_v41, 0.0 }
 0x39a   : > { %v1227_v30 = vsel %vm496_vm3, %v2248_v42, 0.0 }
 0x39b   : > { %994 = vadd.xlane.f32.xlu1 %v993_v29  ;;  %1228 = vadd.xlane.f32.xlu0 %v1227_v30 }
 0x39c   : > { %v2254_v33 = vpop.eup %1797 }
 0x39d   : > { %v2256_v34 = vpop.eup %1799  ;;  %v1230_v38 = vsel %vm496_vm3, %v2254_v33, 0.0 }
 0x39e   : > { %v996_v48 = vsel %vm496_vm3, %v2256_v34, 0.0 }
 0x39f   : > { %1231 = vadd.xlane.f32.xlu1 %v1230_v38  ;;  %997 = vadd.xlane.f32.xlu0 %v996_v48 }
 0x3a1   : > { %v2262_v39 = vpop.eup %1801 }
 0x3a2   : > { %v1233_v43 = vsel %vm496_vm3, %v2262_v39, 0.0 }
 0x3a3   : > { %1234 = vadd.xlane.f32.xlu0 %v1233_v43 }
 0x3b0   : > { %1244 = vrot.lane.b32.xlu1 %v2009_v37, %s1853_s18 }
 0x3b9   : > { %1007 = vrot.lane.b32.xlu0 %v2009_v37, %s1852_s28 }
 0x3fc   : > { %v526_v46 = vpop.xlane.xlu0 %525 }
 0x3fd   : > { %v523_v49 = vpop.xlane.xlu1 %522  ;;  %1803 = vrcp.f32 %v526_v46 }
 0x3fe   : > { %1805 = vrcp.f32 %v523_v49 }
 0x40a   : > { %v1804_v50 = vpop.eup %1803 }
 0x40b   : > { %v1806_v24 = vpop.eup %1805  ;;  %v538_v12 = vmul.f32 %v1804_v50, %v2188_v22 }
 0x40c   : > { %v537_v51 = vmul.f32 %v1806_v24, %v2190_v25 }
 0x40e   : > { %1687 = vmatprep.mubr.msk.f32.mxu0 %vm496_vm3, %v537_v51 }
 0x40f   : > { %1688 = vmatmul.mubr.msk.f32.vlgmr.msra.gmra.mxu0 %vm496_vm3, %v538_v12 }
 0x410   : > { %1708 = vmatpush3.msra.mxu0 %v2026_v44  ;;  %v748_v20 = vpop.xlane.xlu1 %747 }
 0x411   : > { %1807 = vrcp.f32 %v748_v20  ;;  %1709 = vmatprep.subr.mxu0 %v2053_v55 }
 0x412   : > { %1710 = vmatpush3.msra.mxu0 %v2053_v55 }
 0x413   : > { %1711 = vmatprep.subr.mxu0 %v1010_v45 }
 0x414   : > { %1712 = vmatpush3.msra.mxu0 %v1010_v45  ;;  %v529_v37 = vpop.xlane.xlu1 %528  ;;  %v751_v56 = vpop.xlane.xlu0 %750 }
 0x415   : > { %1809 = vrcp.f32 %v529_v37 }
 0x416   : > { %1811 = vrcp.f32 %v751_v56 }
 0x418   : > { %v754_v22 = vpop.xlane.xlu1 %753  ;;  %v532_v25 = vpop.xlane.xlu0 %531 }
 0x419   : > { %1813 = vrcp.f32 %v754_v22 }
 0x41a   : > { %1815 = vrcp.f32 %v532_v25 }
 0x41c   : > { %v989_v15 = vpop.xlane.xlu1 %988  ;;  %v757_v14 = vpop.xlane.xlu0 %756 }
 0x41d   : > { %1817 = vrcp.f32 %v989_v15 }
 0x41e   : > { %v1808_v44 = vpop.eup %1807  ;;  %1819 = vrcp.f32 %v757_v14 }
 0x41f   : > { %v762_v0 = vmul.f32 %v1808_v44, %v2205_v52 }
 0x420   : > { %v1226_v6 = vpop.xlane.xlu1 %1225  ;;  %v992_v57 = vpop.xlane.xlu0 %991 }
 0x421   : > { %1821 = vrcp.f32 %v1226_v6  ;;  %1701 = vmatprep.mubr.msk.f32.mxu1 %vm496_vm3, %v762_v0 }
 0x422   : > { %v1810_v55 = vpop.eup %1809  ;;  %1823 = vrcp.f32 %v992_v57 }
 0x423   : > { %v1812_v61 = vpop.eup %1811  ;;  %v539_v58 = vmul.f32 %v1810_v55, %v2209_v60 }
 0x424   : > { %v763_v35 = vmul.f32 %v1812_v61, %v2213_v23  ;;  %v995_v16 = vpop.xlane.xlu1 %994  ;;  %v1229_v53 = vpop.xlane.xlu0 %1228 }
 0x425   : > { %1825 = vrcp.f32 %v995_v16  ;;  %1690 = vmatprep.mubr.msk.f32.mxu0 %vm496_vm3, %v539_v58 }
 0x426   : > { %v1814_v1 = vpop.eup %1813  ;;  %1827 = vrcp.f32 %v1229_v53  ;;  %1702 = vmatmul.mubr.msk.f32.vlgmr.msra.gmra.mxu1 %vm496_vm3, %v763_v35 }
 0x427   : > { %v1816_v52 = vpop.eup %1815  ;;  %1722 = vmatpush3.msra.mxu1 %v2029_v47  ;;  %v764_v32 = vmul.f32 %v1814_v1, %v2219_v9 }
 0x428   : > { %1723 = vmatprep.subr.mxu1 %v2051_v54  ;;  %v1232_v2 = vpop.xlane.xlu1 %1231  ;;  %v998_v60 = vpop.xlane.xlu0 %997  ;;  %v540_v23 = vmul.f32 %v1816_v52, %v2223_v7 }
 0x429   : > { %1724 = vmatpush3.msra.mxu1 %v2051_v54  ;;  %1829 = vrcp.f32 %v1232_v2  ;;  %1704 = vmatprep.mubr.msk.f32.mxu1 %vm496_vm3, %v764_v32 }
 0x42a   : > { %v1818_v3 = vpop.eup %1817  ;;  %1725 = vmatprep.subr.mxu1 %v1247_v59  ;;  %1831 = vrcp.f32 %v998_v60  ;;  %1691 = vmatmul.mubr.msk.f32.gmra.mxu0 %vm496_vm3, %v540_v23 }
 0x42b   : > { %v1820_v8 = vpop.eup %1819  ;;  %1726 = vmatpush3.msra.mxu1 %v1247_v59  ;;  %v1003_v47 = vmul.f32 %v1818_v3, %v2229_v18 }
 0x42c   : > { %v1245_v9 = vpop.permute.xlu1 %1244  ;;  %v1235_v63 = vpop.xlane.xlu0 %1234  ;;  %v765_v62 = vmul.f32 %v1820_v8, %v2232_v5 }
 0x42d   : > { %1833 = vrcp.f32 %v1235_v63  ;;  %1715 = vmatprep.mubr.msk.f32.mxu0 %vm496_vm3, %v1003_v47  ;;  %1727 = vmatprep.subr.mxu1 %v1245_v9 }
 0x42e   : > { %v1822_v54 = vpop.eup %1821  ;;  %1705 = vmatmul.mubr.msk.f32.gmra.mxu1 %vm496_vm3, %v765_v62 }
 0x42f   : > { %v1824_v7 = vpop.eup %1823  ;;  %1728 = vmatpush3.msra.mxu1 %v1245_v9  ;;  %v1240_v11 = vmul.f32 %v1822_v54, %v2238_v27 }
 0x430   : > { %v1008_v40 = vpop.permute.xlu0 %1007  ;;  %v1004_v4 = vmul.f32 %v1824_v7, %v2240_v28 }
 0x431   : > { %1713 = vmatprep.subr.mxu0 %v1008_v40  ;;  %1729 = vmatprep.mubr.msk.f32.mxu1 %vm496_vm3, %v1240_v11 }
 0x432   : > { %v1826_v13 = vpop.eup %1825  ;;  %1714 = vmatpush3.msra.mxu0 %v1008_v40 }
 0x433   : > { %v1828_v17 = vpop.eup %1827  ;;  %1716 = vmatmul.mubr.msk.f32.vlgmr.msra.gmra.mxu0 %vm496_vm3, %v1004_v4  ;;  %v1005_v18 = vmul.f32 %v1826_v13, %v2246_v41 }
 0x434   : > { %v1241_v31 = vmul.f32 %v1828_v17, %v2248_v42 }
 0x435   : > { %1718 = vmatprep.mubr.msk.f32.mxu0 %vm496_vm3, %v1005_v18 }
 0x436   : > { %v1830_v5 = vpop.eup %1829  ;;  %1730 = vmatmul.mubr.msk.f32.vlgmr.msra.gmra.mxu1 %vm496_vm3, %v1241_v31 }
 0x437   : > { %v1832_v19 = vpop.eup %1831  ;;  %v1242_v21 = vmul.f32 %v1830_v5, %v2254_v33 }
 0x438   : > { %v1006_v26 = vmul.f32 %v1832_v19, %v2256_v34 }
 0x439   : > { %1732 = vmatprep.mubr.msk.f32.mxu1 %vm496_vm3, %v1242_v21 }
 0x43a   : > { %v1834_v27 = vpop.eup %1833  ;;  %1719 = vmatmul.mubr.msk.f32.gmra.mxu0 %vm496_vm3, %v1006_v26 }
 0x43b   : > { %v1243_v28 = vmul.f32 %v1834_v27, %v2262_v39 }
 0x43d   : > { %1733 = vmatmul.mubr.msk.f32.gmra.mxu1 %vm496_vm3, %v1243_v28 }
 0x4cf   : > { %v1689_v36 = vpop.f32.mrf.mxu0 }
 0x4d1   : > { %v619_v42 = vpop.f32.mrf.mxu0 }
 0x4e6   : > { %v1703_v10 = vpop.f32.mrf.mxu1 }
 0x4e7   : > { %1359 = vrot.lane.b32.xlu1 %v1703_v10, %s1853_s18 }
 0x4e8   : > { %v860_v41 = vpop.f32.mrf.mxu1 }
 0x4e9   : > { %1357 = vrot.lane.b32.xlu0 %v860_v41, %s1853_s18 }
 0x4ea   : > { %v1692_v29 = vpop.f32.mrf.mxu0 }
 0x4ec   : > { %v629_v34 = vpop.f32.mrf.mxu0 }
 0x4ee   : > { %v1706_v30 = vpop.f32.mrf.mxu1 }
 0x4ef   : > { %1363 = vrot.lane.b32.xlu1 %v1706_v30, %s1853_s18 }
 0x4f0   : > { %v870_v33 = vpop.f32.mrf.mxu1 }
 0x4f1   : > { %1361 = vrot.lane.b32.xlu0 %v870_v33, %s1853_s18 }
 0x4f3   : > { %v1717_v38 = vpop.f32.mrf.mxu0 }
 0x4f4   : > { %1375 = vrot.lane.b32.xlu1 %v1717_v38, %s1852_s28 }
 0x4f5   : > { %v1097_v48 = vpop.f32.mrf.mxu0 }
 0x4f6   : > { %v1731_v39 = vpop.f32.mrf.mxu1  ;;  %1373 = vrot.lane.b32.xlu0 %v1097_v48, %s1852_s28 }
 0x4f8   : > { %1391 = vrot.lane.b32.xlu1 %v1731_v39, %s1851_s17  ;;  %v1334_v43 = vpop.f32.mrf.mxu1 }
 0x4fa   : > { %v1720_v45 = vpop.f32.mrf.mxu0  ;;  %1389 = vrot.lane.b32.xlu0 %v1334_v43, %s1851_s17 }
 0x4fc   : > { %1379 = vrot.lane.b32.xlu1 %v1720_v45, %s1852_s28  ;;  %v1107_v59 = vpop.f32.mrf.mxu0 }
 0x4fd   : > { %v1734_v46 = vpop.f32.mrf.mxu1 }
 0x4fe   : > { %1377 = vrot.lane.b32.xlu0 %v1107_v59, %s1852_s28 }
 0x4ff   : > { %v1344_v49 = vpop.f32.mrf.mxu1 }
 0x500   : > { %1395 = vrot.lane.b32.xlu1 %v1734_v46, %s1851_s17 }
 0x502   : > { %1393 = vrot.lane.b32.xlu0 %v1344_v49, %s1851_s17 }
 0x559   : > { %v1360_v50 = vpop.permute.xlu1 %1359 }
 0x55a   : > { %v1402_v56 = vsel %vm496_vm3, %v1689_v36, %v1360_v50 }
 0x55b   : > { %v1358_v24 = vpop.permute.xlu0 %1357 }
 0x55c   : > { %v1401_v15 = vsel %vm496_vm3, %v619_v42, %v1358_v24 }
 0x561   : > { %v1364_v12 = vpop.permute.xlu1 %1363 }
 0x562   : > { %v1404_v53 = vsel %vm496_vm3, %v1692_v29, %v1364_v12 }
 0x563   : > { %v1362_v51 = vpop.permute.xlu0 %1361 }
 0x564   : > { %v1403_v32 = vsel %vm496_vm3, %v629_v34, %v1362_v51 }
 0x566   : > { %v1376_v20 = vpop.permute.xlu1 %1375 }
 0x567   : > { %v1407_v22 = vsel %vm1405_vm1, %v1402_v56, %v1376_v20 }
 0x568   : > { %v1374_v37 = vpop.permute.xlu0 %1373 }
 0x569   : > { %v1406_v44 = vsel %vm1405_vm1, %v1401_v15, %v1374_v37 }
 0x56a   : > { %v1392_v25 = vpop.permute.xlu1 %1391 }
 0x56b   : > { %v1412_v14 = vsel %vm1410_vm2, %v1407_v22, %v1392_v25 }
 0x56c   : > { %v1420_v0 = vmin.f32 %v1412_v14, 0.0  ;;  %v1390_v6 = vpop.permute.xlu0 %1389  ;;  %vm1416_vm3 = vcmp.gt.f32.partialorder %v1412_v14, 0.0 }
 0x56d   : > { %v1411_v57 = vsel %vm1410_vm2, %v1406_v44, %v1390_v6 }
 0x56e   : > { %v1425_v55 = vmul.f32 1.442695, %v1420_v0  ;;  %v1419_v61 = vmin.f32 %v1411_v57, 0.0  ;;  %v1380_v58 = vpop.permute.xlu1 %1379  ;;  %vm1415_vm4 = vcmp.gt.f32.partialorder %v1411_v57, 0.0 }
 0x56f   : > { %v1409_v1 = vsel %vm1405_vm1, %v1404_v53, %v1380_v58 }
 0x570   : > { %1835 = vpow2.f32 %v1425_v55  ;;  %v1423_v35 = vmul.f32 1.442695, %v1419_v61  ;;  %v1378_v16 = vpop.permute.xlu0 %1377 }
 0x571   : > { %v1408_v60 = vsel %vm1405_vm1, %v1403_v32, %v1378_v16 }
 0x572   : > { %1837 = vpow2.f32 %v1423_v35  ;;  %v1396_v52 = vpop.permute.xlu1 %1395 }
 0x573   : > { %v1414_v2 = vsel %vm1410_vm2, %v1409_v1, %v1396_v52 }
 0x574   : > { %v1422_v23 = vmin.f32 %v1414_v2, 0.0  ;;  %v1394_v3 = vpop.permute.xlu0 %1393  ;;  %vm1418_vm5 = vcmp.gt.f32.partialorder %v1414_v2, 0.0 }
 0x575   : > { %v1413_v8 = vsel %vm1410_vm2, %v1408_v60, %v1394_v3 }
 0x576   : > { %v1429_v47 = vmul.f32 1.442695, %v1422_v23  ;;  %v1421_v9 = vmin.f32 %v1413_v8, 0.0  ;;  %vm1417_vm6 = vcmp.gt.f32.partialorder %v1413_v8, 0.0 }
 0x578   : > { %1839 = vpow2.f32 %v1429_v47  ;;  %v1427_v63 = vmul.f32 1.442695, %v1421_v9 }
 0x57a   : > { %1841 = vpow2.f32 %v1427_v63 }
 0x57d   : > { %v1836_v62 = vpop.eup %1835 }
 0x57e   : > { %v1524_v54 = vadd.f32 -1.0, %v1836_v62 }
 0x57f   : > { %v1838_v7 = vpop.eup %1837 }
 0x580   : > { %v1436_v11 = vsel %vm1416_vm3, %v1412_v14, %v1524_v54  ;;  %v1523_v40 = vadd.f32 -1.0, %v1838_v7 }
 0x581   : > { %1440 = vst [vmem:[%s197_s9 + $0x8] sm:$0xff] %v1436_v11 }
 0x582   : > { %v1435_v4 = vsel %vm1415_vm4, %v1411_v57, %v1523_v40 }
 0x583   : > { %1439 = vst [vmem:[%s197_s9] sm:$0xff] %v1435_v4 }
 0x585   : > { %v1840_v13 = vpop.eup %1839 }
 0x586   : > { %v1526_v17 = vadd.f32 -1.0, %v1840_v13 }
 0x587   : > { %v1842_v18 = vpop.eup %1841 }
 0x588   : > { %v1438_v31 = vsel %vm1418_vm5, %v1414_v2, %v1526_v17  ;;  %v1525_v5 = vadd.f32 -1.0, %v1842_v18 }
 0x589   : > { %1442 = vst [vmem:[%s197_s9 + $0x18] sm:$0xff] %v1438_v31 }
 0x58a   : > { %v1437_v19 = vsel %vm1417_vm6, %v1413_v8, %v1525_v5 }
 0x58b   : > { %1441 = vst [vmem:[%s197_s9 + $0x10] sm:$0xff] %v1437_v19 }
 0x58c PF: > { %s14_s15 = sadd.s32 1, %s1849_s15  }
 0x58d   : > { %p11_p4 = scmp.ge.s32.totalorder %s14_s15, 4  }
 0x58f   :  { %13 = sbr.rel (!%p11_p4) target bundleno = 1 (0x1), region = 66 }

// kernel: model_forward.9
= control target key start
LH: loop header
LB: loop body
LE: loop exit
PB: predicated region body
PF: predicated region fallthrough
CT: control target
= control target key end

     0   :  { %s1503_s0 = inlined_call_operand.vmem [shape: f32[96,128], index: 0, kind: input, shape index: {}]   ;;  %s1504_s1 = inlined_call_operand.vmem [shape: f32[128,128], index: 1, kind: input, shape index: {}]   ;;  %s1505_s2 = inlined_call_operand.vmem [shape: f32[1,128], index: 2, kind: input, shape index: {}]   ;;  %s1506_s3 = inlined_call_operand.vmem [shape: f32[128,8], index: 3, kind: input, shape index: {}]   ;;  %s1507_s4 = inlined_call_operand.vmem [shape: f32[1,8], index: 4, kind: input, shape index: {}]   ;;  %s1508_s5 = inlined_call_operand.vmem [shape: s32[96,1], index: 5, kind: input, shape index: {}]   ;;  %s1509_s6 = inlined_call_operand.vmem [shape: f32[1,2], index: 6, kind: output, shape index: {}]  }
   0x1   :  { %v51_v0 = vld [vmem:[%s1504_s1 + $0x78] sm:$0xff]  ;;  %v50_v1 = vld [vmem:[%s1504_s1 + $0x70] sm:$0xff]  ;;  %v49_v2 = vld [vmem:[%s1504_s1 + $0x68] sm:$0xff] }
   0x2   :  { %880 = vmatprep.subr.mxu0 %v51_v0  ;;  %v48_v3 = vld [vmem:[%s1504_s1 + $0x60] sm:$0xff]  ;;  %v47_v5 = vld [vmem:[%s1504_s1 + $0x58] sm:$0xff]  ;;  %v46_v6 = vld [vmem:[%s1504_s1 + $0x50] sm:$0xff] }
   0x3   :  { %881 = vmatpush3.msra.mxu0 %v51_v0  ;;  %v24_v4 = vld [vmem:[%s1503_s0] sm:$0xff]  ;;  %v211_v7 = vld [vmem:[%s1506_s3 + $0x78] sm:$0xff]  ;;  %v210_v8 = vld [vmem:[%s1506_s3 + $0x70] sm:$0xff] }
   0x4   :  { %882 = vmatprep.subr.mxu0 %v50_v1  ;;  %912 = vmatprep.mubr.f32.mxu0 %v24_v4  ;;  %v45_v9 = vld [vmem:[%s1504_s1 + $0x48] sm:$0xff]  ;;  %v44_v11 = vld [vmem:[%s1504_s1 + $0x40] sm:$0xff] }
   0x5   :  { %883 = vmatpush3.msra.mxu0 %v50_v1  ;;  %930 = vmatprep.subr.mxu1 %v211_v7  ;;  %v209_v10 = vld [vmem:[%s1506_s3 + $0x68] sm:$0xff]  ;;  %v208_v12 = vld [vmem:[%s1506_s3 + $0x60] sm:$0xff] }
   0x6   :  { %884 = vmatprep.subr.mxu0 %v49_v2  ;;  %931 = vmatpush3.msra.mxu1 %v211_v7 }
   0x7   :  { %885 = vmatpush3.msra.mxu0 %v49_v2  ;;  %932 = vmatprep.subr.mxu1 %v210_v8 }
   0x8   :  { %886 = vmatprep.subr.mxu0 %v48_v3  ;;  %933 = vmatpush3.msra.mxu1 %v210_v8 }
   0x9   :  { %887 = vmatpush3.msra.mxu0 %v48_v3 }
   0xa   :  { %888 = vmatprep.subr.mxu0 %v47_v5 }
   0xb   :  { %889 = vmatpush3.msra.mxu0 %v47_v5 }
   0xc   :  { %890 = vmatprep.subr.mxu0 %v46_v6 }
   0xd   :  { %891 = vmatpush3.msra.mxu0 %v46_v6 }
   0xe   :  { %892 = vmatprep.subr.mxu0 %v45_v9 }
   0xf   :  { %11 = vsyncpa [#allocation3], 0  ;;  %893 = vmatpush3.msra.mxu0 %v45_v9  ;;  %v43_v13 = vld [vmem:[%s1504_s1 + $0x38] sm:$0xff]  ;;  %934 = vmatprep.subr.mxu1 %v209_v10  ;;  %v42_v15 = vld [vmem:[%s1504_s1 + $0x30] sm:$0xff]  ;;  %v1098_v45 = vmov 0   ;;  %vm416_vm0 = vcmask 64512  }
  0x10   :  { %894 = vmatprep.subr.mxu0 %v44_v11  ;;  %935 = vmatpush3.msra.mxu1 %v209_v10  ;;  %v207_v14 = vld [vmem:[%s1506_s3 + $0x58] sm:$0xff]  ;;  %v206_v16 = vld [vmem:[%s1506_s3 + $0x50] sm:$0xff]  ;;  %v41_v17 = vld [vmem:[%s1504_s1 + $0x28] sm:$0xff]  ;;  %vm720_vm13 = vcmask 7168  }
  0x11   :  { %895 = vmatpush3.msra.mxu0 %v44_v11  ;;  %936 = vmatprep.subr.mxu1 %v208_v12  ;;  %v205_v18 = vld [vmem:[%s1506_s3 + $0x48] sm:$0xff]  ;;  %v40_v19 = vld [vmem:[%s1504_s1 + $0x20] sm:$0xff]  ;;  %v39_v21 = vld [vmem:[%s1504_s1 + $0x18] sm:$0xff] }
  0x12   :  { %896 = vmatprep.subr.mxu0 %v43_v13  ;;  %937 = vmatpush3.msra.mxu1 %v208_v12  ;;  %v204_v20 = vld [vmem:[%s1506_s3 + $0x40] sm:$0xff]  ;;  %v203_v22 = vld [vmem:[%s1506_s3 + $0x38] sm:$0xff]  ;;  %v38_v23 = vld [vmem:[%s1504_s1 + $0x10] sm:$0xff] }
  0x13   :  { %897 = vmatpush3.msra.mxu0 %v43_v13  ;;  %938 = vmatprep.subr.mxu1 %v207_v14  ;;  %v202_v24 = vld [vmem:[%s1506_s3 + $0x30] sm:$0xff]  ;;  %v37_v25 = vld [vmem:[%s1504_s1 + $0x8] sm:$0xff]  ;;  %v36_v27 = vld [vmem:[%s1504_s1] sm:$0xff]  ;;  %s813_s1 = sshll.u32 %s1509_s6, 4  ;;  %s814_s1 = int_to_ptr.vmem [resolvable:$true] %s813_s1 }
  0x14   :  { %898 = vmatprep.subr.mxu0 %v42_v15  ;;  %939 = vmatpush3.msra.mxu1 %v207_v14  ;;  %v201_v26 = vld [vmem:[%s1506_s3 + $0x28] sm:$0xff]  ;;  %v200_v28 = vld [vmem:[%s1506_s3 + $0x20] sm:$0xff]  ;;  %v26_v30 = vld [vmem:[%s1503_s0 + $0x10] sm:$0xff]  ;;  %s1084_s15 = scalar_lea.vmem %s814_s1, 16  ;;  %p1089_p1 = scmp.lt.s32.totalorder %s814_s1, %s814_s1 }
  0x15   :  { %899 = vmatpush3.msra.mxu0 %v42_v15  ;;  %940 = vmatprep.subr.mxu1 %v206_v16  ;;  %v25_v29 = vld [vmem:[%s1503_s0 + $0x8] sm:$0xff]  ;;  %v27_v31 = vld [vmem:[%s1503_s0 + $0x18] sm:$0xff]  ;;  %v28_v32 = vld [vmem:[%s1503_s0 + $0x20] sm:$0xff]  ;;  %p1085_p0 = scmp.ne.s32.totalorder %s814_s1, %s1084_s15  ;;  %p1090_p2 = scmp.lt.s32.totalorder %s1084_s15, %s1084_s15 }
  0x16   :  { %900 = vmatprep.subr.mxu0 %v41_v17  ;;  %941 = vmatpush3.msra.mxu1 %v206_v16  ;;  %v29_v33 = vld [vmem:[%s1503_s0 + $0x28] sm:$0xff]  ;;  %v30_v34 = vld [vmem:[%s1503_s0 + $0x30] sm:$0xff]  ;;  %v31_v35 = vld [vmem:[%s1503_s0 + $0x38] sm:$0xff] }
  0x17   :  { %901 = vmatpush3.msra.mxu0 %v41_v17  ;;  %942 = vmatprep.subr.mxu1 %v205_v18  ;;  %v32_v36 = vld [vmem:[%s1503_s0 + $0x40] sm:$0xff]  ;;  %v33_v37 = vld [vmem:[%s1503_s0 + $0x48] sm:$0xff]  ;;  %v34_v38 = vld [vmem:[%s1503_s0 + $0x50] sm:$0xff]  ;;  %p1091_p3 = por %p1090_p2, %p1089_p1 }
  0x18   :  { %902 = vmatprep.subr.mxu0 %v40_v19  ;;  %943 = vmatpush3.msra.mxu1 %v205_v18  ;;  %v35_v39 = vld [vmem:[%s1503_s0 + $0x58] sm:$0xff]  ;;  %v198_v41 = vld [vmem:[%s1506_s3 + $0x10] sm:$0xff]  ;;  %v197_v42 = vld [vmem:[%s1506_s3 + $0x8] sm:$0xff] }
  0x19   :  { %903 = vmatpush3.msra.mxu0 %v40_v19  ;;  %944 = vmatprep.subr.mxu1 %v204_v20  ;;  %v199_v40 = vld [vmem:[%s1506_s3 + $0x18] sm:$0xff]  ;;  %v196_v43 = vld [vmem:[%s1506_s3] sm:$0xff]  ;;  %v564_v44 = vld [vmem:[%s1508_s5 + $0x8] sm:$0xff]  ;;  %p1092_p4 = pnand %p1091_p3, %p1085_p0 }
  0x1a   :  { %904 = vmatprep.subr.mxu0 %v39_v21  ;;  %945 = vmatpush3.msra.mxu1 %v204_v20  ;;  %v563_v46 = vld [vmem:[%s1508_s5] sm:$0xff]  ;;  %v565_v47 = vld [vmem:[%s1508_s5 + $0x10] sm:$0xff]  ;;  %v566_v48 = vld [vmem:[%s1508_s5 + $0x18] sm:$0xff] }
  0x1b   :  { %905 = vmatpush3.msra.mxu0 %v39_v21  ;;  %946 = vmatprep.subr.mxu1 %v203_v22  ;;  %v567_v49 = vld [vmem:[%s1508_s5 + $0x20] sm:$0xff]  ;;  %v568_v50 = vld [vmem:[%s1508_s5 + $0x28] sm:$0xff] }
  0x1c   :  { %906 = vmatprep.subr.mxu0 %v38_v23  ;;  %947 = vmatpush3.msra.mxu1 %v203_v22  ;;  %v571_v51 = vld [vmem:[%s1508_s5 + $0x40] sm:$0xff] }
  0x1d   :  { %907 = vmatpush3.msra.mxu0 %v38_v23  ;;  %948 = vmatprep.subr.mxu1 %v202_v24  ;;  %v822_v52 = vld [vmem:[%s1505_s2] ss:$0 sm:$0xff] }
  0x1e   :  { %908 = vmatprep.subr.mxu0 %v37_v25  ;;  %949 = vmatpush3.msra.mxu1 %v202_v24 }
  0x1f   :  { %909 = vmatpush3.msra.mxu0 %v37_v25  ;;  %950 = vmatprep.subr.mxu1 %v201_v26  ;;  %v823_v25 = vld [vmem:[%s1507_s4] ss:$0 sm:$0xff] }
  0x20   :  { %910 = vmatprep.subr.mxu0 %v36_v27  ;;  %951 = vmatpush3.msra.mxu1 %v201_v26 }
  0x21   :  { %911 = vmatpush3.msra.mxu0 %v36_v27  ;;  %952 = vmatprep.subr.mxu1 %v200_v28 }
  0x22   :  { %913 = vmatmul.mubr.f32.vlgmr.msra.gmra.mxu0 %v25_v29  ;;  %953 = vmatpush3.msra.mxu1 %v200_v28 }
  0x23   :  { %915 = vmatprep.mubr.f32.mxu0 %v26_v30  ;;  %954 = vmatprep.subr.mxu1 %v199_v40 }
  0x24   :  { %955 = vmatpush3.msra.mxu1 %v199_v40  ;;  %987 = vset.pattern.permute.xlu1 %v1098_v45 }
  0x25   :  { %956 = vmatprep.subr.mxu1 %v198_v41  ;;  %986 = vset.pattern.permute.xlu0 %v1098_v45 }
  0x26   :  { %916 = vmatmul.mubr.f32.gmra.mxu0 %v27_v31  ;;  %957 = vmatpush3.msra.mxu1 %v198_v41 }
  0x27   :  { %918 = vmatprep.mubr.f32.mxu0 %v28_v32  ;;  %958 = vmatprep.subr.mxu1 %v197_v42 }
  0x28   :  { %959 = vmatpush3.msra.mxu1 %v197_v42  ;;  %579 = vperm.xlu1 %987, %v564_v44  }
  0x29   :  { %960 = vmatprep.subr.mxu1 %v196_v43  ;;  %576 = vperm.xlu0 %986, %v563_v46  }
  0x2a   :  { %919 = vmatmul.mubr.f32.gmra.mxu0 %v29_v33  ;;  %961 = vmatpush3.msra.mxu1 %v196_v43 }
  0x2b   :  { %921 = vmatprep.mubr.f32.mxu0 %v30_v34 }
  0x2c   :  { %582 = vperm.xlu1 %987, %v565_v47  }
  0x2e   :  { %922 = vmatmul.mubr.f32.gmra.mxu0 %v31_v35 }
  0x2f   :  { %924 = vmatprep.mubr.f32.mxu0 %v32_v36 }
  0x30   :  { %585 = vperm.xlu1 %987, %v566_v48  }
  0x32   :  { %925 = vmatmul.mubr.f32.gmra.mxu0 %v33_v37 }
  0x33   :  { %927 = vmatprep.mubr.f32.mxu0 %v34_v38 }
  0x34   :  { %588 = vperm.xlu1 %987, %v567_v49  }
  0x36   :  { %928 = vmatmul.mubr.f32.gmra.mxu0 %v35_v39 }
  0x38   :  { %591 = vperm.xlu1 %987, %v568_v50  }
  0x3c   :  { %600 = vperm.xlu1 %987, %v571_v51  }
  0xe2   :  { %v914_v53 = vpop.f32.mrf.mxu0 }
  0xe3   :  { %v131_v54 = vadd.f32 %v914_v53, %v822_v52 }
  0xe4   :  { %v125_v55 = vpop.f32.mrf.mxu0 }
  0xe5   :  { %v126_v56 = vadd.f32 %v822_v52, %v125_v55  ;;  %v185_v59 = vmax.f32 %v131_v54, 0.0 }
  0xe6   :  { %v917_v57 = vpop.f32.mrf.mxu0 }
  0xe7   :  { %v184_v58 = vmax.f32 %v126_v56, 0.0  ;;  %v141_v60 = vadd.f32 %v917_v57, %v822_v52 }
  0xe8   :  { %v135_v61 = vpop.f32.mrf.mxu0 }
  0xe9   :  { %v136_v62 = vadd.f32 %v822_v52, %v135_v61  ;;  %962 = vmatprep.mubr.f32.mxu1 %v184_v58  ;;  %v187_v1 = vmax.f32 %v141_v60, 0.0 }
  0xea   :  { %v920_v63 = vpop.f32.mrf.mxu0  ;;  %963 = vmatmul.mubr.f32.vlgmr.msra.gmra.mxu1 %v185_v59 }
  0xeb   :  { %v186_v0 = vmax.f32 %v136_v62, 0.0  ;;  %v151_v2 = vadd.f32 %v920_v63, %v822_v52 }
  0xec   :  { %v145_v3 = vpop.f32.mrf.mxu0 }
  0xed   :  { %v146_v4 = vadd.f32 %v822_v52, %v145_v3  ;;  %965 = vmatprep.mubr.f32.mxu1 %v186_v0  ;;  %v189_v7 = vmax.f32 %v151_v2, 0.0 }
  0xee   :  { %v923_v5 = vpop.f32.mrf.mxu0  ;;  %966 = vmatmul.mubr.f32.gmra.mxu1 %v187_v1 }
  0xef   :  { %v188_v6 = vmax.f32 %v146_v4, 0.0  ;;  %v161_v8 = vadd.f32 %v923_v5, %v822_v52 }
  0xf0   :  { %v155_v9 = vpop.f32.mrf.mxu0 }
  0xf1   :  { %v156_v10 = vadd.f32 %v822_v52, %v155_v9  ;;  %968 = vmatprep.mubr.f32.mxu1 %v188_v6  ;;  %v191_v13 = vmax.f32 %v161_v8, 0.0 }
  0xf2   :  { %v926_v11 = vpop.f32.mrf.mxu0  ;;  %969 = vmatmul.mubr.f32.gmra.mxu1 %v189_v7 }
  0xf3   :  { %v190_v12 = vmax.f32 %v156_v10, 0.0  ;;  %v171_v14 = vadd.f32 %v926_v11, %v822_v52 }
  0xf4   :  { %v165_v15 = vpop.f32.mrf.mxu0 }
  0xf5   :  { %v166_v16 = vadd.f32 %v822_v52, %v165_v15  ;;  %971 = vmatprep.mubr.f32.mxu1 %v190_v12  ;;  %v193_v20 = vmax.f32 %v171_v14, 0.0 }
  0xf6   :  { %v929_v17 = vpop.f32.mrf.mxu0  ;;  %972 = vmatmul.mubr.f32.gmra.mxu1 %v191_v13 }
  0xf7   :  { %v192_v18 = vmax.f32 %v166_v16, 0.0  ;;  %v181_v19 = vadd.f32 %v929_v17, %v822_v52 }
  0xf8   :  { %v175_v21 = vpop.f32.mrf.mxu0 }
  0xf9   :  { %v176_v22 = vadd.f32 %v822_v52, %v175_v21  ;;  %974 = vmatprep.mubr.f32.mxu1 %v192_v18  ;;  %v195_v23 = vmax.f32 %v181_v19, 0.0 }
  0xfa   :  { %975 = vmatmul.mubr.f32.gmra.mxu1 %v193_v20 }
  0xfb   :  { %v194_v24 = vmax.f32 %v176_v22, 0.0 }
  0xfd   :  { %977 = vmatprep.mubr.f32.mxu1 %v194_v24 }
  0xfe   :  { %978 = vmatmul.mubr.f32.gmra.mxu1 %v195_v23 }
 0x1aa   :  { %v964_v26 = vpop.f32.mrf.mxu1 }
 0x1ab   :  { %v291_v27 = vadd.f32 %v964_v26, %v823_v25 }
 0x1ac   :  { %v285_v28 = vpop.f32.mrf.mxu1 }
 0x1ad   :  { %v345_v29 = vsub.f32 0.0, %v291_v27  ;;  %v286_v30 = vadd.f32 %v823_v25, %v285_v28 }
 0x1ae   :  { %v967_v31 = vpop.f32.mrf.mxu1 }
 0x1af   :  { %v358_v32 = vmul.f32 1.442695, %v345_v29  ;;  %v344_v33 = vsub.f32 0.0, %v286_v30  ;;  %v301_v34 = vadd.f32 %v967_v31, %v823_v25 }
 0x1b0   :  { %v295_v35 = vpop.f32.mrf.mxu1 }
 0x1b1   :  { %988 = vpow2.f32 %v358_v32  ;;  %v356_v36 = vmul.f32 1.442695, %v344_v33  ;;  %v347_v37 = vsub.f32 0.0, %v301_v34  ;;  %v296_v38 = vadd.f32 %v823_v25, %v295_v35 }
 0x1b2   :  { %v970_v39 = vpop.f32.mrf.mxu1 }
 0x1b3   :  { %990 = vpow2.f32 %v356_v36  ;;  %v362_v40 = vmul.f32 1.442695, %v347_v37  ;;  %v346_v41 = vsub.f32 0.0, %v296_v38  ;;  %v311_v42 = vadd.f32 %v970_v39, %v823_v25 }
 0x1b4   :  { %v305_v43 = vpop.f32.mrf.mxu1 }
 0x1b5   :  { %992 = vpow2.f32 %v362_v40  ;;  %v360_v44 = vmul.f32 1.442695, %v346_v41  ;;  %v349_v45 = vsub.f32 0.0, %v311_v42  ;;  %v306_v46 = vadd.f32 %v823_v25, %v305_v43 }
 0x1b6   :  { %v973_v47 = vpop.f32.mrf.mxu1 }
 0x1b7   :  { %994 = vpow2.f32 %v360_v44  ;;  %v366_v48 = vmul.f32 1.442695, %v349_v45  ;;  %v348_v49 = vsub.f32 0.0, %v306_v46  ;;  %v321_v50 = vadd.f32 %v973_v47, %v823_v25 }
 0x1b8   :  { %v315_v51 = vpop.f32.mrf.mxu1 }
 0x1b9   :  { %996 = vpow2.f32 %v366_v48  ;;  %v364_v52 = vmul.f32 1.442695, %v348_v49  ;;  %v351_v53 = vsub.f32 0.0, %v321_v50  ;;  %v316_v54 = vadd.f32 %v823_v25, %v315_v51 }
 0x1ba   :  { %v976_v55 = vpop.f32.mrf.mxu1 }
 0x1bb   :  { %998 = vpow2.f32 %v364_v52  ;;  %v370_v56 = vmul.f32 1.442695, %v351_v53  ;;  %v350_v57 = vsub.f32 0.0, %v316_v54  ;;  %v331_v58 = vadd.f32 %v976_v55, %v823_v25 }
 0x1bc   :  { %v325_v59 = vpop.f32.mrf.mxu1 }
 0x1bd   :  { %1000 = vpow2.f32 %v370_v56  ;;  %v368_v60 = vmul.f32 1.442695, %v350_v57  ;;  %v353_v61 = vsub.f32 0.0, %v331_v58  ;;  %v326_v62 = vadd.f32 %v823_v25, %v325_v59  ;;  %v572_v58 = vld [vmem:[%s1508_s5 + $0x48] sm:$0xff]  ;;  %v573_v59 = vld [vmem:[%s1508_s5 + $0x50] sm:$0xff] }
 0x1be   :  { %v989_v63 = vpop.eup %988  ;;  %v979_v0 = vpop.f32.mrf.mxu1 }
 0x1bf   :  { %v381_v1 = vadd.f32 1.0, %v989_v63  ;;  %1002 = vpow2.f32 %v368_v60  ;;  %v374_v2 = vmul.f32 1.442695, %v353_v61  ;;  %v352_v3 = vsub.f32 0.0, %v326_v62  ;;  %v569_v60 = vld [vmem:[%s1508_s5 + $0x30] sm:$0xff]  ;;  %v574_v61 = vld [vmem:[%s1508_s5 + $0x58] sm:$0xff]  ;;  %v1357_v63 = vpop.permute.xlu1 %579 }
 0x1c0   :  { %v991_v4 = vpop.eup %990  ;;  %v341_v5 = vadd.f32 %v979_v0, %v823_v25  ;;  %v335_v6 = vpop.f32.mrf.mxu1  ;;  %v570_v62 = vld [vmem:[%s1508_s5 + $0x38] sm:$0xff] }
 0x1c1   :  { %1004 = vrcp.f32 %v381_v1  ;;  %v380_v7 = vadd.f32 1.0, %v991_v4  ;;  %v372_v8 = vmul.f32 1.442695, %v352_v3  ;;  %v336_v9 = vadd.f32 %v823_v25, %v335_v6  ;;  %v1365_v3 = vpop.permute.xlu0 %576 }
 0x1c2   :  { %v993_v10 = vpop.eup %992  ;;  %1006 = vpow2.f32 %v374_v2  ;;  %v355_v11 = vsub.f32 0.0, %v341_v5 }
 0x1c3   :  { %1008 = vrcp.f32 %v380_v7  ;;  %v383_v12 = vadd.f32 1.0, %v993_v10  ;;  %v354_v13 = vsub.f32 0.0, %v336_v9  ;;  %v1359_v0 = vpop.permute.xlu1 %582 }
 0x1c4   :  { %v995_v14 = vpop.eup %994  ;;  %1010 = vpow2.f32 %v372_v8  ;;  %v378_v15 = vmul.f32 1.442695, %v355_v11 }
 0x1c5   :  { %1012 = vrcp.f32 %v383_v12  ;;  %v382_v16 = vadd.f32 1.0, %v995_v14  ;;  %v376_v17 = vmul.f32 1.442695, %v354_v13 }
 0x1c6   :  { %v997_v18 = vpop.eup %996  ;;  %1014 = vpow2.f32 %v378_v15 }
 0x1c7   :  { %1016 = vrcp.f32 %v382_v16  ;;  %v385_v19 = vadd.f32 1.0, %v997_v18  ;;  %v1361_v1 = vpop.permute.xlu1 %585 }
 0x1c8   :  { %v999_v20 = vpop.eup %998  ;;  %1018 = vpow2.f32 %v376_v17 }
 0x1c9   :  { %v384_v21 = vadd.f32 1.0, %v999_v20  ;;  %1020 = vrcp.f32 %v385_v19 }
 0x1ca   :  { %v1001_v22 = vpop.eup %1000 }
 0x1cb   :  { %1022 = vrcp.f32 %v384_v21  ;;  %v387_v23 = vadd.f32 1.0, %v1001_v22  ;;  %v1363_v2 = vpop.permute.xlu1 %588 }
 0x1cc   :  { %v1003_v24 = vpop.eup %1002 }
 0x1cd   :  { %1024 = vrcp.f32 %v387_v23  ;;  %v386_v25 = vadd.f32 1.0, %v1003_v24 }
 0x1ce   :  { %v1294_v26 = vpop.eup %1004 }
 0x1cf   :  { %v1007_v27 = vpop.eup %1006  ;;  %v420_v28 = vsel %vm416_vm0, %v1294_v26, -inf  ;;  %1026 = vrcp.f32 %v386_v25  ;;  %v1367_v4 = vpop.permute.xlu1 %591 }
 0x1d0   :  { %v1298_v29 = vpop.eup %1008  ;;  %v389_v30 = vadd.f32 1.0, %v1007_v27  ;;  %421 = vmax.xlane.f32.xlu0 %v420_v28 }
 0x1d1   :  { %v1011_v31 = vpop.eup %1010  ;;  %v417_v36 = vsel %vm416_vm0, %v1298_v29, -inf }
 0x1d2   :  { %v1300_v32 = vpop.eup %1012  ;;  %1028 = vrcp.f32 %v389_v30  ;;  %v388_v33 = vadd.f32 1.0, %v1011_v31 }
 0x1d3   :  { %v1015_v34 = vpop.eup %1014  ;;  %v426_v35 = vsel %vm416_vm0, %v1300_v32, -inf  ;;  %v1369_v5 = vpop.permute.xlu1 %600 }
 0x1d4   :  { %v1306_v37 = vpop.eup %1016  ;;  %v391_v38 = vadd.f32 1.0, %v1015_v34  ;;  %427 = vmax.xlane.f32.xlu1 %v426_v35  ;;  %418 = vmax.xlane.f32.xlu0 %v417_v36  ;;  %1030 = vrcp.f32 %v388_v33 }
 0x1d5   :  { %v1019_v39 = vpop.eup %1018  ;;  %v423_v42 = vsel %vm416_vm0, %v1306_v37, -inf }
 0x1d6   :  { %1032 = vrcp.f32 %v391_v38  ;;  %v390_v40 = vadd.f32 1.0, %v1019_v39  ;;  %v1308_v41 = vpop.eup %1020 }
 0x1d7   :  { %v432_v46 = vsel %vm416_vm0, %v1308_v41, -inf }
 0x1d8   :  { %v1312_v43 = vpop.eup %1022  ;;  %1034 = vrcp.f32 %v390_v40  ;;  %424 = vmax.xlane.f32.xlu1 %v423_v42 }
 0x1d9   :  { %v429_v44 = vsel %vm416_vm0, %v1312_v43, -inf }
 0x1da   :  { %v1316_v45 = vpop.eup %1024  ;;  %430 = vmax.xlane.f32.xlu0 %v429_v44 }
 0x1db   :  { %v438_v47 = vsel %vm416_vm0, %v1316_v45, -inf }
 0x1dc   :  { %433 = vmax.xlane.f32.xlu1 %v432_v46  ;;  %v1322_v48 = vpop.eup %1026 }
 0x1dd   :  { %v435_v51 = vsel %vm416_vm0, %v1322_v48, -inf }
 0x1de   :  { %439 = vmax.xlane.f32.xlu0 %v438_v47 }
 0x1df   :  { %v1324_v49 = vpop.eup %1028 }
 0x1e0   :  { %v444_v50 = vsel %vm416_vm0, %v1324_v49, -inf }
 0x1e1   :  { %445 = vmax.xlane.f32.xlu1 %v444_v50  ;;  %v1330_v52 = vpop.eup %1030 }
 0x1e2   :  { %436 = vmax.xlane.f32.xlu0 %v435_v51  ;;  %v441_v56 = vsel %vm416_vm0, %v1330_v52, -inf }
 0x1e3   :  { %v1332_v53 = vpop.eup %1032 }
 0x1e4   :  { %v450_v54 = vsel %vm416_vm0, %v1332_v53, -inf }
 0x1e5   :  { %v1336_v55 = vpop.eup %1034  ;;  %451 = vmax.xlane.f32.xlu1 %v450_v54 }
 0x1e6   :  { %442 = vmax.xlane.f32.xlu0 %v441_v56  ;;  %v447_v57 = vsel %vm416_vm0, %v1336_v55, -inf }
 0x1e9   :  { %448 = vmax.xlane.f32.xlu1 %v447_v57 }
 0x1fa   :  { %603 = vperm.xlu1 %987, %v572_v58   ;;  %v561_v58 = vlaneseq }
 0x1fc   :  { %606 = vperm.xlu0 %986, %v573_v59  }
 0x1fe   :  { %594 = vperm.xlu1 %987, %v569_v60  }
 0x200   :  { %609 = vperm.xlu0 %986, %v574_v61  }
 0x202   :  { %597 = vperm.xlu1 %987, %v570_v62  }
 0x259   :  { %v1371_v6 = vpop.xlane.xlu0 %421 }
 0x25a   :  { %v454_v7 = vsub.f32 %v1294_v26, %v1371_v6 }
 0x25c   :  { %v467_v8 = vmul.f32 1.442695, %v454_v7 }
 0x25d   :  { %v1375_v9 = vpop.xlane.xlu1 %427  ;;  %v1377_v10 = vpop.xlane.xlu0 %418 }
 0x25e   :  { %1036 = vpow2.f32 %v467_v8  ;;  %v456_v11 = vsub.f32 %v1300_v32, %v1375_v9  ;;  %v453_v12 = vsub.f32 %v1298_v29, %v1377_v10 }
 0x260   :  { %v465_v13 = vmul.f32 1.442695, %v453_v12  ;;  %v471_v14 = vmul.f32 1.442695, %v456_v11  ;;  %v1423_v11 = vand.u32 127, %v561_v58 }
 0x261   :  { %v1383_v15 = vpop.xlane.xlu1 %424 }
 0x262   :  { %v455_v16 = vsub.f32 %v1306_v37, %v1383_v15  ;;  %1038 = vpow2.f32 %v465_v13  ;;  %vm612_vm1 = vcmp.eq.s32.totalorder %v1423_v11, %v1357_v63  ;;  %vm611_vm2 = vcmp.eq.s32.totalorder %v1423_v11, %v1365_v3 }
 0x263   :  { %v1387_v17 = vpop.xlane.xlu0 %430  ;;  %1040 = vpow2.f32 %v471_v14  ;;  %vm613_vm3 = vcmp.eq.s32.totalorder %v1423_v11, %v1359_v0  ;;  %vm614_vm4 = vcmp.eq.s32.totalorder %v1423_v11, %v1361_v1  ;;  %vm615_vm5 = vcmp.eq.s32.totalorder %v1423_v11, %v1363_v2 }
 0x264   :  { %v469_v18 = vmul.f32 1.442695, %v455_v16  ;;  %v457_v19 = vsub.f32 %v1312_v43, %v1387_v17  ;;  %vm616_vm6 = vcmp.eq.s32.totalorder %v1423_v11, %v1367_v4  ;;  %vm619_vm7 = vcmp.eq.s32.totalorder %v1423_v11, %v1369_v5 }
 0x265   :  { %v1391_v20 = vpop.xlane.xlu1 %433  ;;  %v628_v2 = vsel %vm616_vm6, %v1308_v41, 0.0 }
 0x266   :  { %1042 = vpow2.f32 %v469_v18  ;;  %v473_v21 = vmul.f32 1.442695, %v457_v19  ;;  %v458_v22 = vsub.f32 %v1308_v41, %v1391_v20  ;;  %v650_v4 = vsel %vm416_vm0, %v628_v2, 0.0 }
 0x267   :  { %v1395_v23 = vpop.xlane.xlu0 %439 }
 0x268   :  { %1044 = vpow2.f32 %v473_v21  ;;  %v475_v24 = vmul.f32 1.442695, %v458_v22  ;;  %v460_v25 = vsub.f32 %v1316_v45, %v1395_v23  ;;  %v624_v22 = vsel %vm612_vm1, %v1294_v26, 0.0 }
 0x26a   :  { %1046 = vpow2.f32 %v475_v24  ;;  %v479_v27 = vmul.f32 1.442695, %v460_v25  ;;  %v1399_v28 = vpop.xlane.xlu1 %445 }
 0x26b   :  { %v1037_v30 = vpop.eup %1036  ;;  %v462_v31 = vsub.f32 %v1324_v49, %v1399_v28  ;;  %v1403_v33 = vpop.xlane.xlu0 %436 }
 0x26c   :  { %1048 = vpow2.f32 %v479_v27  ;;  %v459_v34 = vsub.f32 %v1322_v48, %v1403_v33  ;;  %v492_v35 = vsel %vm416_vm0, %v1037_v30, 0.0  ;;  %v638_v27 = vsel %vm416_vm0, %v624_v22, 0.0 }
 0x26d   :  { %v483_v36 = vmul.f32 1.442695, %v462_v31  ;;  %493 = vadd.xlane.f32.xlu0 %v492_v35 }
 0x26e   :  { %v477_v38 = vmul.f32 1.442695, %v459_v34  ;;  %v1408_v39 = vpop.xlane.xlu1 %451  ;;  %v623_v34 = vsel %vm611_vm2, %v1298_v29, 0.0  ;;  %v626_v29 = vsel %vm614_vm4, %v1300_v32, 0.0 }
 0x26f   :  { %1050 = vpow2.f32 %v483_v36  ;;  %v464_v40 = vsub.f32 %v1332_v53, %v1408_v39  ;;  %v1412_v42 = vpop.xlane.xlu0 %442  ;;  %v1039_v44 = vpop.eup %1038  ;;  %v635_v36 = vsel %vm416_vm0, %v623_v34, 0.0 }
 0x270   :  { %1052 = vpow2.f32 %v477_v38  ;;  %v461_v46 = vsub.f32 %v1330_v52, %v1412_v42  ;;  %v489_v50 = vsel %vm416_vm0, %v1039_v44, 0.0  ;;  %v1041_v51 = vpop.eup %1040  ;;  %v625_v38 = vsel %vm613_vm3, %v1306_v37, 0.0 }
 0x271   :  { %v487_v47 = vmul.f32 1.442695, %v464_v40  ;;  %490 = vadd.xlane.f32.xlu1 %v489_v50  ;;  %v498_v7 = vsel %vm416_vm0, %v1041_v51, 0.0  ;;  %v641_v0 = vsel %vm416_vm0, %v625_v38, 0.0  ;;  %v644_v40 = vsel %vm416_vm0, %v626_v29, 0.0 }
 0x272   :  { %v481_v54 = vmul.f32 1.442695, %v461_v46  ;;  %v1417_v56 = vpop.xlane.xlu1 %448  ;;  %v627_v44 = vsel %vm615_vm5, %v1312_v43, 0.0  ;;  %v631_v46 = vsel %vm619_vm7, %v1330_v52, 0.0 }
 0x273   :  { %v1043_v57 = vpop.eup %1042  ;;  %v463_v59 = vsub.f32 %v1336_v55, %v1417_v56  ;;  %v647_v32 = vsel %vm416_vm0, %v627_v44, 0.0  ;;  %v659_v41 = vsel %vm416_vm0, %v631_v46, 0.0 }
 0x274   :  { %1054 = vpow2.f32 %v481_v54  ;;  %v495_v60 = vsel %vm416_vm0, %v1043_v57, 0.0 }
 0x275   :  { %v1045_v61 = vpop.eup %1044  ;;  %1056 = vpow2.f32 %v487_v47  ;;  %v485_v62 = vmul.f32 1.442695, %v463_v59  ;;  %496 = vadd.xlane.f32.xlu0 %v495_v60  ;;  %499 = vadd.xlane.f32.xlu1 %v498_v7 }
 0x276   :  { %v501_v13 = vsel %vm416_vm0, %v1045_v61, 0.0  ;;  %v604_v26 = vpop.permute.xlu1 %603 }
 0x277   :  { %v1047_v8 = vpop.eup %1046  ;;  %1058 = vpow2.f32 %v485_v62  ;;  %v607_v37 = vpop.permute.xlu0 %606  ;;  %vm620_vm8 = vcmp.eq.s32.totalorder %v1423_v11, %v604_v26 }
 0x278   :  { %v504_v12 = vsel %vm416_vm0, %v1047_v8, 0.0  ;;  %v632_v43 = vsel %vm620_vm8, %v1324_v49, 0.0  ;;  %vm621_vm10 = vcmp.eq.s32.totalorder %v1423_v11, %v607_v37 }
 0x279   :  { %v1049_v14 = vpop.eup %1048  ;;  %502 = vadd.xlane.f32.xlu0 %v501_v13  ;;  %505 = vadd.xlane.f32.xlu1 %v504_v12  ;;  %v662_v50 = vsel %vm416_vm0, %v632_v43, 0.0  ;;  %v633_v52 = vsel %vm621_vm10, %v1336_v55, 0.0 }
 0x27a   :  { %v510_v18 = vsel %vm416_vm0, %v1049_v14, 0.0  ;;  %v595_v1 = vpop.permute.xlu1 %594  ;;  %v665_v54 = vsel %vm416_vm0, %v633_v52, 0.0 }
 0x27b   :  { %vm617_vm9 = vcmp.eq.s32.totalorder %v1423_v11, %v595_v1  ;;  %v610_v47 = vpop.permute.xlu0 %609 }
 0x27c   :  { %v1051_v16 = vpop.eup %1050  ;;  %v629_v51 = vsel %vm617_vm9, %v1322_v48, 0.0  ;;  %vm622_vm12 = vcmp.eq.s32.totalorder %v1423_v11, %v610_v47 }
 0x27d   :  { %v1053_v19 = vpop.eup %1052  ;;  %v516_v21 = vsel %vm416_vm0, %v1051_v16, 0.0  ;;  %511 = vadd.xlane.f32.xlu0 %v510_v18  ;;  %v653_v49 = vsel %vm416_vm0, %v629_v51, 0.0  ;;  %v634_v58 = vsel %vm622_vm12, %v1332_v53, 0.0 }
 0x27e   :  { %517 = vadd.xlane.f32.xlu1 %v516_v21  ;;  %v507_v24 = vsel %vm416_vm0, %v1053_v19, 0.0  ;;  %v598_v5 = vpop.permute.xlu1 %597  ;;  %v668_v48 = vsel %vm416_vm0, %v634_v58, 0.0 }
 0x27f   :  { %vm618_vm11 = vcmp.eq.s32.totalorder %v1423_v11, %v598_v5 }
 0x280   :  { %v630_v57 = vsel %vm618_vm11, %v1316_v45, 0.0 }
 0x281   :  { %v1055_v25 = vpop.eup %1054  ;;  %508 = vadd.xlane.f32.xlu0 %v507_v24  ;;  %v656_v59 = vsel %vm416_vm0, %v630_v57, 0.0 }
 0x282   :  { %v1057_v30 = vpop.eup %1056  ;;  %639 = vadd.xlane.f32.xlu1 %v638_v27  ;;  %v513_v63 = vsel %vm416_vm0, %v1055_v25, 0.0 }
 0x283   :  { %v522_v31 = vsel %vm416_vm0, %v1057_v30, 0.0 }
 0x284   :  { %v1059_v35 = vpop.eup %1058 }
 0x285   :  { %514 = vadd.xlane.f32.xlu0 %v513_v63  ;;  %v519_v3 = vsel %vm416_vm0, %v1059_v35, 0.0 }
 0x286   :  { %523 = vadd.xlane.f32.xlu1 %v522_v31 }
 0x289   :  { %636 = vadd.xlane.f32.xlu0 %v635_v36 }
 0x28a   :  { %520 = vadd.xlane.f32.xlu1 %v519_v3 }
 0x28d   :  { %642 = vadd.xlane.f32.xlu0 %v641_v0 }
 0x28e   :  { %645 = vadd.xlane.f32.xlu1 %v644_v40 }
 0x291   :  { %648 = vadd.xlane.f32.xlu0 %v647_v32 }
 0x292   :  { %651 = vadd.xlane.f32.xlu1 %v650_v4 }
 0x295   :  { %660 = vadd.xlane.f32.xlu0 %v659_v41 }
 0x296   :  { %663 = vadd.xlane.f32.xlu1 %v662_v50 }
 0x299   :  { %654 = vadd.xlane.f32.xlu0 %v653_v49 }
 0x29a   :  { %666 = vadd.xlane.f32.xlu1 %v665_v54 }
 0x29d   :  { %657 = vadd.xlane.f32.xlu0 %v656_v59 }
 0x29e   :  { %669 = vadd.xlane.f32.xlu1 %v668_v48 }
 0x2f6   :  { %v494_v60 = vpop.xlane.xlu0 %493 }
 0x2f7   :  { %1060 = vlog2.f32 %v494_v60 }
 0x2fa   :  { %v491_v55 = vpop.xlane.xlu1 %490 }
 0x2fb   :  { %1062 = vlog2.f32 %v491_v55 }
 0x2fe   :  { %v497_v61 = vpop.xlane.xlu0 %496  ;;  %v500_v62 = vpop.xlane.xlu1 %499 }
 0x2ff   :  { %1064 = vlog2.f32 %v497_v61 }
 0x300   :  { %1066 = vlog2.f32 %v500_v62 }
 0x302   :  { %v503_v7 = vpop.xlane.xlu0 %502  ;;  %v506_v8 = vpop.xlane.xlu1 %505 }
 0x303   :  { %1068 = vlog2.f32 %v503_v7 }
 0x304   :  { %v1061_v53 = vpop.eup %1060  ;;  %1070 = vlog2.f32 %v506_v8 }
 0x305   :  { %v528_v16 = vmul.f32 0.6931472, %v1061_v53 }
 0x306   :  { %v512_v45 = vpop.xlane.xlu0 %511 }
 0x307   :  { %v518_v11 = vpop.xlane.xlu1 %517  ;;  %v550_v27 = vadd.f32 %v528_v16, %v1371_v6 }
 0x308   :  { %v1063_v12 = vpop.eup %1062  ;;  %1072 = vlog2.f32 %v518_v11 }
 0x309   :  { %v526_v18 = vmul.f32 0.6931472, %v1063_v12 }
 0x30a   :  { %v509_v13 = vpop.xlane.xlu0 %508 }
 0x30b   :  { %v640_v14 = vpop.xlane.xlu1 %639  ;;  %1074 = vlog2.f32 %v509_v13  ;;  %v549_v30 = vadd.f32 %v526_v18, %v1377_v10 }
 0x30c   :  { %v1065_v19 = vpop.eup %1064  ;;  %v672_v35 = vsub.f32 %v550_v27, %v640_v14 }
 0x30d   :  { %v1067_v24 = vpop.eup %1066  ;;  %v530_v25 = vmul.f32 0.6931472, %v1065_v19 }
 0x30e   :  { %v515_v21 = vpop.xlane.xlu0 %514  ;;  %v532_v34 = vmul.f32 0.6931472, %v1067_v24  ;;  %v722_v1 = vsel %vm720_vm13, %v672_v35, 0.0 }
 0x30f   :  { %v524_v22 = vpop.xlane.xlu1 %523  ;;  %1076 = vlog2.f32 %v515_v21  ;;  %v551_v29 = vadd.f32 %v530_v25, %v1383_v15 }
 0x310   :  { %1078 = vlog2.f32 %v512_v45  ;;  %v1069_v63 = vpop.eup %1068  ;;  %v552_v6 = vadd.f32 %v532_v34, %v1375_v9 }
 0x311   :  { %1080 = vlog2.f32 %v524_v22  ;;  %v534_v3 = vmul.f32 0.6931472, %v1069_v63  ;;  %v1071_v44 = vpop.eup %1070 }
 0x312   :  { %v637_v31 = vpop.xlane.xlu0 %636  ;;  %v536_v41 = vmul.f32 0.6931472, %v1071_v44 }
 0x313   :  { %v521_v26 = vpop.xlane.xlu1 %520  ;;  %v671_v36 = vsub.f32 %v549_v30, %v637_v31  ;;  %v553_v46 = vadd.f32 %v534_v3, %v1387_v17 }
 0x314   :  { %1082 = vlog2.f32 %v521_v26  ;;  %v554_v60 = vadd.f32 %v536_v41, %v1391_v20 }
 0x315   :  { %v721_v38 = vsel %vm720_vm13, %v671_v36, 0.0  ;;  %v1073_v2 = vpop.eup %1072 }
 0x316   :  { %v643_v0 = vpop.xlane.xlu0 %642  ;;  %v723_v37 = vadd.f32 %v722_v1, %v721_v38  ;;  %v544_v52 = vmul.f32 0.6931472, %v1073_v2 }
 0x317   :  { %v646_v10 = vpop.xlane.xlu1 %645  ;;  %v673_v40 = vsub.f32 %v551_v29, %v643_v0 }
 0x318   :  { %v674_v32 = vsub.f32 %v552_v6, %v646_v10  ;;  %v1075_v43 = vpop.eup %1074  ;;  %v558_v62 = vadd.f32 %v544_v52, %v1399_v28 }
 0x319   :  { %v724_v4 = vsel %vm720_vm13, %v673_v40, 0.0  ;;  %v538_v49 = vmul.f32 0.6931472, %v1075_v43 }
 0x31a   :  { %v725_v5 = vadd.f32 %v724_v4, %v723_v37  ;;  %v649_v47 = vpop.xlane.xlu0 %648  ;;  %v726_v54 = vsel %vm720_vm13, %v674_v32, 0.0 }
 0x31b   :  { %v652_v15 = vpop.xlane.xlu1 %651  ;;  %v675_v50 = vsub.f32 %v553_v46, %v649_v47  ;;  %v555_v53 = vadd.f32 %v538_v49, %v1403_v33 }
 0x31c   :  { %v1077_v51 = vpop.eup %1076  ;;  %v727_v58 = vadd.f32 %v726_v54, %v725_v5  ;;  %v676_v45 = vsub.f32 %v554_v60, %v652_v15 }
 0x31d   :  { %v542_v9 = vmul.f32 0.6931472, %v1077_v51  ;;  %v1079_v57 = vpop.eup %1078  ;;  %v728_v17 = vsel %vm720_vm13, %v675_v50, 0.0 }
 0x31e   :  { %v661_v59 = vpop.xlane.xlu0 %660  ;;  %v1081_v48 = vpop.eup %1080  ;;  %v540_v8 = vmul.f32 0.6931472, %v1079_v57  ;;  %v729_v14 = vadd.f32 %v728_v17, %v727_v58 }
 0x31f   :  { %v664_v55 = vpop.xlane.xlu1 %663  ;;  %v557_v61 = vadd.f32 %v542_v9, %v1412_v42  ;;  %v548_v12 = vmul.f32 0.6931472, %v1081_v48  ;;  %v730_v42 = vsel %vm720_vm13, %v676_v45, 0.0 }
 0x320   :  { %v680_v16 = vsub.f32 %v558_v62, %v664_v55  ;;  %v556_v24 = vadd.f32 %v540_v8, %v1395_v23  ;;  %v731_v63 = vadd.f32 %v730_v42, %v729_v14 }
 0x321   :  { %v1083_v7 = vpop.eup %1082  ;;  %v679_v11 = vsub.f32 %v557_v61, %v661_v59  ;;  %v560_v27 = vadd.f32 %v548_v12, %v1408_v39 }
 0x322   :  { %v546_v13 = vmul.f32 0.6931472, %v1083_v7  ;;  %v655_v18 = vpop.xlane.xlu0 %654  ;;  %v787_v25 = vsel %vm720_vm13, %v680_v16, 0.0 }
 0x323   :  { %v667_v19 = vpop.xlane.xlu1 %666  ;;  %v677_v20 = vsub.f32 %v555_v53, %v655_v18  ;;  %v785_v21 = vsel %vm720_vm13, %v679_v11, 0.0 }
 0x324   :  { %v559_v22 = vadd.f32 %v546_v13, %v1417_v56  ;;  %v788_v31 = vadd.f32 %v787_v25, %v785_v21 }
 0x325   :  { %v732_v28 = vsel %vm720_vm13, %v677_v20, 0.0 }
 0x326   :  { %v681_v33 = vsub.f32 %v559_v22, %v667_v19  ;;  %v658_v30 = vpop.xlane.xlu0 %657  ;;  %v733_v56 = vadd.f32 %v732_v28, %v731_v63 }
 0x327   :  { %v670_v34 = vpop.xlane.xlu1 %669  ;;  %v678_v35 = vsub.f32 %v556_v24, %v658_v30 }
 0x328   :  { %v789_v26 = vsel %vm720_vm13, %v681_v33, 0.0  ;;  %v682_v36 = vsub.f32 %v560_v27, %v670_v34 }
 0x329   :  { %v790_v3 = vadd.f32 %v789_v26, %v788_v31  ;;  %v734_v38 = vsel %vm720_vm13, %v678_v35, 0.0 }
 0x32a   :  { %v791_v29 = vsel %vm720_vm13, %v682_v36, 0.0  ;;  %v735_v23 = vadd.f32 %v734_v38, %v733_v56 }
 0x32b   :  { %v792_v0 = vadd.f32 %v791_v29, %v790_v3 }
 0x32c   :  { %744 = vadd.xlane.f32.xlu0 %v735_v23 }
 0x32d   :  { %793 = vadd.xlane.f32.xlu1 %v792_v0 }
 0x3b5   :  { %v745_v1 = vpop.xlane.xlu0 %744 }
 0x3b6   :  { %v794_v39 = vpop.xlane.xlu1 %793  ;;  %v746_v6 = vrot.slane %v745_v1, 4 }
 0x3b7   :  { %v795_v10 = vrot.slane %v794_v39, 4 }
 0x3b8   :  { %v747_v40 = vadd.f32 %v746_v6, %v745_v1 }
 0x3b9   :  { %v796_v44 = vadd.f32 %v795_v10, %v794_v39 }
 0x3ba   :  { %v748_v37 = vrot.slane %v747_v40, 2 }
 0x3bb   :  { %v797_v2 = vrot.slane %v796_v44, 2 }
 0x3bc   :  { %v749_v32 = vadd.f32 %v748_v37, %v747_v40 }
 0x3bd   :  { %v798_v4 = vadd.f32 %v797_v2, %v796_v44 }
 0x3be   :  { %v750_v46 = vrot.slane %v749_v32, 1 }
 0x3bf   :  { %v799_v43 = vrot.slane %v798_v4, 1 }
 0x3c0   :  { %v751_v5 = vadd.f32 %v750_v46, %v749_v32 }
 0x3c1   :  { %v800_v47 = vadd.f32 %v799_v43, %v798_v4 }
 0x3c2   :  { %980 = vpush %v751_v5 }
 0x3c3   :  { %982 = vpush %v800_v47 }
 0x3f3   :  { %s981_s11 = spop %980 }
 0x3f4   :  { %s755_s12 = smul.f32 0.015625, %s981_s11  ;;  %s983_s13 = spop %982 }
 0x3f5   :  { %s804_s14 = smul.f32 0.03125, %s983_s13 }
 0x3f6   :  { %757 = sst [smem:[#allocation2]] %s755_s12 }
 0x3f7   :  { %806 = sst [smem:[#allocation2 + $0x1]] %s804_s14 }
 0x3f8   :  { %1095 = shalt.err (!%p1092_p4)
}
 0x3f9   :  { %s1099_s3 = smov [#allocation2]  }
 0x3fa   :  { %816 = dma.smem_to_vmem %s1099_s3, 16, %s814_s1, [#allocation3]  }
 0x3fb   :  { %1096 = dma.done.wait [#allocation3], 16  }
 0x3fc   :  { %1097 = vsyncadd [#allocation3], 4294967280 }
 0x3fd   :  { %820 = sfence }
 0x3fe   :  { %821 = vsyncpa [#allocation3], 1 }

</bundles_post_ra>
